<compile_context>
chip_gen: v6e
topology: v6e:2x2x1
jax: 0.10.0
libtpu: 0.0.40
codegen_flags: <defaults>
</compile_context>

<pallas_src>
import functools

import jax
import jax.numpy as jnp
from jax.experimental import pallas as pl
from jax.experimental.pallas import tpu as pltpu


# ----------------------------- Pallas kernel ------------------------------ #
def _convgnup_kernel(x_ref, w_ref, gamma_ref, beta_ref, o_ref, *,
                     H, W, Cout, num_group, group_size, eps):
    """One batch element per grid step.

    x_ref:     (1, H+2, W+2, Cin)  zero-padded NHWC input (compute dtype)
    w_ref:     (9, Cin, Cout)      conv weights, tap-major (t = dy*3 + dx)
    gamma_ref: (1, Cout)           GroupNorm scale (f32)
    beta_ref:  (1, Cout)           GroupNorm shift (f32)
    o_ref:     (1, 4, H*W, Cout)   parity-split upsampled output:
                                   o[2*hp+wp, h*W+w, c] = out[2h+hp, 2w+wp, c]
    """
    HW = H * W
    xp = x_ref[0]                                   # (H+2, W+2, Cin)

    # ---- 3x3 conv: 9 shifted-slice matmuls, f32 accumulate on the MXU ----
    acc = None
    for dx in range(3):
        xdx = xp[:, dx:dx + W, :]                   # one sublane shift per dx
        for dy in range(3):
            tap = xdx[dy:dy + H].reshape(HW, xdx.shape[-1])     # (HW, Cin)
            part = jnp.dot(tap, w_ref[dy * 3 + dx],
                           preferred_element_type=jnp.float32)  # (HW, Cout)
            acc = part if acc is None else acc + part

    # ---- GroupNorm (centered two-pass stats; gamma folded into scale) ----
    n_elem = float(HW * group_size)
    ch_sum = jnp.sum(acc, axis=0, keepdims=True)                # (1, Cout)
    if group_size == 1:
        mean_c = ch_sum * (1.0 / n_elem)
    else:
        g_mean = (ch_sum.reshape(num_group, group_size)
                  .sum(axis=1, keepdims=True)) * (1.0 / n_elem)
        mean_c = jnp.broadcast_to(
            g_mean, (num_group, group_size)).reshape(1, Cout)

    d = acc - mean_c
    ch_sq = jnp.sum(d * d, axis=0, keepdims=True)               # (1, Cout)
    if group_size == 1:
        var_c = ch_sq * (1.0 / n_elem)
    else:
        g_var = (ch_sq.reshape(num_group, group_size)
                 .sum(axis=1, keepdims=True)) * (1.0 / n_elem)
        var_c = jnp.broadcast_to(
            g_var, (num_group, group_size)).reshape(1, Cout)

    scale = jax.lax.rsqrt(var_c + eps) * gamma_ref[...]
    y = jnp.maximum(d * scale + beta_ref[...], 0.0)             # GN + ReLU

    # ---- 2x bilinear upsample (align_corners=False) as 2-tap stencils ----
    # Pixel-major layout kept throughout: neighbours in w are +-1 sublane
    # rows, neighbours in h are +-W sublane rows.  Boundary handling matches
    # PyTorch's src-coordinate clamp (first/last output row/col copy input).
    wpos = jax.lax.broadcasted_iota(jnp.int32, (HW, Cout), 0) % W
    prev_w = jnp.concatenate([y[:1], y[:-1]], axis=0)       # col w-1 (wrap fixed)
    prev_w = jnp.where(wpos == 0, y, prev_w)                 # out col 0 = col 0
    next_w = jnp.concatenate([y[1:], y[-1:]], axis=0)        # col w+1
    next_w = jnp.where(wpos == W - 1, y, next_w)             # out col 2W-1 = col W-1
    we = 0.75 * y + 0.25 * prev_w                            # output cols 2w
    wo = 0.75 * y + 0.25 * next_w                            # output cols 2w+1

    def up_h(t):
        ph = jnp.concatenate([t[:W], t[:-W]], axis=0)        # row h-1 (h=0 -> self)
        nh = jnp.concatenate([t[W:], t[-W:]], axis=0)        # row h+1 (h=H-1 -> self)
        return 0.75 * t + 0.25 * ph, 0.75 * t + 0.25 * nh    # rows 2h, rows 2h+1

    q00, q10 = up_h(we)          # (h even, w even), (h odd, w even)
    q01, q11 = up_h(wo)          # (h even, w odd),  (h odd, w odd)

    odt = o_ref.dtype
    o_ref[0, 0] = q00.astype(odt)
    o_ref[0, 1] = q01.astype(odt)
    o_ref[0, 2] = q10.astype(odt)
    o_ref[0, 3] = q11.astype(odt)


# ------------------------------ host wrapper ------------------------------ #
def conv_gn_up2d(x_nchw, weight_oihw, gamma, beta, *, num_group=32, eps=1e-5,
                 compute_dtype=jnp.bfloat16):
    """Matches ConvGnUp2d.forward. x: (N, Cin, H, W) -> (N, Cout, 2H, 2W)."""
    N, Cin, H, W = x_nchw.shape
    Cout = weight_oihw.shape[0]
    assert Cout % num_group == 0
    group_size = Cout // num_group

    # Layout glue only (no arithmetic): NCHW -> NHWC, zero pad, pack weights.
    x_nhwc = jnp.transpose(x_nchw, (0, 2, 3, 1))
    xpad = jnp.pad(x_nhwc, ((0, 0), (1, 1), (1, 1), (0, 0))).astype(compute_dtype)
    w9 = (jnp.transpose(weight_oihw, (2, 3, 1, 0))        # (3,3,Cin,Cout)
          .reshape(9, Cin, Cout).astype(compute_dtype))   # t = dy*3 + dx
    gamma2 = gamma.reshape(1, Cout).astype(jnp.float32)
    beta2 = beta.reshape(1, Cout).astype(jnp.float32)

    kernel = functools.partial(_convgnup_kernel, H=H, W=W, Cout=Cout,
                               num_group=num_group, group_size=group_size,
                               eps=eps)
    out = pl.pallas_call(
        kernel,
        out_shape=jax.ShapeDtypeStruct((N, 4, H * W, Cout), jnp.float32),
        grid_spec=pltpu.PrefetchScalarGridSpec(
            num_scalar_prefetch=0,
            grid=(N,),
            in_specs=[
                pl.BlockSpec((1, H + 2, W + 2, Cin), lambda n: (n, 0, 0, 0)),
                pl.BlockSpec((9, Cin, Cout), lambda n: (0, 0, 0)),
                pl.BlockSpec((1, Cout), lambda n: (0, 0)),
                pl.BlockSpec((1, Cout), lambda n: (0, 0)),
            ],
            out_specs=pl.BlockSpec((1, 4, H * W, Cout), lambda n: (n, 0, 0, 0)),
        ),
        compiler_params=pltpu.CompilerParams(
            dimension_semantics=("parallel",),
            vmem_limit_bytes=64 * 1024 * 1024),
    )(xpad, w9, gamma2, beta2)

    # Parity-split slab -> NCHW.  The single transpose below is the
    # NHWC->NCHW permutation the module interface needs anyway; it also
    # undoes the parity split (layout plumbing outside the kernel).
    out = out.reshape(N, 2, 2, H, W, Cout)            # (n, hp, wp, h, w, c)
    out = jnp.transpose(out, (0, 5, 3, 1, 4, 2))      # (n, c, h, hp, w, wp)
    return out.reshape(N, Cout, 2 * H, 2 * W)


# --------------------------- pure-JAX reference ---------------------------- #
def _bilinear_matrix(in_size):
    """Interp matrix U (2*in, in) for scale_factor=2, align_corners=False
    (PyTorch convention: src = (dst+0.5)/2 - 0.5, clamped to >= 0)."""
    out_size = 2 * in_size
    o = jnp.arange(out_size, dtype=jnp.float32)
    src = jnp.maximum((o + 0.5) * 0.5 - 0.5, 0.0)
    i0 = jnp.minimum(jnp.floor(src).astype(jnp.int32), in_size - 1)
    i1 = jnp.minimum(i0 + 1, in_size - 1)
    w1 = src - i0.astype(jnp.float32)
    w0 = 1.0 - w1
    U = jnp.zeros((out_size, in_size), jnp.float32)
    U = U.at[jnp.arange(out_size), i0].add(w0)
    U = U.at[jnp.arange(out_size), i1].add(w1)
    return U


def _reference(x_nchw, weight_oihw, gamma, beta, num_group, eps=1e-5):
    hi = jax.lax.Precision.HIGHEST
    y = jax.lax.conv_general_dilated(
        x_nchw, weight_oihw, window_strides=(1, 1),
        padding=((1, 1), (1, 1)),
        dimension_numbers=("NCHW", "OIHW", "NCHW"), precision=hi)
    N, C, H, W = y.shape
    yg = y.reshape(N, num_group, -1)
    mean = yg.mean(axis=2, keepdims=True)
    var = yg.var(axis=2, keepdims=True)
    yn = ((yg - mean) / jnp.sqrt(var + eps)).reshape(N, C, H, W)
    yn = yn * gamma[None, :, None, None] + beta[None, :, None, None]
    yn = jnp.maximum(yn, 0.0)
    Uh, Uw = _bilinear_matrix(H), _bilinear_matrix(W)
    up = jnp.einsum("oh,nchw->ncow", Uh, yn, precision=hi)
    up = jnp.einsum("pw,ncow->ncop", Uw, up, precision=hi)
    return up


if __name__ == "__main__":
    # small shapes: batch=2, in_channel=4, out_channel=32 (num_group=32 default)
    N, Cin, H, W = 2, 4, 16, 16
    Cout, G = 32, 32

    key = jax.random.PRNGKey(0)
    kx, kw, kg, kb = jax.random.split(key, 4)
    x = jax.random.normal(kx, (N, Cin, H, W), jnp.float32)
    weight = jax.random.normal(kw, (Cout, Cin, 3, 3), jnp.float32) * 0.1
    gamma = 1.0 + 0.1 * jax.random.normal(kg, (Cout,), jnp.float32)
    beta = 0.1 * jax.random.normal(kb, (Cout,), jnp.float32)

    ref = _reference(x, weight, gamma, beta, num_group=G)

    # f32-operand path (tolerance-sensitive callers).
    run_f32 = jax.jit(functools.partial(conv_gn_up2d, num_group=G,
                                        compute_dtype=jnp.float32))
    out32 = jax.block_until_ready(run_f32(x, weight, gamma, beta))
    assert out32.shape == (N, Cout, 2 * H, 2 * W), out32.shape
    err32 = float(jnp.max(jnp.abs(out32 - ref)))
    assert jnp.allclose(out32, ref, atol=2e-3, rtol=2e-3), err32

    # default path: bf16 MXU operands, f32 accumulation (looser tolerance,
    # inputs lose mantissa but the conv accumulate stays f32).
    run_bf16 = jax.jit(functools.partial(conv_gn_up2d, num_group=G,
                                         compute_dtype=jnp.bfloat16))
    out16 = jax.block_until_ready(run_bf16(x, weight, gamma, beta))
    assert out16.shape == (N, Cout, 2 * H, 2 * W), out16.shape
    err16 = float(jnp.max(jnp.abs(out16 - ref)))
    assert jnp.allclose(out16, ref, atol=8e-2, rtol=8e-2), err16

    print("KERNEL_OK")
</pallas_src>

<mosaic_0001>
module attributes {stable_mosaic.version = 11 : i64} {
  func.func @_convgnup_kernel(%arg0: i32, %arg1: memref<1x18x18x4xf32, #tpu.memory_space<vmem>>, %arg2: memref<9x4x32xf32, #tpu.memory_space<vmem>>, %arg3: memref<1x32xf32, #tpu.memory_space<vmem>>, %arg4: memref<1x32xf32, #tpu.memory_space<vmem>>, %arg5: memref<1x4x256x32xf32, #tpu.memory_space<vmem>>) attributes {dimension_semantics = [#tpu.dimension_semantics<parallel>], iteration_bounds = array<i64: 2>, scalar_prefetch = 0 : i64, scratch_operands = 0 : i64, tpu.core_type = #tpu.core_type<tc>, window_params = [{transform_indices = @transform_0, window_bounds = array<i64: 1, 18, 18, 4>}, {pipeline_mode = #tpu.pipeline_mode<synchronous>, transform_indices = @transform_1, window_bounds = array<i64: 9, 4, 32>}, {pipeline_mode = #tpu.pipeline_mode<synchronous>, transform_indices = @transform_2, window_bounds = array<i64: 1, 32>}, {pipeline_mode = #tpu.pipeline_mode<synchronous>, transform_indices = @transform_3, window_bounds = array<i64: 1, 32>}, {transform_indices = @transform_4, window_bounds = array<i64: 1, 4, 256, 32>}]} {
    %c0 = arith.constant 0 : index
    %c0_0 = arith.constant 0 : index
    %c0_1 = arith.constant 0 : index
    %c0_2 = arith.constant 0 : index
    %0 = vector.load %arg1[%c0, %c0_0, %c0_1, %c0_2] : memref<1x18x18x4xf32, #tpu.memory_space<vmem>>, vector<1x18x18x4xf32>
    %1 = vector.shape_cast %0 : vector<1x18x18x4xf32> to vector<18x18x4xf32>
    %2 = vector.extract_strided_slice %1 {offsets = [0, 0, 0], sizes = [18, 16, 4], strides = [1, 1, 1]} : vector<18x18x4xf32> to vector<18x16x4xf32>
    %3 = vector.extract_strided_slice %2 {offsets = [0, 0, 0], sizes = [16, 16, 4], strides = [1, 1, 1]} : vector<18x16x4xf32> to vector<16x16x4xf32>
    %4 = vector.shape_cast %3 : vector<16x16x4xf32> to vector<256x4xf32>
    %c0_3 = arith.constant 0 : index
    %c0_4 = arith.constant 0 : index
    %c0_5 = arith.constant 0 : index
    %5 = vector.load %arg2[%c0_3, %c0_4, %c0_5] : memref<9x4x32xf32, #tpu.memory_space<vmem>>, vector<1x4x32xf32>
    %6 = vector.shape_cast %5 : vector<1x4x32xf32> to vector<4x32xf32>
    %cst = arith.constant dense<0.000000e+00> : vector<256x32xf32>
    %7 = tpu.matmul %4, %6, %cst {dimension_numbers = #tpu.dot_dimension_numbers<[1], [0], [0], [1], [0, 0, 1, 1], [], []>} : vector<256x4xf32>, vector<4x32xf32>, vector<256x32xf32> -> vector<256x32xf32>
    %8 = vector.extract_strided_slice %2 {offsets = [1, 0, 0], sizes = [16, 16, 4], strides = [1, 1, 1]} : vector<18x16x4xf32> to vector<16x16x4xf32>
    %9 = vector.shape_cast %8 : vector<16x16x4xf32> to vector<256x4xf32>
    %c3 = arith.constant 3 : index
    %c0_6 = arith.constant 0 : index
    %c0_7 = arith.constant 0 : index
    %10 = vector.load %arg2[%c3, %c0_6, %c0_7] : memref<9x4x32xf32, #tpu.memory_space<vmem>>, vector<1x4x32xf32>
    %11 = vector.shape_cast %10 : vector<1x4x32xf32> to vector<4x32xf32>
    %cst_8 = arith.constant dense<0.000000e+00> : vector<256x32xf32>
    %12 = tpu.matmul %9, %11, %cst_8 {dimension_numbers = #tpu.dot_dimension_numbers<[1], [0], [0], [1], [0, 0, 1, 1], [], []>} : vector<256x4xf32>, vector<4x32xf32>, vector<256x32xf32> -> vector<256x32xf32>
    %13 = arith.addf %7, %12 : vector<256x32xf32>
    %14 = vector.extract_strided_slice %2 {offsets = [2, 0, 0], sizes = [16, 16, 4], strides = [1, 1, 1]} : vector<18x16x4xf32> to vector<16x16x4xf32>
    %15 = vector.shape_cast %14 : vector<16x16x4xf32> to vector<256x4xf32>
    %c6 = arith.constant 6 : index
    %c0_9 = arith.constant 0 : index
    %c0_10 = arith.constant 0 : index
    %16 = vector.load %arg2[%c6, %c0_9, %c0_10] : memref<9x4x32xf32, #tpu.memory_space<vmem>>, vector<1x4x32xf32>
    %17 = vector.shape_cast %16 : vector<1x4x32xf32> to vector<4x32xf32>
    %cst_11 = arith.constant dense<0.000000e+00> : vector<256x32xf32>
    %18 = tpu.matmul %15, %17, %cst_11 {dimension_numbers = #tpu.dot_dimension_numbers<[1], [0], [0], [1], [0, 0, 1, 1], [], []>} : vector<256x4xf32>, vector<4x32xf32>, vector<256x32xf32> -> vector<256x32xf32>
    %19 = arith.addf %13, %18 : vector<256x32xf32>
    %20 = vector.extract_strided_slice %1 {offsets = [0, 1, 0], sizes = [18, 16, 4], strides = [1, 1, 1]} : vector<18x18x4xf32> to vector<18x16x4xf32>
    %21 = vector.extract_strided_slice %20 {offsets = [0, 0, 0], sizes = [16, 16, 4], strides = [1, 1, 1]} : vector<18x16x4xf32> to vector<16x16x4xf32>
    %22 = vector.shape_cast %21 : vector<16x16x4xf32> to vector<256x4xf32>
    %c1 = arith.constant 1 : index
    %c0_12 = arith.constant 0 : index
    %c0_13 = arith.constant 0 : index
    %23 = vector.load %arg2[%c1, %c0_12, %c0_13] : memref<9x4x32xf32, #tpu.memory_space<vmem>>, vector<1x4x32xf32>
    %24 = vector.shape_cast %23 : vector<1x4x32xf32> to vector<4x32xf32>
    %cst_14 = arith.constant dense<0.000000e+00> : vector<256x32xf32>
    %25 = tpu.matmul %22, %24, %cst_14 {dimension_numbers = #tpu.dot_dimension_numbers<[1], [0], [0], [1], [0, 0, 1, 1], [], []>} : vector<256x4xf32>, vector<4x32xf32>, vector<256x32xf32> -> vector<256x32xf32>
    %26 = arith.addf %19, %25 : vector<256x32xf32>
    %27 = vector.extract_strided_slice %20 {offsets = [1, 0, 0], sizes = [16, 16, 4], strides = [1, 1, 1]} : vector<18x16x4xf32> to vector<16x16x4xf32>
    %28 = vector.shape_cast %27 : vector<16x16x4xf32> to vector<256x4xf32>
    %c4 = arith.constant 4 : index
    %c0_15 = arith.constant 0 : index
    %c0_16 = arith.constant 0 : index
    %29 = vector.load %arg2[%c4, %c0_15, %c0_16] : memref<9x4x32xf32, #tpu.memory_space<vmem>>, vector<1x4x32xf32>
    %30 = vector.shape_cast %29 : vector<1x4x32xf32> to vector<4x32xf32>
    %cst_17 = arith.constant dense<0.000000e+00> : vector<256x32xf32>
    %31 = tpu.matmul %28, %30, %cst_17 {dimension_numbers = #tpu.dot_dimension_numbers<[1], [0], [0], [1], [0, 0, 1, 1], [], []>} : vector<256x4xf32>, vector<4x32xf32>, vector<256x32xf32> -> vector<256x32xf32>
    %32 = arith.addf %26, %31 : vector<256x32xf32>
    %33 = vector.extract_strided_slice %20 {offsets = [2, 0, 0], sizes = [16, 16, 4], strides = [1, 1, 1]} : vector<18x16x4xf32> to vector<16x16x4xf32>
    %34 = vector.shape_cast %33 : vector<16x16x4xf32> to vector<256x4xf32>
    %c7 = arith.constant 7 : index
    %c0_18 = arith.constant 0 : index
    %c0_19 = arith.constant 0 : index
    %35 = vector.load %arg2[%c7, %c0_18, %c0_19] : memref<9x4x32xf32, #tpu.memory_space<vmem>>, vector<1x4x32xf32>
    %36 = vector.shape_cast %35 : vector<1x4x32xf32> to vector<4x32xf32>
    %cst_20 = arith.constant dense<0.000000e+00> : vector<256x32xf32>
    %37 = tpu.matmul %34, %36, %cst_20 {dimension_numbers = #tpu.dot_dimension_numbers<[1], [0], [0], [1], [0, 0, 1, 1], [], []>} : vector<256x4xf32>, vector<4x32xf32>, vector<256x32xf32> -> vector<256x32xf32>
    %38 = arith.addf %32, %37 : vector<256x32xf32>
    %39 = vector.extract_strided_slice %1 {offsets = [0, 2, 0], sizes = [18, 16, 4], strides = [1, 1, 1]} : vector<18x18x4xf32> to vector<18x16x4xf32>
    %40 = vector.extract_strided_slice %39 {offsets = [0, 0, 0], sizes = [16, 16, 4], strides = [1, 1, 1]} : vector<18x16x4xf32> to vector<16x16x4xf32>
    %41 = vector.shape_cast %40 : vector<16x16x4xf32> to vector<256x4xf32>
    %c2 = arith.constant 2 : index
    %c0_21 = arith.constant 0 : index
    %c0_22 = arith.constant 0 : index
    %42 = vector.load %arg2[%c2, %c0_21, %c0_22] : memref<9x4x32xf32, #tpu.memory_space<vmem>>, vector<1x4x32xf32>
    %43 = vector.shape_cast %42 : vector<1x4x32xf32> to vector<4x32xf32>
    %cst_23 = arith.constant dense<0.000000e+00> : vector<256x32xf32>
    %44 = tpu.matmul %41, %43, %cst_23 {dimension_numbers = #tpu.dot_dimension_numbers<[1], [0], [0], [1], [0, 0, 1, 1], [], []>} : vector<256x4xf32>, vector<4x32xf32>, vector<256x32xf32> -> vector<256x32xf32>
    %45 = arith.addf %38, %44 : vector<256x32xf32>
    %46 = vector.extract_strided_slice %39 {offsets = [1, 0, 0], sizes = [16, 16, 4], strides = [1, 1, 1]} : vector<18x16x4xf32> to vector<16x16x4xf32>
    %47 = vector.shape_cast %46 : vector<16x16x4xf32> to vector<256x4xf32>
    %c5 = arith.constant 5 : index
    %c0_24 = arith.constant 0 : index
    %c0_25 = arith.constant 0 : index
    %48 = vector.load %arg2[%c5, %c0_24, %c0_25] : memref<9x4x32xf32, #tpu.memory_space<vmem>>, vector<1x4x32xf32>
    %49 = vector.shape_cast %48 : vector<1x4x32xf32> to vector<4x32xf32>
    %cst_26 = arith.constant dense<0.000000e+00> : vector<256x32xf32>
    %50 = tpu.matmul %47, %49, %cst_26 {dimension_numbers = #tpu.dot_dimension_numbers<[1], [0], [0], [1], [0, 0, 1, 1], [], []>} : vector<256x4xf32>, vector<4x32xf32>, vector<256x32xf32> -> vector<256x32xf32>
    %51 = arith.addf %45, %50 : vector<256x32xf32>
    %52 = vector.extract_strided_slice %39 {offsets = [2, 0, 0], sizes = [16, 16, 4], strides = [1, 1, 1]} : vector<18x16x4xf32> to vector<16x16x4xf32>
    %53 = vector.shape_cast %52 : vector<16x16x4xf32> to vector<256x4xf32>
    %c8 = arith.constant 8 : index
    %c0_27 = arith.constant 0 : index
    %c0_28 = arith.constant 0 : index
    %54 = vector.load %arg2[%c8, %c0_27, %c0_28] : memref<9x4x32xf32, #tpu.memory_space<vmem>>, vector<1x4x32xf32>
    %55 = vector.shape_cast %54 : vector<1x4x32xf32> to vector<4x32xf32>
    %cst_29 = arith.constant dense<0.000000e+00> : vector<256x32xf32>
    %56 = tpu.matmul %53, %55, %cst_29 {dimension_numbers = #tpu.dot_dimension_numbers<[1], [0], [0], [1], [0, 0, 1, 1], [], []>} : vector<256x4xf32>, vector<4x32xf32>, vector<256x32xf32> -> vector<256x32xf32>
    %57 = arith.addf %51, %56 : vector<256x32xf32>
    %cst_30 = arith.constant dense<0.000000e+00> : vector<32xf32>
    %58 = vector.multi_reduction <add>, %57, %cst_30 [0] : vector<256x32xf32> to vector<32xf32>
    %59 = vector.shape_cast %58 : vector<32xf32> to vector<1x32xf32>
    %cst_31 = arith.constant 3.906250e-03 : f32
    %60 = vector.broadcast %cst_31 : f32 to vector<1x32xf32>
    %61 = arith.mulf %59, %60 : vector<1x32xf32>
    %62 = vector.broadcast %61 : vector<1x32xf32> to vector<256x32xf32>
    %63 = arith.subf %57, %62 : vector<256x32xf32>
    %64 = arith.mulf %63, %63 : vector<256x32xf32>
    %cst_32 = arith.constant dense<0.000000e+00> : vector<32xf32>
    %65 = vector.multi_reduction <add>, %64, %cst_32 [0] : vector<256x32xf32> to vector<32xf32>
    %66 = vector.shape_cast %65 : vector<32xf32> to vector<1x32xf32>
    %cst_33 = arith.constant 3.906250e-03 : f32
    %67 = vector.broadcast %cst_33 : f32 to vector<1x32xf32>
    %68 = arith.mulf %66, %67 : vector<1x32xf32>
    %cst_34 = arith.constant 9.99999974E-6 : f32
    %69 = vector.broadcast %cst_34 : f32 to vector<1x32xf32>
    %70 = arith.addf %68, %69 : vector<1x32xf32>
    %71 = math.rsqrt %70 : vector<1x32xf32>
    %c0_35 = arith.constant 0 : index
    %c0_36 = arith.constant 0 : index
    %72 = vector.load %arg3[%c0_35, %c0_36] : memref<1x32xf32, #tpu.memory_space<vmem>>, vector<1x32xf32>
    %73 = arith.mulf %71, %72 : vector<1x32xf32>
    %74 = vector.broadcast %73 : vector<1x32xf32> to vector<256x32xf32>
    %75 = arith.mulf %63, %74 : vector<256x32xf32>
    %c0_37 = arith.constant 0 : index
    %c0_38 = arith.constant 0 : index
    %76 = vector.load %arg4[%c0_37, %c0_38] : memref<1x32xf32, #tpu.memory_space<vmem>>, vector<1x32xf32>
    %77 = vector.broadcast %76 : vector<1x32xf32> to vector<256x32xf32>
    %78 = arith.addf %75, %77 : vector<256x32xf32>
    %cst_39 = arith.constant 0.000000e+00 : f32
    %79 = vector.broadcast %cst_39 : f32 to vector<256x32xf32>
    %80 = arith.maximumf %78, %79 : vector<256x32xf32>
    %81 = tpu.iota {dimensions = array<i32: 0>} : vector<256x32xi32>
    %c16_i32 = arith.constant 16 : i32
    %c0_i32 = arith.constant 0 : i32
    %82 = arith.cmpi eq, %c16_i32, %c0_i32 : i32
    %c1_i32 = arith.constant 1 : i32
    %83 = arith.select %82, %c1_i32, %c16_i32 : i32
    %84 = vector.broadcast %83 : i32 to vector<256x32xi32>
    %85 = arith.remsi %81, %84 : vector<256x32xi32>
    %c0_i32_40 = arith.constant 0 : i32
    %86 = vector.broadcast %c0_i32_40 : i32 to vector<256x32xi32>
    %87 = arith.cmpi ne, %85, %86 : vector<256x32xi32>
    %c0_i32_41 = arith.constant 0 : i32
    %88 = vector.broadcast %c0_i32_41 : i32 to vector<256x32xi32>
    %89 = arith.cmpi slt, %85, %88 : vector<256x32xi32>
    %c0_i32_42 = arith.constant 0 : i32
    %90 = arith.cmpi slt, %83, %c0_i32_42 : i32
    %91 = vector.broadcast %90 : i1 to vector<256x32xi1>
    %92 = vector.broadcast %91 : vector<256x32xi1> to vector<256x32xi1>
    %93 = arith.xori %89, %92 : vector<256x32xi1>
    %94 = arith.andi %93, %87 : vector<256x32xi1>
    %95 = vector.broadcast %83 : i32 to vector<256x32xi32>
    %96 = arith.addi %85, %95 : vector<256x32xi32>
    %97 = arith.select %94, %96, %85 : vector<256x32xi1>, vector<256x32xi32>
    %98 = vector.extract_strided_slice %80 {offsets = [0, 0], sizes = [1, 32], strides = [1, 1]} : vector<256x32xf32> to vector<1x32xf32>
    %99 = vector.extract_strided_slice %80 {offsets = [0, 0], sizes = [255, 32], strides = [1, 1]} : vector<256x32xf32> to vector<255x32xf32>
    %100 = tpu.concatenate %98, %99 in 0 : vector<1x32xf32>, vector<255x32xf32> -> vector<256x32xf32>
    %c0_i32_43 = arith.constant 0 : i32
    %101 = vector.broadcast %c0_i32_43 : i32 to vector<256x32xi32>
    %102 = arith.cmpi eq, %97, %101 : vector<256x32xi32>
    %103 = arith.select %102, %80, %100 : vector<256x32xi1>, vector<256x32xf32>
    %104 = vector.extract_strided_slice %80 {offsets = [1, 0], sizes = [255, 32], strides = [1, 1]} : vector<256x32xf32> to vector<255x32xf32>
    %105 = vector.extract_strided_slice %80 {offsets = [255, 0], sizes = [1, 32], strides = [1, 1]} : vector<256x32xf32> to vector<1x32xf32>
    %106 = tpu.concatenate %104, %105 in 0 : vector<255x32xf32>, vector<1x32xf32> -> vector<256x32xf32>
    %c15_i32 = arith.constant 15 : i32
    %107 = vector.broadcast %c15_i32 : i32 to vector<256x32xi32>
    %108 = arith.cmpi eq, %97, %107 : vector<256x32xi32>
    %109 = arith.select %108, %80, %106 : vector<256x32xi1>, vector<256x32xf32>
    %cst_44 = arith.constant 7.500000e-01 : f32
    %110 = vector.broadcast %cst_44 : f32 to vector<256x32xf32>
    %111 = arith.mulf %110, %80 : vector<256x32xf32>
    %cst_45 = arith.constant 2.500000e-01 : f32
    %112 = vector.broadcast %cst_45 : f32 to vector<256x32xf32>
    %113 = arith.mulf %112, %103 : vector<256x32xf32>
    %114 = arith.addf %111, %113 : vector<256x32xf32>
    %cst_46 = arith.constant 7.500000e-01 : f32
    %115 = vector.broadcast %cst_46 : f32 to vector<256x32xf32>
    %116 = arith.mulf %115, %80 : vector<256x32xf32>
    %cst_47 = arith.constant 2.500000e-01 : f32
    %117 = vector.broadcast %cst_47 : f32 to vector<256x32xf32>
    %118 = arith.mulf %117, %109 : vector<256x32xf32>
    %119 = arith.addf %116, %118 : vector<256x32xf32>
    %120 = vector.extract_strided_slice %114 {offsets = [0, 0], sizes = [16, 32], strides = [1, 1]} : vector<256x32xf32> to vector<16x32xf32>
    %121 = vector.extract_strided_slice %114 {offsets = [0, 0], sizes = [240, 32], strides = [1, 1]} : vector<256x32xf32> to vector<240x32xf32>
    %122 = tpu.concatenate %120, %121 in 0 : vector<16x32xf32>, vector<240x32xf32> -> vector<256x32xf32>
    %123 = vector.extract_strided_slice %114 {offsets = [16, 0], sizes = [240, 32], strides = [1, 1]} : vector<256x32xf32> to vector<240x32xf32>
    %124 = vector.extract_strided_slice %114 {offsets = [240, 0], sizes = [16, 32], strides = [1, 1]} : vector<256x32xf32> to vector<16x32xf32>
    %125 = tpu.concatenate %123, %124 in 0 : vector<240x32xf32>, vector<16x32xf32> -> vector<256x32xf32>
    %cst_48 = arith.constant 7.500000e-01 : f32
    %126 = vector.broadcast %cst_48 : f32 to vector<256x32xf32>
    %127 = arith.mulf %126, %114 : vector<256x32xf32>
    %cst_49 = arith.constant 2.500000e-01 : f32
    %128 = vector.broadcast %cst_49 : f32 to vector<256x32xf32>
    %129 = arith.mulf %128, %122 : vector<256x32xf32>
    %130 = arith.addf %127, %129 : vector<256x32xf32>
    %cst_50 = arith.constant 7.500000e-01 : f32
    %131 = vector.broadcast %cst_50 : f32 to vector<256x32xf32>
    %132 = arith.mulf %131, %114 : vector<256x32xf32>
    %cst_51 = arith.constant 2.500000e-01 : f32
    %133 = vector.broadcast %cst_51 : f32 to vector<256x32xf32>
    %134 = arith.mulf %133, %125 : vector<256x32xf32>
    %135 = arith.addf %132, %134 : vector<256x32xf32>
    %136 = vector.extract_strided_slice %119 {offsets = [0, 0], sizes = [16, 32], strides = [1, 1]} : vector<256x32xf32> to vector<16x32xf32>
    %137 = vector.extract_strided_slice %119 {offsets = [0, 0], sizes = [240, 32], strides = [1, 1]} : vector<256x32xf32> to vector<240x32xf32>
    %138 = tpu.concatenate %136, %137 in 0 : vector<16x32xf32>, vector<240x32xf32> -> vector<256x32xf32>
    %139 = vector.extract_strided_slice %119 {offsets = [16, 0], sizes = [240, 32], strides = [1, 1]} : vector<256x32xf32> to vector<240x32xf32>
    %140 = vector.extract_strided_slice %119 {offsets = [240, 0], sizes = [16, 32], strides = [1, 1]} : vector<256x32xf32> to vector<16x32xf32>
    %141 = tpu.concatenate %139, %140 in 0 : vector<240x32xf32>, vector<16x32xf32> -> vector<256x32xf32>
    %cst_52 = arith.constant 7.500000e-01 : f32
    %142 = vector.broadcast %cst_52 : f32 to vector<256x32xf32>
    %143 = arith.mulf %142, %119 : vector<256x32xf32>
    %cst_53 = arith.constant 2.500000e-01 : f32
    %144 = vector.broadcast %cst_53 : f32 to vector<256x32xf32>
    %145 = arith.mulf %144, %138 : vector<256x32xf32>
    %146 = arith.addf %143, %145 : vector<256x32xf32>
    %cst_54 = arith.constant 7.500000e-01 : f32
    %147 = vector.broadcast %cst_54 : f32 to vector<256x32xf32>
    %148 = arith.mulf %147, %119 : vector<256x32xf32>
    %cst_55 = arith.constant 2.500000e-01 : f32
    %149 = vector.broadcast %cst_55 : f32 to vector<256x32xf32>
    %150 = arith.mulf %149, %141 : vector<256x32xf32>
    %151 = arith.addf %148, %150 : vector<256x32xf32>
    %c0_56 = arith.constant 0 : index
    %c0_57 = arith.constant 0 : index
    %c0_58 = arith.constant 0 : index
    %c0_59 = arith.constant 0 : index
    %152 = vector.load %arg5[%c0_56, %c0_57, %c0_58, %c0_59] : memref<1x4x256x32xf32, #tpu.memory_space<vmem>>, vector<1x1x256x32xf32>
    %153 = vector.shape_cast %152 : vector<1x1x256x32xf32> to vector<256x32xf32>
    %154 = vector.shape_cast %130 : vector<256x32xf32> to vector<1x1x256x32xf32>
    tpu.vector_store %arg5[%c0_56, %c0_57, %c0_58, %c0_59], %154 {strides = array<i32>} : memref<1x4x256x32xf32, #tpu.memory_space<vmem>>, vector<1x1x256x32xf32>,
    %c0_60 = arith.constant 0 : index
    %c1_61 = arith.constant 1 : index
    %c0_62 = arith.constant 0 : index
    %c0_63 = arith.constant 0 : index
    %155 = vector.load %arg5[%c0_60, %c1_61, %c0_62, %c0_63] : memref<1x4x256x32xf32, #tpu.memory_space<vmem>>, vector<1x1x256x32xf32>
    %156 = vector.shape_cast %155 : vector<1x1x256x32xf32> to vector<256x32xf32>
    %157 = vector.shape_cast %146 : vector<256x32xf32> to vector<1x1x256x32xf32>
    tpu.vector_store %arg5[%c0_60, %c1_61, %c0_62, %c0_63], %157 {strides = array<i32>} : memref<1x4x256x32xf32, #tpu.memory_space<vmem>>, vector<1x1x256x32xf32>,
    %c0_64 = arith.constant 0 : index
    %c2_65 = arith.constant 2 : index
    %c0_66 = arith.constant 0 : index
    %c0_67 = arith.constant 0 : index
    %158 = vector.load %arg5[%c0_64, %c2_65, %c0_66, %c0_67] : memref<1x4x256x32xf32, #tpu.memory_space<vmem>>, vector<1x1x256x32xf32>
    %159 = vector.shape_cast %158 : vector<1x1x256x32xf32> to vector<256x32xf32>
    %160 = vector.shape_cast %135 : vector<256x32xf32> to vector<1x1x256x32xf32>
    tpu.vector_store %arg5[%c0_64, %c2_65, %c0_66, %c0_67], %160 {strides = array<i32>} : memref<1x4x256x32xf32, #tpu.memory_space<vmem>>, vector<1x1x256x32xf32>,
    %c0_68 = arith.constant 0 : index
    %c3_69 = arith.constant 3 : index
    %c0_70 = arith.constant 0 : index
    %c0_71 = arith.constant 0 : index
    %161 = vector.load %arg5[%c0_68, %c3_69, %c0_70, %c0_71] : memref<1x4x256x32xf32, #tpu.memory_space<vmem>>, vector<1x1x256x32xf32>
    %162 = vector.shape_cast %161 : vector<1x1x256x32xf32> to vector<256x32xf32>
    %163 = vector.shape_cast %151 : vector<256x32xf32> to vector<1x1x256x32xf32>
    tpu.vector_store %arg5[%c0_68, %c3_69, %c0_70, %c0_71], %163 {strides = array<i32>} : memref<1x4x256x32xf32, #tpu.memory_space<vmem>>, vector<1x1x256x32xf32>,
    return
  }
  func.func @transform_0(%arg0: i32) -> (i32, i32, i32, i32) {
    %c0_i32 = arith.constant 0 : i32
    %c0_i32_0 = arith.constant 0 : i32
    %c0_i32_1 = arith.constant 0 : i32
    %c0_i32_2 = arith.constant 0 : i32
    return %arg0, %c0_i32, %c0_i32_0, %c0_i32_1 : i32, i32, i32, i32
  }
  func.func @transform_1(%arg0: i32) -> (i32, i32, i32) {
    %c0_i32 = arith.constant 0 : i32
    %c0_i32_0 = arith.constant 0 : i32
    %c0_i32_1 = arith.constant 0 : i32
    %c0_i32_2 = arith.constant 0 : i32
    return %c0_i32, %c0_i32_0, %c0_i32_1 : i32, i32, i32
  }
  func.func @transform_2(%arg0: i32) -> (i32, i32) {
    %c0_i32 = arith.constant 0 : i32
    %c0_i32_0 = arith.constant 0 : i32
    %c0_i32_1 = arith.constant 0 : i32
    return %c0_i32, %c0_i32_0 : i32, i32
  }
  func.func @transform_3(%arg0: i32) -> (i32, i32) {
    %c0_i32 = arith.constant 0 : i32
    %c0_i32_0 = arith.constant 0 : i32
    %c0_i32_1 = arith.constant 0 : i32
    return %c0_i32, %c0_i32_0 : i32, i32
  }
  func.func @transform_4(%arg0: i32) -> (i32, i32, i32, i32) {
    %c0_i32 = arith.constant 0 : i32
    %c0_i32_0 = arith.constant 0 : i32
    %c0_i32_1 = arith.constant 0 : i32
    %c0_i32_2 = arith.constant 0 : i32
    return %arg0, %c0_i32, %c0_i32_0, %c0_i32_1 : i32, i32, i32, i32
  }
}

</mosaic_0001>

<bundles_post_ra>
// kernel: conv_gn_up2d.1
= control target key start
LH: loop header
LB: loop body
LE: loop exit
PB: predicated region body
PF: predicated region fallthrough
CT: control target
= control target key end

     0   :  { %s5895_s15 = smov 0   ;;  %s9939_s0 = inlined_call_operand.vmem [shape: f32[2,18,18,4], index: 0, kind: input, shape index: {}]   ;;  %s9940_s1 = inlined_call_operand.vmem [shape: f32[9,4,32], index: 1, kind: input, shape index: {}]   ;;  %s9941_s2 = inlined_call_operand.vmem [shape: f32[1,32], index: 2, kind: input, shape index: {}]   ;;  %s9942_s3 = inlined_call_operand.vmem [shape: f32[1,32], index: 3, kind: input, shape index: {}]   ;;  %s9943_s4 = inlined_call_operand.vmem [shape: f32[2,4,256,32], index: 4, kind: output, shape index: {}]  }
   0x1 LB: > { %s4687_s16 = sadd.s32 4294967295, %s5868_s15   ;;  %p4691_p0 = scmp.ge.s32.totalorder %s5868_s15, 1  ;;  %s5868_s15 = sphi %s5895_s15, %s14_s15  }
   0x2   : > { %p162_p1 = scmp.lt.s32.totalorder %s5868_s15, 3 }
   0x4   : > { %p163_p2 = pnand %p4691_p0, %p162_p1 }
   0x6   : > { %166 = sbr.rel (%p163_p2) target bundleno = 952 (0x3b8), region = 36 }
   0xb   : > { %v4695_v0 = vld [vmem:[%s9940_s1 + $0xc] sm:$0xf]  ;;  %vm352_vm0 = vcmask 1043456   ;;  %p188_p3 = scmp.lt.s32.totalorder %s4687_s16, 1  ;;  %v252_v1 = vld [vmem:[%s9940_s1] sm:$0xf] }
   0xc   : > { %5847 = vmatprep.subr.msk.mxu1 %vm352_vm0, %v4695_v0  ;;  %5397 = vmatprep.subr.msk.mxu0 %vm352_vm0, %v4695_v0  ;;  %v4762_v2 = vld [vmem:[%s9940_s1 + $0x18] sm:$0xf]  ;;  %vm255_vm1 = vcmask 31744   ;;  %vm10005_vm2 = vcmask 1046528   ;;  %v5950_v10 = vld [vmem:[%s9940_s1 + $0x4] sm:$0xf] }
   0xd   : > { %5848 = vmatpush3.msk.msra.mxu1 %vm352_vm0, %v4695_v0  ;;  %5398 = vmatpush3.msk.msra.mxu0 %vm352_vm0, %v4695_v0  ;;  %s11233_s16 = smov (!%p188_p3, %s4687_s16), 1  ;;  %v5965_v13 = vld [vmem:[%s9940_s1 + $0x10] sm:$0xf]  ;;  %vm2050_vm3 = vcmask 1045504   ;;  %vm10004_vm4 = vcmask 261120   ;;  %vm10012_vm5 = vcmask 1040384  }
   0xe   : > { %5447 = vmatprep.subr.msk.mxu1 %vm352_vm0, %v252_v1  ;;  %5497 = vmatprep.subr.msk.mxu0 %vm352_vm0, %v4762_v2  ;;  %s5849_s23 = smul.u32 432, %s11233_s16  ;;  %s5099_s19 = sshll.u32 %s11233_s16, 10 }
   0xf   : > { %s9234_s21 = scalar_lea.vmem %s9943_s4, %s5099_s19 }
  0x10   : > { %s5924_s26 = scalar_lea.vmem %s9939_s0, %s5849_s23 }
  0x11   : > { %v5927_v3 = vld [vmem:[%s5924_s26 + $0x18] sm:$0xff]  ;;  %v5933_v5 = vld [vmem:[%s5924_s26 + $0x20] sm:$0xff]  ;;  %v5945_v9 = vld [vmem:[%s5924_s26 + $0x30] sm:$0xff] }
  0x12   : > { %v5930_v4 = vld [vmem:[%s5924_s26 + $0xd8] sm:$0xff]  ;;  %5399 = vmatprep.mubr.msk.f32.mxu0 %vm255_vm1, %v5927_v3  ;;  %v1105_v6 = vrot.slane %v5927_v3, 1  ;;  %v9951_v7 = vrot.slane %v5933_v5, 1  ;;  %v5942_v8 = vld [vmem:[%s5924_s26 + $0xe0] sm:$0xff]  ;;  %v5957_v11 = vld [vmem:[%s5924_s26 + $0xf0] sm:$0xff]  ;;  %v1110_v14 = vrot.slane %v5945_v9, 1 }
  0x13   : > { %5423 = vmatprep.mubr.msk.f32.mxu1 %vm255_vm1, %v5930_v4  ;;  %5400 = vmatmul.mubr.msk.f32.vlgmr.msra.gmra.mxu0 %vm255_vm1, %v5933_v5  ;;  %v5960_v12 = vld [vmem:[%s5924_s26 + $0x38] sm:$0xff]  ;;  %v5974_v16 = vld [vmem:[%s5924_s26 + $0x48] sm:$0xff]  ;;  %v5977_v17 = vld [vmem:[%s5924_s26 + $0x50] sm:$0xff] }
  0x14   : > { %5424 = vmatmul.mubr.msk.f32.vlgmr.msra.gmra.mxu1 %vm255_vm1, %v5942_v8  ;;  %5498 = vmatpush3.msk.msra.mxu0 %vm352_vm0, %v4762_v2  ;;  %v5971_v15 = vld [vmem:[%s5924_s26 + $0xf8] sm:$0xff]  ;;  %v5982_v18 = vsel %vm10005_vm2, %v1105_v6, %v9951_v7  ;;  %v9950_v19 = vrot.slane %v5960_v12, 1  ;;  %v5990_v20 = vld [vmem:[%s5924_s26 + $0x108] sm:$0xff]  ;;  %v5993_v21 = vld [vmem:[%s5924_s26 + $0x60] sm:$0xff]  ;;  %v1115_v22 = vrot.slane %v5974_v16, 1  ;;  %v9949_v23 = vrot.slane %v5977_v17, 1 }
  0x15   : > { %5448 = vmatpush3.msk.msra.mxu1 %vm352_vm0, %v252_v1  ;;  %5402 = vmatprep.mubr.msk.f32.mxu0 %vm255_vm1, %v5945_v9  ;;  %v5998_v24 = vld [vmem:[%s5924_s26 + $0x68] sm:$0xff]  ;;  %v6001_v25 = vld [vmem:[%s5924_s26 + $0x78] sm:$0xff]  ;;  %v1120_v27 = vrot.slane %v5993_v21, 1  ;;  %v6018_v28 = vld [vmem:[%s5924_s26 + $0x80] sm:$0xff]  ;;  %v2056_v6 = vrot.slane %v5927_v3, 2 }
  0x16   : > { %5426 = vmatprep.mubr.msk.f32.mxu1 %vm255_vm1, %v5957_v11  ;;  %5547 = vmatprep.subr.msk.mxu1 %vm352_vm0, %v5950_v10  ;;  %v6010_v26 = vsel %vm10005_vm2, %v1110_v14, %v9950_v19  ;;  %v6023_v29 = vsel %vm10005_vm2, %v1115_v22, %v9949_v23  ;;  %v9948_v30 = vrot.slane %v5998_v24, 1  ;;  %v1125_v31 = vrot.slane %v6001_v25, 1  ;;  %v6032_v32 = vld [vmem:[%s5924_s26 + $0x110] sm:$0xff]  ;;  %v6038_v34 = vld [vmem:[%s5924_s26 + $0x98] sm:$0xff]  ;;  %v6042_v36 = vld [vmem:[%s5924_s26 + $0x120] sm:$0xff] }
  0x17   : > { %5597 = vmatprep.subr.msk.mxu0 %vm352_vm0, %v5965_v13  ;;  %5403 = vmatmul.mubr.msk.f32.gmra.mxu0 %vm255_vm1, %v5960_v12  ;;  %v6035_v33 = vld [vmem:[%s5924_s26 + $0x90] sm:$0xff]  ;;  %v9947_v35 = vrot.slane %v6018_v28, 1  ;;  %v6045_v37 = vld [vmem:[%s5924_s26 + $0xa8] sm:$0xff]  ;;  %v9946_v40 = vrot.slane %v6038_v34, 1  ;;  %v6081_v47 = vld [vmem:[%s5924_s26 + $0xc0] sm:$0xff]  ;;  %v2057_v14 = vrot.slane %v5933_v5, 2 }
  0x18   : > { %5427 = vmatmul.mubr.msk.f32.gmra.mxu1 %vm255_vm1, %v5971_v15  ;;  %5405 = vmatprep.mubr.msk.f32.mxu0 %vm255_vm1, %v5974_v16  ;;  %v6050_v38 = vsel %vm10005_vm2, %v1120_v27, %v9948_v30  ;;  %v1130_v39 = vrot.slane %v6035_v33, 1  ;;  %v6055_v41 = vld [vmem:[%s5924_s26 + $0xb0] sm:$0xff]  ;;  %v1135_v43 = vrot.slane %v6045_v37, 1  ;;  %v6078_v46 = vld [vmem:[%s5924_s26 + $0x128] sm:$0xff]  ;;  %v6084_v48 = vld [vmem:[%s5924_s26 + $0x138] sm:$0xff]  ;;  %v1140_v50 = vrot.slane %v6081_v47, 1 }
  0x19   : > { %5429 = vmatprep.mubr.msk.f32.mxu1 %vm255_vm1, %v5990_v20  ;;  %v6060_v42 = vsel %vm10005_vm2, %v1125_v31, %v9947_v35  ;;  %v9945_v45 = vrot.slane %v6055_v41, 1  ;;  %10260 = vst [vmem:[#allocation2_spill] sm:$0xff] %v6084_v48  ;;  %v6093_v51 = vld [vmem:[%s5924_s26 + $0xc8] sm:$0xff]  ;;  %v6105_v53 = vld [vmem:[%s5924_s26 + $0x140] sm:$0xff]  ;;  %v6108_v54 = vld [vmem:[%s5924_s26 + $0x150] sm:$0xff]  ;;  %v2077_v30 = vrot.slane %v6018_v28, 2 }
  0x1a   : > { %v6070_v44 = vsel %vm10005_vm2, %v1130_v39, %v9946_v40  ;;  %v9944_v52 = vrot.slane %v6093_v51, 1  ;;  %10261 = vst [vmem:[#allocation3_spill] sm:$0xff] %v6105_v53  ;;  %10262 = vst [vmem:[#allocation4_spill] sm:$0xff] %v6108_v54  ;;  %v6124_v56 = vld [vmem:[%s5924_s26 + $0x158] sm:$0xff]  ;;  %v6127_v57 = vld [vmem:[%s5924_s26 + $0x168] sm:$0xff]  ;;  %v2072_v40 = vrot.slane %v5998_v24, 2 }
  0x1b   : > { %5406 = vmatmul.mubr.msk.f32.gmra.mxu0 %vm255_vm1, %v5977_v17  ;;  %v6089_v49 = vsel %vm10005_vm2, %v1135_v43, %v9945_v45  ;;  %10263 = vst [vmem:[#allocation5_spill] sm:$0xff] %v6124_v56  ;;  %10264 = vst [vmem:[#allocation6_spill] sm:$0xff] %v6127_v57  ;;  %v6138_v58 = vld [vmem:[%s5924_s26 + $0x170] sm:$0xff]  ;;  %v6141_v59 = vld [vmem:[%s5924_s26 + $0x180] sm:$0xff]  ;;  %v2082_v19 = vrot.slane %v6038_v34, 2 }
  0x1c   : > { %5430 = vmatmul.mubr.msk.f32.gmra.mxu1 %vm255_vm1, %v6032_v32  ;;  %5408 = vmatprep.mubr.msk.f32.mxu0 %vm255_vm1, %v5993_v21  ;;  %v6113_v55 = vsel %vm10005_vm2, %v1140_v50, %v9944_v52  ;;  %10265 = vst [vmem:[#allocation7_spill] sm:$0xff] %v6138_v58  ;;  %v6152_v60 = vld [vmem:[%s5924_s26 + $0x188] sm:$0xff]  ;;  %v6155_v61 = vld [vmem:[%s5924_s26] sm:$0xff]  ;;  %v6166_v0 = vld [vmem:[%s5924_s26 + $0x10] sm:$0x3]  ;;  %v2067_v52 = vrot.slane %v5977_v17, 2 }
  0x1d   : > { %5432 = vmatprep.mubr.msk.f32.mxu1 %vm255_vm1, %v6042_v36  ;;  %v2051_v62 = vrot.slane %v6155_v61, 2  ;;  %v6159_v63 = vld [vmem:[%s5924_s26 + $0x8] sm:$0xff]  ;;  %v2054_v2 = vrot.slane %v6166_v0, 2  ;;  %v6189_v31 = vld [vmem:[%s9940_s1 + $0x1c] sm:$0xf] }
  0x1e   : > { %v2052_v1 = vrot.slane %v6159_v63, 2  ;;  %v6192_v39 = vld [vmem:[%s5924_s26 + $0x28] sm:$0x3]  ;;  %v6263_v45 = vld [vmem:[%s5924_s26 + $0x70] sm:$0x3] }
  0x1f   : > { %5409 = vmatmul.mubr.msk.f32.gmra.mxu0 %vm255_vm1, %v5998_v24  ;;  %v6197_v43 = vld [vmem:[%s9940_s1 + $0x8] sm:$0xf]  ;;  %v2059_v50 = vrot.slane %v6192_v39, 2  ;;  %v6303_v23 = vld [vmem:[%s5924_s26 + $0xa0] sm:$0x3] }
  0x20   : > { %5433 = vmatmul.mubr.msk.f32.gmra.mxu1 %vm255_vm1, %v6078_v46  ;;  %5411 = vmatprep.mubr.msk.f32.mxu0 %vm255_vm1, %v6001_v25  ;;  %v6177_v22 = vsel %vm2050_vm3, %v2051_v62, %v2052_v1  ;;  %v6180_v27 = vsel %vm2050_vm3, %v2052_v1, %v2054_v2  ;;  %v6209_v62 = vsel %vm2050_vm3, %v2056_v6, %v2057_v14  ;;  %v2062_v1 = vrot.slane %v5960_v12, 2  ;;  %v6283_v35 = vld [vmem:[%s5924_s26 + $0x88] sm:$0x3]  ;;  %v6323_v7 = vld [vmem:[%s5924_s26 + $0xb8] sm:$0x3] }
  0x21   : > { %5435 = vmatprep.mubr.msk.f32.mxu1 %vm255_vm1, %v6084_v48 }
  0x23   : > { %5412 = vmatmul.mubr.msk.f32.gmra.mxu0 %vm255_vm1, %v6018_v28 }
  0x24   : > { %5436 = vmatmul.mubr.msk.f32.gmra.mxu1 %vm255_vm1, %v6105_v53  ;;  %5414 = vmatprep.mubr.msk.f32.mxu0 %vm255_vm1, %v6035_v33 }
  0x25   : > { %5438 = vmatprep.mubr.msk.f32.mxu1 %vm255_vm1, %v6108_v54 }
  0x27   : > { %5415 = vmatmul.mubr.msk.f32.gmra.mxu0 %vm255_vm1, %v6038_v34 }
  0x28   : > { %5439 = vmatmul.mubr.msk.f32.gmra.mxu1 %vm255_vm1, %v6124_v56  ;;  %5417 = vmatprep.mubr.msk.f32.mxu0 %vm255_vm1, %v6045_v37 }
  0x29   : > { %5441 = vmatprep.mubr.msk.f32.mxu1 %vm255_vm1, %v6127_v57 }
  0x2b   : > { %5418 = vmatmul.mubr.msk.f32.gmra.mxu0 %vm255_vm1, %v6055_v41 }
  0x2c   : > { %5442 = vmatmul.mubr.msk.f32.gmra.mxu1 %vm255_vm1, %v6138_v58  ;;  %5420 = vmatprep.mubr.msk.f32.mxu0 %vm255_vm1, %v6081_v47 }
  0x2d   : > { %5444 = vmatprep.mubr.msk.f32.mxu1 %vm255_vm1, %v6141_v59 }
  0x2f   : > { %5421 = vmatmul.mubr.msk.f32.gmra.mxu0 %vm255_vm1, %v6093_v51 }
  0x30   : > { %5445 = vmatmul.mubr.msk.f32.gmra.mxu1 %vm255_vm1, %v6152_v60  ;;  %5499 = vmatprep.mubr.msk.f32.mxu0 %vm255_vm1, %v5945_v9 }
  0x31   : > { %5449 = vmatprep.mubr.msk.f32.mxu1 %vm255_vm1, %v6155_v61 }
  0x33   : > { %5500 = vmatmul.mubr.msk.f32.vlgmr.msra.gmra.mxu0 %vm255_vm1, %v5960_v12 }
  0x34   : > { %5450 = vmatmul.mubr.msk.f32.vlgmr.msra.gmra.mxu1 %vm255_vm1, %v6159_v63  ;;  %5598 = vmatpush3.msk.msra.mxu0 %vm352_vm0, %v5965_v13  ;;  %v2061_v13 = vrot.slane %v5945_v9, 2 }
  0x35   : > { %5548 = vmatpush3.msk.msra.mxu1 %vm352_vm0, %v5950_v10  ;;  %5452 = vmatprep.mubr.msk.f32.mxu1 %vm255_vm1, %v5927_v3  ;;  %v6216_v10 = vsel %vm2050_vm3, %v2057_v14, %v2059_v50  ;;  %v6223_v3 = vld [vmem:[%s5924_s26 + $0x40] sm:$0x3]  ;;  %v6243_v50 = vld [vmem:[%s5924_s26 + $0x58] sm:$0x3] }
  0x36   : > { %5502 = vmatprep.mubr.msk.f32.mxu0 %vm255_vm1, %v5974_v16  ;;  %5647 = vmatprep.subr.msk.mxu1 %vm352_vm0, %v6189_v31  ;;  %v2064_v2 = vrot.slane %v6223_v3, 2  ;;  %v6233_v6 = vsel %vm2050_vm3, %v2061_v13, %v2062_v1  ;;  %v2069_v13 = vrot.slane %v6243_v50, 2 }
  0x37   : > { %5697 = vmatprep.subr.msk.mxu0 %vm352_vm0, %v6197_v43  ;;  %5503 = vmatmul.mubr.msk.f32.gmra.mxu0 %vm255_vm1, %v5977_v17 }
  0x38   : > { %5453 = vmatmul.mubr.msk.f32.gmra.mxu1 %vm255_vm1, %v5933_v5  ;;  %5505 = vmatprep.mubr.msk.f32.mxu0 %vm255_vm1, %v5993_v21  ;;  %v6236_v14 = vsel %vm2050_vm3, %v2062_v1, %v2064_v2  ;;  %v6256_v2 = vsel %vm2050_vm3, %v2067_v52, %v2069_v13 }
  0x39   : > { %5455 = vmatprep.mubr.msk.f32.mxu1 %vm255_vm1, %v5945_v9  ;;  %v2066_v9 = vrot.slane %v5974_v16, 2 }
  0x3b   : > { %5506 = vmatmul.mubr.msk.f32.gmra.mxu0 %vm255_vm1, %v5998_v24  ;;  %v6253_v1 = vsel %vm2050_vm3, %v2066_v9, %v2067_v52  ;;  %v2074_v52 = vrot.slane %v6263_v45, 2 }
  0x3c   : > { %5456 = vmatmul.mubr.msk.f32.gmra.mxu1 %vm255_vm1, %v5960_v12  ;;  %5508 = vmatprep.mubr.msk.f32.mxu0 %vm255_vm1, %v6001_v25 }
  0x3d   : > { %5458 = vmatprep.mubr.msk.f32.mxu1 %vm255_vm1, %v5974_v16  ;;  %v2071_v16 = vrot.slane %v5993_v21, 2  ;;  %v6276_v13 = vsel %vm2050_vm3, %v2072_v40, %v2074_v52 }
  0x3f   : > { %5509 = vmatmul.mubr.msk.f32.gmra.mxu0 %vm255_vm1, %v6018_v28  ;;  %v6273_v9 = vsel %vm2050_vm3, %v2071_v16, %v2072_v40  ;;  %v2079_v40 = vrot.slane %v6283_v35, 2 }
  0x40   : > { %5459 = vmatmul.mubr.msk.f32.gmra.mxu1 %vm255_vm1, %v5977_v17  ;;  %5511 = vmatprep.mubr.msk.f32.mxu0 %vm255_vm1, %v6035_v33 }
  0x41   : > { %5461 = vmatprep.mubr.msk.f32.mxu1 %vm255_vm1, %v5993_v21  ;;  %v2076_v21 = vrot.slane %v6001_v25, 2  ;;  %v6296_v52 = vsel %vm2050_vm3, %v2077_v30, %v2079_v40 }
  0x42   : > { %10266 = vst [vmem:[#allocation8_spill] sm:$0xff] %v6296_v52  ;;  %v2087_v52 = vrot.slane %v6055_v41, 2 }
  0x43   : > { %5512 = vmatmul.mubr.msk.f32.gmra.mxu0 %vm255_vm1, %v6038_v34  ;;  %v6293_v16 = vsel %vm2050_vm3, %v2076_v21, %v2077_v30  ;;  %v2084_v30 = vrot.slane %v6303_v23, 2 }
  0x44   : > { %5462 = vmatmul.mubr.msk.f32.gmra.mxu1 %vm255_vm1, %v5998_v24  ;;  %5514 = vmatprep.mubr.msk.f32.mxu0 %vm255_vm1, %v6045_v37 }
  0x45   : > { %5464 = vmatprep.mubr.msk.f32.mxu1 %vm255_vm1, %v6001_v25  ;;  %v2081_v25 = vrot.slane %v6035_v33, 2  ;;  %v6316_v40 = vsel %vm2050_vm3, %v2082_v19, %v2084_v30 }
  0x46   : > { %10268 = vst [vmem:[#allocation10_spill] sm:$0xff] %v6316_v40  ;;  %v6343_v40 = vld [vmem:[%s5924_s26 + $0xd0] sm:$0x3] }
  0x47   : > { %5515 = vmatmul.mubr.msk.f32.gmra.mxu0 %vm255_vm1, %v6055_v41  ;;  %v6313_v21 = vsel %vm2050_vm3, %v2081_v25, %v2082_v19  ;;  %v2089_v19 = vrot.slane %v6323_v7, 2 }
  0x48   : > { %5465 = vmatmul.mubr.msk.f32.gmra.mxu1 %vm255_vm1, %v6018_v28  ;;  %5517 = vmatprep.mubr.msk.f32.mxu0 %vm255_vm1, %v6081_v47  ;;  %10267 = vst [vmem:[#allocation9_spill] sm:$0xff] %v6313_v21  ;;  %v2092_v21 = vrot.slane %v6093_v51, 2 }
  0x49   : > { %5467 = vmatprep.mubr.msk.f32.mxu1 %vm255_vm1, %v6035_v33  ;;  %v2086_v33 = vrot.slane %v6045_v37, 2  ;;  %v6336_v30 = vsel %vm2050_vm3, %v2087_v52, %v2089_v19 }
  0x4b   : > { %5518 = vmatmul.mubr.msk.f32.gmra.mxu0 %vm255_vm1, %v6093_v51  ;;  %v6333_v25 = vsel %vm2050_vm3, %v2086_v33, %v2087_v52  ;;  %v2094_v52 = vrot.slane %v6343_v40, 2 }
  0x4c   : > { %5468 = vmatmul.mubr.msk.f32.gmra.mxu1 %vm255_vm1, %v6038_v34  ;;  %5520 = vmatprep.mubr.msk.f32.mxu0 %vm255_vm1, %v5930_v4 }
  0x4d   : > { %5470 = vmatprep.mubr.msk.f32.mxu1 %vm255_vm1, %v6045_v37  ;;  %v2091_v37 = vrot.slane %v6081_v47, 2  ;;  %v6356_v19 = vsel %vm2050_vm3, %v2092_v21, %v2094_v52  ;;  %v6420_v52 = vld [vmem:[%s5924_s26 + $0x1a0] sm:$0xff] }
  0x4e   : > { %10270 = vst [vmem:[#allocation12_spill] sm:$0xff] %v6356_v19  ;;  %10272 = vst [vmem:[#allocation14_spill] sm:$0xff] %v6420_v52  ;;  %v1108_v19 = vrot.slane %v6192_v39, 1  ;;  %v1113_v39 = vrot.slane %v6223_v3, 1 }
  0x4f   : > { %5521 = vmatmul.mubr.msk.f32.gmra.mxu0 %vm255_vm1, %v5942_v8  ;;  %v6353_v33 = vsel %vm2050_vm3, %v2091_v37, %v2092_v21  ;;  %v6408_v21 = vld [vmem:[%s5924_s26 + $0x198] sm:$0xff]  ;;  %v1101_v37 = vrot.slane %v6159_v63, 1 }
  0x50   : > { %5471 = vmatmul.mubr.msk.f32.gmra.mxu1 %vm255_vm1, %v6055_v41  ;;  %5523 = vmatprep.mubr.msk.f32.mxu0 %vm255_vm1, %v5957_v11  ;;  %10269 = vst [vmem:[#allocation11_spill] sm:$0xff] %v6353_v33  ;;  %10271 = vst [vmem:[#allocation13_spill] sm:$0xff] %v6408_v21  ;;  %v10273_v33 = vrot.slane %v5933_v5, 1  ;;  %v10274_v5 = vrot.slane %v5960_v12, 1  ;;  %v10275_v12 = vrot.slane %v5977_v17, 1 }
  0x51   : > { %5473 = vmatprep.mubr.msk.f32.mxu1 %vm255_vm1, %v6081_v47  ;;  %v1100_v47 = vrot.slane %v6155_v61, 1  ;;  %v1103_v61 = vrot.slane %v6166_v0, 1 }
  0x52   : > { %v1109_v0 = vsel %vm10005_vm2, %v10273_v33, %v1108_v19  ;;  %v6456_v3 = vsel %vm10005_vm2, %v10274_v5, %v1113_v39  ;;  %v1118_v33 = vrot.slane %v6243_v50, 1  ;;  %v1128_v50 = vrot.slane %v6283_v35, 1 }
  0x53   : > { %5524 = vmatmul.mubr.msk.f32.gmra.mxu0 %vm255_vm1, %v5971_v15  ;;  %v1102_v63 = vsel %vm10005_vm2, %v1100_v47, %v1101_v37  ;;  %v6442_v47 = vld [vmem:[%s9940_s1 + $0x14] sm:$0xf]  ;;  %v1133_v35 = vrot.slane %v6303_v23, 1  ;;  %v10279_v23 = vrot.slane %v6055_v41, 1  ;;  %v10280_v41 = vrot.slane %v6093_v51, 1 }
  0x54   : > { %5474 = vmatmul.mubr.msk.f32.gmra.mxu1 %vm255_vm1, %v6093_v51  ;;  %5526 = vmatprep.mubr.msk.f32.mxu0 %vm255_vm1, %v5990_v20 }
  0x55   : > { %5476 = vmatprep.mubr.msk.f32.mxu1 %vm255_vm1, %v5930_v4 }
  0x57   : > { %5527 = vmatmul.mubr.msk.f32.gmra.mxu0 %vm255_vm1, %v6032_v32 }
  0x58   : > { %5477 = vmatmul.mubr.msk.f32.gmra.mxu1 %vm255_vm1, %v5942_v8  ;;  %5529 = vmatprep.mubr.msk.f32.mxu0 %vm255_vm1, %v6042_v36 }
  0x59   : > { %5479 = vmatprep.mubr.msk.f32.mxu1 %vm255_vm1, %v5957_v11 }
  0x5b   : > { %5530 = vmatmul.mubr.msk.f32.gmra.mxu0 %vm255_vm1, %v6078_v46 }
  0x5c   : > { %5480 = vmatmul.mubr.msk.f32.gmra.mxu1 %vm255_vm1, %v5971_v15  ;;  %5532 = vmatprep.mubr.msk.f32.mxu0 %vm255_vm1, %v6084_v48 }
  0x5d   : > { %5482 = vmatprep.mubr.msk.f32.mxu1 %vm255_vm1, %v5990_v20 }
  0x5f   : > { %5533 = vmatmul.mubr.msk.f32.gmra.mxu0 %vm255_vm1, %v6105_v53 }
  0x60   : > { %5483 = vmatmul.mubr.msk.f32.gmra.mxu1 %vm255_vm1, %v6032_v32  ;;  %5535 = vmatprep.mubr.msk.f32.mxu0 %vm255_vm1, %v6108_v54 }
  0x61   : > { %5485 = vmatprep.mubr.msk.f32.mxu1 %vm255_vm1, %v6042_v36 }
  0x63   : > { %5536 = vmatmul.mubr.msk.f32.gmra.mxu0 %vm255_vm1, %v6124_v56 }
  0x64   : > { %5486 = vmatmul.mubr.msk.f32.gmra.mxu1 %vm255_vm1, %v6078_v46  ;;  %5538 = vmatprep.mubr.msk.f32.mxu0 %vm255_vm1, %v6127_v57 }
  0x65   : > { %5488 = vmatprep.mubr.msk.f32.mxu1 %vm255_vm1, %v6084_v48 }
  0x67   : > { %5539 = vmatmul.mubr.msk.f32.gmra.mxu0 %vm255_vm1, %v6138_v58 }
  0x68   : > { %5489 = vmatmul.mubr.msk.f32.gmra.mxu1 %vm255_vm1, %v6105_v53  ;;  %5541 = vmatprep.mubr.msk.f32.mxu0 %vm255_vm1, %v6141_v59 }
  0x69   : > { %5491 = vmatprep.mubr.msk.f32.mxu1 %vm255_vm1, %v6108_v54 }
  0x6b   : > { %5542 = vmatmul.mubr.msk.f32.gmra.mxu0 %vm255_vm1, %v6152_v60 }
  0x6c   : > { %5492 = vmatmul.mubr.msk.f32.gmra.mxu1 %vm255_vm1, %v6124_v56  ;;  %5544 = vmatprep.mubr.msk.f32.mxu0 %vm255_vm1, %v6408_v21  ;;  %v1104_v21 = vsel %vm10005_vm2, %v1101_v37, %v1103_v61  ;;  %v1145_v37 = vrot.slane %v5930_v4, 1  ;;  %v1146_v61 = vrot.slane %v5942_v8, 1 }
  0x6d   : > { %5494 = vmatprep.mubr.msk.f32.mxu1 %vm255_vm1, %v6127_v57 }
  0x6e   : > { %v6556_v5 = vsel %vm10005_vm2, %v1145_v37, %v1146_v61  ;;  %v1160_v37 = vrot.slane %v6042_v36, 1 }
  0x6f   : > { %5545 = vmatmul.mubr.msk.f32.gmra.mxu0 %vm255_vm1, %v6420_v52  ;;  %v6621_v52 = vld [vmem:[%s5924_s26 + $0x148] sm:$0x3] }
  0x70   : > { %5495 = vmatmul.mubr.msk.f32.gmra.mxu1 %vm255_vm1, %v6138_v58  ;;  %5599 = vmatprep.mubr.msk.f32.mxu0 %vm255_vm1, %v5982_v18  ;;  %10282 = vst [vmem:[#allocation16_spill] sm:$0xff] %v6621_v52 }
  0x71   : > { %5549 = vmatprep.mubr.msk.f32.mxu1 %vm255_vm1, %v1102_v63  ;;  %v6447_v63 = vld [vmem:[%s9940_s1 + $0x20] sm:$0xf] }
  0x73   : > { %5600 = vmatmul.mubr.msk.f32.vlgmr.msra.gmra.mxu0 %vm255_vm1, %v1109_v0 }
  0x74   : > { %5550 = vmatmul.mubr.msk.f32.vlgmr.msra.gmra.mxu1 %vm255_vm1, %v1104_v21  ;;  %5698 = vmatpush3.msk.msra.mxu0 %vm352_vm0, %v6197_v43  ;;  %v10276_v43 = vrot.slane %v5998_v24, 1  ;;  %v1138_v21 = vrot.slane %v6323_v7, 1  ;;  %v1143_v7 = vrot.slane %v6343_v40, 1 }
  0x75   : > { %5648 = vmatpush3.msk.msra.mxu1 %vm352_vm0, %v6189_v31  ;;  %5552 = vmatprep.mubr.msk.f32.mxu1 %vm255_vm1, %v5982_v18  ;;  %v6477_v18 = vsel %vm10005_vm2, %v10275_v12, %v1118_v33  ;;  %v1123_v31 = vrot.slane %v6263_v45, 1  ;;  %v10277_v45 = vrot.slane %v6018_v28, 1  ;;  %v10278_v28 = vrot.slane %v6038_v34, 1 }
  0x76   : > { %5602 = vmatprep.mubr.msk.f32.mxu0 %vm255_vm1, %v6010_v26  ;;  %5747 = vmatprep.subr.msk.mxu1 %vm352_vm0, %v6442_v47  ;;  %v6533_v34 = vsel %vm10005_vm2, %v10279_v23, %v1138_v21  ;;  %v6552_v40 = vsel %vm10005_vm2, %v10280_v41, %v1143_v7  ;;  %v1150_v33 = vrot.slane %v5957_v11, 1  ;;  %v1151_v12 = vrot.slane %v5971_v15, 1  ;;  %v6601_v41 = vld [vmem:[%s5924_s26 + $0x130] sm:$0x3] }
  0x77   : > { %5797 = vmatprep.subr.msk.mxu0 %vm352_vm0, %v6447_v63  ;;  %5603 = vmatmul.mubr.msk.f32.gmra.mxu0 %vm255_vm1, %v6456_v3  ;;  %v6491_v17 = vsel %vm10005_vm2, %v10276_v43, %v1123_v31  ;;  %v6505_v24 = vsel %vm10005_vm2, %v10277_v45, %v1128_v50  ;;  %v6519_v19 = vsel %vm10005_vm2, %v10278_v28, %v1133_v35  ;;  %v6561_v31 = vld [vmem:[%s5924_s26 + $0x100] sm:$0x3]  ;;  %v1155_v45 = vrot.slane %v5990_v20, 1  ;;  %v6581_v28 = vld [vmem:[%s5924_s26 + $0x118] sm:$0x3] }
  0x78   : > { %5553 = vmatmul.mubr.msk.f32.gmra.mxu1 %vm255_vm1, %v1109_v0  ;;  %5605 = vmatprep.mubr.msk.f32.mxu0 %vm255_vm1, %v6023_v29  ;;  %v6539_v0 = vld [vmem:[%s5924_s26 + $0xe8] sm:$0x3]  ;;  %v1153_v43 = vrot.slane %v6561_v31, 1  ;;  %v6576_v50 = vsel %vm10005_vm2, %v1150_v33, %v1151_v12  ;;  %v1156_v35 = vrot.slane %v6032_v32, 1  ;;  %v1158_v23 = vrot.slane %v6581_v28, 1  ;;  %10281 = vst [vmem:[#allocation15_spill] sm:$0xff] %v6601_v41 }
  0x79   : > { %5555 = vmatprep.mubr.msk.f32.mxu1 %vm255_vm1, %v6010_v26  ;;  %v1148_v39 = vrot.slane %v6539_v0, 1  ;;  %v1163_v33 = vrot.slane %v6601_v41, 1  ;;  %v6641_v41 = vld [vmem:[%s5924_s26 + $0x160] sm:$0x3] }
  0x7a   : > { %v6592_v21 = vsel %vm10005_vm2, %v1151_v12, %v1153_v43  ;;  %v6596_v7 = vsel %vm10005_vm2, %v1155_v45, %v1156_v35  ;;  %v1165_v43 = vrot.slane %v6084_v48, 1  ;;  %v1166_v45 = vrot.slane %v6105_v53, 1  ;;  %10283 = vst [vmem:[#allocation17_spill] sm:$0xff] %v6641_v41 }
  0x7b   : > { %5606 = vmatmul.mubr.msk.f32.gmra.mxu0 %vm255_vm1, %v6477_v18  ;;  %v6572_v51 = vsel %vm10005_vm2, %v1146_v61, %v1148_v39  ;;  %v1161_v61 = vrot.slane %v6078_v46, 1  ;;  %v6612_v39 = vsel %vm10005_vm2, %v1156_v35, %v1158_v23  ;;  %v1168_v23 = vrot.slane %v6621_v52, 1  ;;  %v6661_v52 = vld [vmem:[%s5924_s26 + $0x178] sm:$0x3] }
  0x7c   : > { %5556 = vmatmul.mubr.msk.f32.gmra.mxu1 %vm255_vm1, %v6456_v3  ;;  %5608 = vmatprep.mubr.msk.f32.mxu0 %vm255_vm1, %v6050_v38  ;;  %v1170_v53 = vrot.slane %v6108_v54, 1  ;;  %v1171_v48 = vrot.slane %v6124_v56, 1  ;;  %v1175_v56 = vrot.slane %v6127_v57, 1  ;;  %v1176_v54 = vrot.slane %v6138_v58, 1 }
  0x7d   : > { %5558 = vmatprep.mubr.msk.f32.mxu1 %vm255_vm1, %v6023_v29  ;;  %v6616_v12 = vsel %vm10005_vm2, %v1160_v37, %v1161_v61  ;;  %v6632_v35 = vsel %vm10005_vm2, %v1161_v61, %v1163_v33  ;;  %v6636_v37 = vsel %vm10005_vm2, %v1165_v43, %v1166_v45  ;;  %v6652_v61 = vsel %vm10005_vm2, %v1166_v45, %v1168_v23 }
  0x7e   : > { %v1173_v33 = vrot.slane %v6641_v41, 1  ;;  %v6656_v43 = vsel %vm10005_vm2, %v1170_v53, %v1171_v48  ;;  %v1178_v45 = vrot.slane %v6661_v52, 1  ;;  %v1507_v23 = vrot.slane %v6141_v59, 1  ;;  %v6681_v41 = vld [vmem:[%s5924_s26 + $0x190] sm:$0x3] }
  0x7f   : > { %5609 = vmatmul.mubr.msk.f32.gmra.mxu0 %vm255_vm1, %v6491_v17  ;;  %v1508_v58 = vrot.slane %v6152_v60, 1  ;;  %v6678_v57 = vsel %vm10005_vm2, %v1175_v56, %v1176_v54  ;;  %10284 = vst [vmem:[#allocation18_spill] sm:$0xff] %v6681_v41  ;;  %v1510_v56 = vrot.slane %v6681_v41, 1  ;;  %v6921_v41 = vld [vmem:[%s5924_s26 + $0x1a8] sm:$0x3] }
  0x80   : > { %5559 = vmatmul.mubr.msk.f32.gmra.mxu1 %vm255_vm1, %v6477_v18  ;;  %5611 = vmatprep.mubr.msk.f32.mxu0 %vm255_vm1, %v6060_v42  ;;  %v6672_v53 = vsel %vm10005_vm2, %v1171_v48, %v1173_v33  ;;  %v6692_v48 = vsel %vm10005_vm2, %v1176_v54, %v1178_v45  ;;  %v10292_v33 = vld [vmem:[#allocation3_spill] sm:$0xff] }
  0x81   : > { %5561 = vmatprep.mubr.msk.f32.mxu1 %vm255_vm1, %v6050_v38  ;;  %v6696_v59 = vsel %vm10005_vm2, %v1507_v23, %v1508_v58  ;;  %v6707_v54 = vsel %vm10005_vm2, %v1508_v58, %v1510_v56  ;;  %v2117_v45 = vrot.slane %v10292_v33, 2 }
  0x83   : > { %5612 = vmatmul.mubr.msk.f32.gmra.mxu0 %vm255_vm1, %v6505_v24 }
  0x84   : > { %5562 = vmatmul.mubr.msk.f32.gmra.mxu1 %vm255_vm1, %v6491_v17  ;;  %5614 = vmatprep.mubr.msk.f32.mxu0 %vm255_vm1, %v6070_v44 }
  0x85   : > { %5564 = vmatprep.mubr.msk.f32.mxu1 %vm255_vm1, %v6060_v42 }
  0x87   : > { %5615 = vmatmul.mubr.msk.f32.gmra.mxu0 %vm255_vm1, %v6519_v19 }
  0x88   : > { %5565 = vmatmul.mubr.msk.f32.gmra.mxu1 %vm255_vm1, %v6505_v24  ;;  %5617 = vmatprep.mubr.msk.f32.mxu0 %vm255_vm1, %v6089_v49 }
  0x89   : > { %5567 = vmatprep.mubr.msk.f32.mxu1 %vm255_vm1, %v6070_v44 }
  0x8b   : > { %5618 = vmatmul.mubr.msk.f32.gmra.mxu0 %vm255_vm1, %v6533_v34 }
  0x8c   : > { %5568 = vmatmul.mubr.msk.f32.gmra.mxu1 %vm255_vm1, %v6519_v19  ;;  %5620 = vmatprep.mubr.msk.f32.mxu0 %vm255_vm1, %v6113_v55 }
  0x8d   : > { %5570 = vmatprep.mubr.msk.f32.mxu1 %vm255_vm1, %v6089_v49 }
  0x8f   : > { %5621 = vmatmul.mubr.msk.f32.gmra.mxu0 %vm255_vm1, %v6552_v40 }
  0x90   : > { %5571 = vmatmul.mubr.msk.f32.gmra.mxu1 %vm255_vm1, %v6533_v34  ;;  %5623 = vmatprep.mubr.msk.f32.mxu0 %vm255_vm1, %v6556_v5 }
  0x91   : > { %5573 = vmatprep.mubr.msk.f32.mxu1 %vm255_vm1, %v6113_v55 }
  0x93   : > { %5624 = vmatmul.mubr.msk.f32.gmra.mxu0 %vm255_vm1, %v6572_v51 }
  0x94   : > { %5574 = vmatmul.mubr.msk.f32.gmra.mxu1 %vm255_vm1, %v6552_v40  ;;  %5626 = vmatprep.mubr.msk.f32.mxu0 %vm255_vm1, %v6576_v50 }
  0x95   : > { %5576 = vmatprep.mubr.msk.f32.mxu1 %vm255_vm1, %v6556_v5 }
  0x97   : > { %5627 = vmatmul.mubr.msk.f32.gmra.mxu0 %vm255_vm1, %v6592_v21 }
  0x98   : > { %5577 = vmatmul.mubr.msk.f32.gmra.mxu1 %vm255_vm1, %v6572_v51  ;;  %5629 = vmatprep.mubr.msk.f32.mxu0 %vm255_vm1, %v6596_v7 }
  0x99   : > { %5579 = vmatprep.mubr.msk.f32.mxu1 %vm255_vm1, %v6576_v50 }
  0x9b   : > { %5630 = vmatmul.mubr.msk.f32.gmra.mxu0 %vm255_vm1, %v6612_v39 }
  0x9c   : > { %5580 = vmatmul.mubr.msk.f32.gmra.mxu1 %vm255_vm1, %v6592_v21  ;;  %5632 = vmatprep.mubr.msk.f32.mxu0 %vm255_vm1, %v6616_v12 }
  0x9d   : > { %5582 = vmatprep.mubr.msk.f32.mxu1 %vm255_vm1, %v6596_v7 }
  0x9f   : > { %5633 = vmatmul.mubr.msk.f32.gmra.mxu0 %vm255_vm1, %v6632_v35 }
  0xa0   : > { %5583 = vmatmul.mubr.msk.f32.gmra.mxu1 %vm255_vm1, %v6612_v39  ;;  %5635 = vmatprep.mubr.msk.f32.mxu0 %vm255_vm1, %v6636_v37 }
  0xa1   : > { %5585 = vmatprep.mubr.msk.f32.mxu1 %vm255_vm1, %v6616_v12 }
  0xa3   : > { %5636 = vmatmul.mubr.msk.f32.gmra.mxu0 %vm255_vm1, %v6652_v61 }
  0xa4   : > { %5586 = vmatmul.mubr.msk.f32.gmra.mxu1 %vm255_vm1, %v6632_v35  ;;  %5638 = vmatprep.mubr.msk.f32.mxu0 %vm255_vm1, %v6656_v43 }
  0xa5   : > { %5588 = vmatprep.mubr.msk.f32.mxu1 %vm255_vm1, %v6636_v37 }
  0xa7   : > { %5639 = vmatmul.mubr.msk.f32.gmra.mxu0 %vm255_vm1, %v6672_v53 }
  0xa8   : > { %5589 = vmatmul.mubr.msk.f32.gmra.mxu1 %vm255_vm1, %v6652_v61  ;;  %5641 = vmatprep.mubr.msk.f32.mxu0 %vm255_vm1, %v6678_v57 }
  0xa9   : > { %5591 = vmatprep.mubr.msk.f32.mxu1 %vm255_vm1, %v6656_v43 }
  0xab   : > { %5642 = vmatmul.mubr.msk.f32.gmra.mxu0 %vm255_vm1, %v6692_v48 }
  0xac   : > { %5592 = vmatmul.mubr.msk.f32.gmra.mxu1 %vm255_vm1, %v6672_v53  ;;  %5644 = vmatprep.mubr.msk.f32.mxu0 %vm255_vm1, %v6696_v59 }
  0xad   : > { %5594 = vmatprep.mubr.msk.f32.mxu1 %vm255_vm1, %v6678_v57 }
  0xaf   : > { %5645 = vmatmul.mubr.msk.f32.gmra.mxu0 %vm255_vm1, %v6707_v54 }
  0xb0   : > { %5595 = vmatmul.mubr.msk.f32.gmra.mxu1 %vm255_vm1, %v6692_v48  ;;  %5699 = vmatprep.mubr.msk.f32.mxu0 %vm255_vm1, %v6177_v22 }
  0xb1   : > { %5649 = vmatprep.mubr.msk.f32.mxu1 %vm255_vm1, %v6010_v26  ;;  %v10285_v26 = vld [vmem:[#allocation8_spill] sm:$0xff] }
  0xb3   : > { %5700 = vmatmul.mubr.msk.f32.vlgmr.msra.gmra.mxu0 %vm255_vm1, %v6180_v27  ;;  %v10289_v27 = vld [vmem:[#allocation12_spill] sm:$0xff] }
  0xb4   : > { %5650 = vmatmul.mubr.msk.f32.vlgmr.msra.gmra.mxu1 %vm255_vm1, %v6456_v3  ;;  %5798 = vmatpush3.msk.msra.mxu0 %vm352_vm0, %v6447_v63 }
  0xb5   : > { %5748 = vmatpush3.msk.msra.mxu1 %vm352_vm0, %v6442_v47  ;;  %5652 = vmatprep.mubr.msk.f32.mxu1 %vm255_vm1, %v6023_v29  ;;  %v10286_v29 = vld [vmem:[#allocation9_spill] sm:$0xff] }
  0xb6   : > { %5702 = vmatprep.mubr.msk.f32.mxu0 %vm255_vm1, %v6209_v62 }
  0xb7   : > { %5703 = vmatmul.mubr.msk.f32.gmra.mxu0 %vm255_vm1, %v6216_v10 }
  0xb8   : > { %5653 = vmatmul.mubr.msk.f32.gmra.mxu1 %vm255_vm1, %v6477_v18  ;;  %5705 = vmatprep.mubr.msk.f32.mxu0 %vm255_vm1, %v6233_v6  ;;  %v2106_v18 = vrot.slane %v5990_v20, 2 }
  0xb9   : > { %5655 = vmatprep.mubr.msk.f32.mxu1 %vm255_vm1, %v6050_v38  ;;  %v10287_v38 = vld [vmem:[#allocation10_spill] sm:$0xff] }
  0xbb   : > { %5706 = vmatmul.mubr.msk.f32.gmra.mxu0 %vm255_vm1, %v6236_v14 }
  0xbc   : > { %5656 = vmatmul.mubr.msk.f32.gmra.mxu1 %vm255_vm1, %v6491_v17  ;;  %5708 = vmatprep.mubr.msk.f32.mxu0 %vm255_vm1, %v6253_v1  ;;  %v2107_v17 = vrot.slane %v6032_v32, 2  ;;  %v2109_v32 = vrot.slane %v6581_v28, 2 }
  0xbd   : > { %5658 = vmatprep.mubr.msk.f32.mxu1 %vm255_vm1, %v6060_v42  ;;  %v2096_v42 = vrot.slane %v5930_v4, 2  ;;  %v2101_v4 = vrot.slane %v5957_v11, 2 }
  0xbf   : > { %5709 = vmatmul.mubr.msk.f32.gmra.mxu0 %vm255_vm1, %v6256_v2 }
  0xc0   : > { %5659 = vmatmul.mubr.msk.f32.gmra.mxu1 %vm255_vm1, %v6505_v24  ;;  %5711 = vmatprep.mubr.msk.f32.mxu0 %vm255_vm1, %v6273_v9 }
  0xc1   : > { %5661 = vmatprep.mubr.msk.f32.mxu1 %vm255_vm1, %v6070_v44  ;;  %v2097_v44 = vrot.slane %v5942_v8, 2  ;;  %v2102_v8 = vrot.slane %v5971_v15, 2  ;;  %v2104_v15 = vrot.slane %v6561_v31, 2  ;;  %v2112_v31 = vrot.slane %v6078_v46, 2  ;;  %v10290_v46 = vld [vmem:[#allocation15_spill] sm:$0xff] }
  0xc2   : > { %v2114_v28 = vrot.slane %v10290_v46, 2 }
  0xc3   : > { %5712 = vmatmul.mubr.msk.f32.gmra.mxu0 %vm255_vm1, %v6276_v13  ;;  %v6789_v58 = vsel %vm2050_vm3, %v2096_v42, %v2097_v44  ;;  %v6814_v3 = vsel %vm2050_vm3, %v2101_v4, %v2102_v8  ;;  %v6831_v20 = vsel %vm2050_vm3, %v2102_v8, %v2104_v15  ;;  %v10293_v42 = vld [vmem:[#allocation16_spill] sm:$0xff] }
  0xc4   : > { %5662 = vmatmul.mubr.msk.f32.gmra.mxu1 %vm255_vm1, %v6519_v19  ;;  %5714 = vmatprep.mubr.msk.f32.mxu0 %vm255_vm1, %v6293_v16  ;;  %v6881_v56 = vsel %vm2050_vm3, %v2112_v31, %v2114_v28  ;;  %v10295_v8 = vld [vmem:[#allocation4_spill] sm:$0xff]  ;;  %v10299_v28 = vld [vmem:[#allocation17_spill] sm:$0xff] }
  0xc5   : > { %5664 = vmatprep.mubr.msk.f32.mxu1 %vm255_vm1, %v6089_v49  ;;  %v10288_v49 = vld [vmem:[#allocation11_spill] sm:$0xff]  ;;  %v2121_v15 = vrot.slane %v10295_v8, 2 }
  0xc7   : > { %5715 = vmatmul.mubr.msk.f32.gmra.mxu0 %vm255_vm1, %v10285_v26 }
  0xc8   : > { %5665 = vmatmul.mubr.msk.f32.gmra.mxu1 %vm255_vm1, %v6533_v34  ;;  %5717 = vmatprep.mubr.msk.f32.mxu0 %vm255_vm1, %v10286_v29 }
  0xc9   : > { %5667 = vmatprep.mubr.msk.f32.mxu1 %vm255_vm1, %v6113_v55  ;;  %v2099_v55 = vrot.slane %v6539_v0, 2 }
  0xcb   : > { %5718 = vmatmul.mubr.msk.f32.gmra.mxu0 %vm255_vm1, %v10287_v38  ;;  %v6806_v11 = vsel %vm2050_vm3, %v2097_v44, %v2099_v55  ;;  %v2119_v44 = vrot.slane %v10293_v42, 2 }
  0xcc   : > { %5668 = vmatmul.mubr.msk.f32.gmra.mxu1 %vm255_vm1, %v6552_v40  ;;  %5720 = vmatprep.mubr.msk.f32.mxu0 %vm255_vm1, %v6333_v25  ;;  %v6839_v40 = vsel %vm2050_vm3, %v2106_v18, %v2107_v17  ;;  %v10296_v18 = vld [vmem:[#allocation5_spill] sm:$0xff] }
  0xcd   : > { %5670 = vmatprep.mubr.msk.f32.mxu1 %vm255_vm1, %v6556_v5  ;;  %v2111_v5 = vrot.slane %v6042_v36, 2  ;;  %v6856_v36 = vsel %vm2050_vm3, %v2107_v17, %v2109_v32  ;;  %v2122_v17 = vrot.slane %v10296_v18, 2  ;;  %v6907_v46 = vsel %vm2050_vm3, %v2117_v45, %v2119_v44  ;;  %v10302_v18 = vld [vmem:[#allocation6_spill] sm:$0xff] }
  0xcf   : > { %5721 = vmatmul.mubr.msk.f32.gmra.mxu0 %vm255_vm1, %v6336_v30  ;;  %v6916_v8 = vsel %vm2050_vm3, %v2121_v15, %v2122_v17  ;;  %v1782_v15 = vrot.slane %v6921_v41, 1 }
  0xd0   : > { %5671 = vmatmul.mubr.msk.f32.gmra.mxu1 %vm255_vm1, %v6572_v51  ;;  %5723 = vmatprep.mubr.msk.f32.mxu0 %vm255_vm1, %v10288_v49 }
  0xd1   : > { %5673 = vmatprep.mubr.msk.f32.mxu1 %vm255_vm1, %v6576_v50 }
  0xd3   : > { %v6793_v60 = vpop.f32.mrf.mxu0  ;;  %5724 = vmatmul.mubr.msk.f32.gmra.mxu0 %vm255_vm1, %v10289_v27 }
  0xd4   : > { %v6795_v22 = vpop.f32.mrf.mxu1  ;;  %5674 = vmatmul.mubr.msk.f32.gmra.mxu1 %vm255_vm1, %v6592_v21  ;;  %5726 = vmatprep.mubr.msk.f32.mxu0 %vm255_vm1, %v6789_v58 }
  0xd5   : > { %5676 = vmatprep.mubr.msk.f32.mxu1 %vm255_vm1, %v6596_v7  ;;  %v6809_v47 = vpop.f32.mrf.mxu0 }
  0xd6   : > { %v6811_v63 = vpop.f32.mrf.mxu1 }
  0xd7   : > { %v6818_v24 = vpop.f32.mrf.mxu0  ;;  %5727 = vmatmul.mubr.msk.f32.gmra.mxu0 %vm255_vm1, %v6806_v11 }
  0xd8   : > { %v6820_v19 = vpop.f32.mrf.mxu1  ;;  %5677 = vmatmul.mubr.msk.f32.gmra.mxu1 %vm255_vm1, %v6612_v39  ;;  %5729 = vmatprep.mubr.msk.f32.mxu0 %vm255_vm1, %v6814_v3  ;;  %v6864_v39 = vsel %vm2050_vm3, %v2111_v5, %v2112_v31  ;;  %v10298_v5 = vld [vmem:[#allocation13_spill] sm:$0xff] }
  0xd9   : > { %5679 = vmatprep.mubr.msk.f32.mxu1 %vm255_vm1, %v6616_v12  ;;  %v6834_v34 = vpop.f32.mrf.mxu0  ;;  %v10291_v12 = vld [vmem:[#allocation2_spill] sm:$0xff]  ;;  %v1779_v31 = vrot.slane %v10298_v5, 1  ;;  %v2126_v5 = vrot.slane %v10302_v18, 2 }
  0xda   : > { %v6836_v0 = vpop.f32.mrf.mxu1 }
  0xdb   : > { %v6843_v51 = vpop.f32.mrf.mxu0  ;;  %5730 = vmatmul.mubr.msk.f32.gmra.mxu0 %vm255_vm1, %v6831_v20 }
  0xdc   : > { %v6845_v50 = vpop.f32.mrf.mxu1  ;;  %5680 = vmatmul.mubr.msk.f32.gmra.mxu1 %vm255_vm1, %v6632_v35  ;;  %5732 = vmatprep.mubr.msk.f32.mxu0 %vm255_vm1, %v6839_v40  ;;  %v2116_v35 = vrot.slane %v10291_v12, 2  ;;  %v2124_v12 = vrot.slane %v10299_v28, 2  ;;  %v2129_v28 = vrot.slane %v6661_v52, 2 }
  0xdd   : > { %5682 = vmatprep.mubr.msk.f32.mxu1 %vm255_vm1, %v6636_v37  ;;  %v6859_v21 = vpop.f32.mrf.mxu0 }
  0xde   : > { %v6861_v7 = vpop.f32.mrf.mxu1  ;;  %v6936_v44 = vsel %vm2050_vm3, %v2122_v17, %v2124_v12 }
  0xdf   : > { %v6868_v37 = vpop.f32.mrf.mxu0  ;;  %5733 = vmatmul.mubr.msk.f32.gmra.mxu0 %vm255_vm1, %v6856_v36 }
  0xe0   : > { %v6870_v23 = vpop.f32.mrf.mxu1  ;;  %5683 = vmatmul.mubr.msk.f32.gmra.mxu1 %vm255_vm1, %v6652_v61  ;;  %5735 = vmatprep.mubr.msk.f32.mxu0 %vm255_vm1, %v6864_v39  ;;  %v6889_v61 = vsel %vm2050_vm3, %v2116_v35, %v2117_v45  ;;  %v10300_v35 = vld [vmem:[#allocation14_spill] sm:$0xff] }
  0xe1   : > { %5685 = vmatprep.mubr.msk.f32.mxu1 %vm255_vm1, %v6656_v43  ;;  %v6884_v55 = vpop.f32.mrf.mxu0  ;;  %v1780_v33 = vrot.slane %v10300_v35, 1 }
  0xe2   : > { %v6886_v4 = vpop.f32.mrf.mxu1 }
  0xe3   : > { %10294 = vst [vmem:[#allocation8_spill] sm:$0xff] %v6886_v4  ;;  %v6893_v43 = vpop.f32.mrf.mxu0  ;;  %5736 = vmatmul.mubr.msk.f32.gmra.mxu0 %vm255_vm1, %v6881_v56  ;;  %v1783_v52 = vsel %vm10005_vm2, %v1780_v33, %v1782_v15 }
  0xe4   : > { %v6895_v32 = vpop.f32.mrf.mxu1  ;;  %5686 = vmatmul.mubr.msk.f32.gmra.mxu1 %vm255_vm1, %v6672_v53  ;;  %5738 = vmatprep.mubr.msk.f32.mxu0 %vm255_vm1, %v6889_v61 }
  0xe5   : > { %10297 = vst [vmem:[#allocation9_spill] sm:$0xff] %v6895_v32  ;;  %5688 = vmatprep.mubr.msk.f32.mxu1 %vm255_vm1, %v6678_v57  ;;  %v6911_v42 = vpop.f32.mrf.mxu0  ;;  %v10303_v57 = vld [vmem:[#allocation7_spill] sm:$0xff] }
  0xe6   : > { %v6913_v53 = vpop.f32.mrf.mxu1  ;;  %v2127_v32 = vrot.slane %v10303_v57, 2 }
  0xe7   : > { %10301 = vst [vmem:[#allocation10_spill] sm:$0xff] %v6913_v53  ;;  %v6923_v4 = vpop.f32.mrf.mxu0  ;;  %5739 = vmatmul.mubr.msk.f32.gmra.mxu0 %vm255_vm1, %v6907_v46 }
  0xe8   : > { %v6925_v45 = vpop.f32.mrf.mxu1  ;;  %5689 = vmatmul.mubr.msk.f32.gmra.mxu1 %vm255_vm1, %v6692_v48  ;;  %5741 = vmatprep.mubr.msk.f32.mxu0 %vm255_vm1, %v6916_v8  ;;  %v1781_v48 = vsel %vm10005_vm2, %v1779_v31, %v1780_v33  ;;  %v6961_v17 = vsel %vm2050_vm3, %v2127_v32, %v2129_v28 }
  0xe9   : > { %10304 = vst [vmem:[#allocation11_spill] sm:$0xff] %v6925_v45  ;;  %5691 = vmatprep.mubr.msk.f32.mxu1 %vm255_vm1, %v6696_v59  ;;  %v6940_v18 = vpop.f32.mrf.mxu0  ;;  %v6946_v45 = vsel %vm2050_vm3, %v2126_v5, %v2127_v32 }
  0xea   : > { %v6942_v57 = vpop.f32.mrf.mxu1 }
  0xeb   : > { %v6948_v59 = vpop.f32.mrf.mxu0  ;;  %5742 = vmatmul.mubr.msk.f32.gmra.mxu0 %vm255_vm1, %v6936_v44 }
  0xec   : > { %v6950_v53 = vpop.f32.mrf.mxu1  ;;  %5692 = vmatmul.mubr.msk.f32.gmra.mxu1 %vm255_vm1, %v6707_v54  ;;  %5744 = vmatprep.mubr.msk.f32.mxu0 %vm255_vm1, %v6946_v45 }
  0xed   : > { %10305 = vst [vmem:[#allocation12_spill] sm:$0xff] %v6950_v53  ;;  %5694 = vmatprep.mubr.msk.f32.mxu1 %vm255_vm1, %v1781_v48  ;;  %v6963_v5 = vpop.f32.mrf.mxu0 }
  0xee   : > { %v6965_v31 = vpop.f32.mrf.mxu1 }
  0xef   : > { %10306 = vst [vmem:[#allocation15_spill] sm:$0xff] %v6965_v31  ;;  %v6967_v12 = vpop.f32.mrf.mxu0  ;;  %5745 = vmatmul.mubr.msk.f32.gmra.mxu0 %vm255_vm1, %v6961_v17 }
  0xf0   : > { %v6969_v54 = vpop.f32.mrf.mxu1  ;;  %5695 = vmatmul.mubr.msk.f32.gmra.mxu1 %vm255_vm1, %v1783_v52  ;;  %5799 = vmatprep.mubr.msk.f32.mxu0 %vm255_vm1, %v6233_v6 }
  0xf1   : > { %10307 = vst [vmem:[#allocation2_spill] sm:$0xff] %v6969_v54  ;;  %5749 = vmatprep.mubr.msk.f32.mxu1 %vm255_vm1, %v6209_v62  ;;  %v6978_v32 = vpop.f32.mrf.mxu0 }
  0xf2   : > { %v6980_v33 = vpop.f32.mrf.mxu1 }
  0xf3   : > { %10308 = vst [vmem:[#allocation3_spill] sm:$0xff] %v6980_v33  ;;  %v5501_v28 = vpop.f32.mrf.mxu0  ;;  %5800 = vmatmul.mubr.msk.f32.vlgmr.msra.gmra.mxu0 %vm255_vm1, %v6236_v14 }
  0xf4   : > { %v5451_v15 = vpop.f32.mrf.mxu1  ;;  %5750 = vmatmul.mubr.msk.f32.vlgmr.msra.gmra.mxu1 %vm255_vm1, %v6216_v10  ;;  %5802 = vmatprep.mubr.msk.f32.mxu0 %vm255_vm1, %v6253_v1 }
  0xf5   : > { %v662_v48 = vadd.f32 %v5451_v15, %v6793_v60  ;;  %5752 = vmatprep.mubr.msk.f32.mxu1 %vm255_vm1, %v6233_v6  ;;  %v892_v52 = vpop.f32.mrf.mxu0 }
  0xf6   : > { %v656_v62 = vpop.f32.mrf.mxu1 }
  0xf7   : > { %v6991_v54 = vadd.f32 %v5501_v28, %v662_v48  ;;  %v657_v33 = vadd.f32 %v656_v62, %v6809_v47  ;;  %v5504_v53 = vpop.f32.mrf.mxu0  ;;  %5803 = vmatmul.mubr.msk.f32.gmra.mxu0 %vm255_vm1, %v6256_v2 }
  0xf8   : > { %v5454_v31 = vpop.f32.mrf.mxu1  ;;  %5753 = vmatmul.mubr.msk.f32.gmra.mxu1 %vm255_vm1, %v6236_v14  ;;  %5805 = vmatprep.mubr.msk.f32.mxu0 %vm255_vm1, %v6273_v9 }
  0xf9   : > { %v6998_v10 = vadd.f32 %v892_v52, %v657_v33  ;;  %v672_v6 = vadd.f32 %v5454_v31, %v6818_v24  ;;  %5755 = vmatprep.mubr.msk.f32.mxu1 %vm255_vm1, %v6253_v1  ;;  %v902_v47 = vpop.f32.mrf.mxu0 }
  0xfa   : > { %v666_v60 = vpop.f32.mrf.mxu1 }
  0xfb   : > { %v7005_v15 = vadd.f32 %v5504_v53, %v672_v6  ;;  %v667_v28 = vadd.f32 %v666_v60, %v6834_v34  ;;  %v5507_v48 = vpop.f32.mrf.mxu0  ;;  %5806 = vmatmul.mubr.msk.f32.gmra.mxu0 %vm255_vm1, %v6276_v13 }
  0xfc   : > { %v5457_v14 = vpop.f32.mrf.mxu1  ;;  %5756 = vmatmul.mubr.msk.f32.gmra.mxu1 %vm255_vm1, %v6256_v2  ;;  %5808 = vmatprep.mubr.msk.f32.mxu0 %vm255_vm1, %v6293_v16 }
  0xfd   : > { %v7012_v24 = vadd.f32 %v902_v47, %v667_v28  ;;  %v682_v1 = vadd.f32 %v5457_v14, %v6843_v51  ;;  %5758 = vmatprep.mubr.msk.f32.mxu1 %vm255_vm1, %v6273_v9  ;;  %v912_v34 = vpop.f32.mrf.mxu0 }
  0xfe   : > { %v676_v53 = vpop.f32.mrf.mxu1 }
  0xff   : > { %v7019_v31 = vadd.f32 %v5507_v48, %v682_v1  ;;  %v677_v33 = vadd.f32 %v676_v53, %v6859_v21  ;;  %v5510_v62 = vpop.f32.mrf.mxu0  ;;  %5809 = vmatmul.mubr.msk.f32.gmra.mxu0 %vm255_vm1, %v10285_v26 }
 0x100   : > { %v5460_v2 = vpop.f32.mrf.mxu1  ;;  %5759 = vmatmul.mubr.msk.f32.gmra.mxu1 %vm255_vm1, %v6276_v13  ;;  %5811 = vmatprep.mubr.msk.f32.mxu0 %vm255_vm1, %v10286_v29 }
 0x101   : > { %v7026_v51 = vadd.f32 %v912_v34, %v677_v33  ;;  %v692_v9 = vadd.f32 %v5460_v2, %v6868_v37  ;;  %5761 = vmatprep.mubr.msk.f32.mxu1 %vm255_vm1, %v6293_v16  ;;  %v922_v21 = vpop.f32.mrf.mxu0 }
 0x102   : > { %v686_v52 = vpop.f32.mrf.mxu1 }
 0x103   : > { %v7033_v6 = vadd.f32 %v5510_v62, %v692_v9  ;;  %v687_v60 = vadd.f32 %v686_v52, %v6884_v55  ;;  %v5513_v47 = vpop.f32.mrf.mxu0  ;;  %5812 = vmatmul.mubr.msk.f32.gmra.mxu0 %vm255_vm1, %v10287_v38 }
 0x104   : > { %v5463_v13 = vpop.f32.mrf.mxu1  ;;  %5762 = vmatmul.mubr.msk.f32.gmra.mxu1 %vm255_vm1, %v10285_v26  ;;  %5814 = vmatprep.mubr.msk.f32.mxu0 %vm255_vm1, %v6333_v25 }
 0x105   : > { %v7040_v37 = vadd.f32 %v922_v21, %v687_v60  ;;  %v702_v16 = vadd.f32 %v5463_v13, %v6893_v43  ;;  %5764 = vmatprep.mubr.msk.f32.mxu1 %vm255_vm1, %v10286_v29  ;;  %v932_v55 = vpop.f32.mrf.mxu0 }
 0x106   : > { %v696_v28 = vpop.f32.mrf.mxu1 }
 0x107   : > { %v7047_v14 = vadd.f32 %v5513_v47, %v702_v16  ;;  %v697_v48 = vadd.f32 %v696_v28, %v6911_v42  ;;  %v5516_v1 = vpop.f32.mrf.mxu0  ;;  %5815 = vmatmul.mubr.msk.f32.gmra.mxu0 %vm255_vm1, %v6336_v30 }
 0x108   : > { %v5466_v26 = vpop.f32.mrf.mxu1  ;;  %5765 = vmatmul.mubr.msk.f32.gmra.mxu1 %vm255_vm1, %v10287_v38  ;;  %5817 = vmatprep.mubr.msk.f32.mxu0 %vm255_vm1, %v10288_v49 }
 0x109   : > { %v7054_v43 = vadd.f32 %v932_v55, %v697_v48  ;;  %v712_v29 = vadd.f32 %v5466_v26, %v6923_v4  ;;  %5767 = vmatprep.mubr.msk.f32.mxu1 %vm255_vm1, %v6333_v25  ;;  %v942_v42 = vpop.f32.mrf.mxu0 }
 0x10a   : > { %v706_v53 = vpop.f32.mrf.mxu1 }
 0x10b   : > { %v7061_v34 = vadd.f32 %v5516_v1, %v712_v29  ;;  %v707_v33 = vadd.f32 %v706_v53, %v6940_v18  ;;  %v5519_v2 = vpop.f32.mrf.mxu0  ;;  %5818 = vmatmul.mubr.msk.f32.gmra.mxu0 %vm255_vm1, %v10289_v27 }
 0x10c   : > { %v5469_v38 = vpop.f32.mrf.mxu1  ;;  %5768 = vmatmul.mubr.msk.f32.gmra.mxu1 %vm255_vm1, %v6336_v30  ;;  %5820 = vmatprep.mubr.msk.f32.mxu0 %vm255_vm1, %v6789_v58 }
 0x10d   : > { %v7068_v4 = vadd.f32 %v942_v42, %v707_v33  ;;  %v722_v25 = vadd.f32 %v5469_v38, %v6948_v59  ;;  %5770 = vmatprep.mubr.msk.f32.mxu1 %vm255_vm1, %v10288_v49  ;;  %v952_v18 = vpop.f32.mrf.mxu0 }
 0x10e   : > { %v716_v62 = vpop.f32.mrf.mxu1 }
 0x10f   : > { %v7075_v9 = vadd.f32 %v5519_v2, %v722_v25  ;;  %v717_v52 = vadd.f32 %v716_v62, %v6963_v5  ;;  %v5522_v21 = vpop.f32.mrf.mxu0  ;;  %5821 = vmatmul.mubr.msk.f32.gmra.mxu0 %vm255_vm1, %v6806_v11  ;;  %v5860_v62 = vld [vmem:[%s5924_s26 + $0x180] sm:$0xff] }
 0x110   : > { %v5472_v30 = vpop.f32.mrf.mxu1  ;;  %5771 = vmatmul.mubr.msk.f32.gmra.mxu1 %vm255_vm1, %v10289_v27  ;;  %5823 = vmatprep.mubr.msk.f32.mxu0 %vm255_vm1, %v6814_v3 }
 0x111   : > { %v7082_v59 = vadd.f32 %v952_v18, %v717_v52  ;;  %v732_v49 = vadd.f32 %v5472_v30, %v6967_v12  ;;  %5773 = vmatprep.mubr.msk.f32.mxu1 %vm255_vm1, %v6789_v58  ;;  %v962_v5 = vpop.f32.mrf.mxu0  ;;  %v5861_v18 = vld [vmem:[%s5924_s26 + $0x188] sm:$0xff] }
 0x112   : > { %v726_v60 = vpop.f32.mrf.mxu1  ;;  %v2458_v52 = vrot.slane %v5861_v18, 2 }
 0x113   : > { %v7089_v13 = vadd.f32 %v5522_v21, %v732_v49  ;;  %v727_v47 = vadd.f32 %v726_v60, %v6978_v32  ;;  %v5525_v16 = vpop.f32.mrf.mxu0  ;;  %5824 = vmatmul.mubr.msk.f32.gmra.mxu0 %vm255_vm1, %v6831_v20  ;;  %v10309_v49 = vld [vmem:[#allocation8_spill] sm:$0xff] }
 0x114   : > { %v5475_v27 = vpop.f32.mrf.mxu1  ;;  %5774 = vmatmul.mubr.msk.f32.gmra.mxu1 %vm255_vm1, %v6806_v11  ;;  %5826 = vmatprep.mubr.msk.f32.mxu0 %vm255_vm1, %v6839_v40 }
 0x115   : > { %v7096_v12 = vadd.f32 %v962_v5, %v727_v47  ;;  %v742_v58 = vadd.f32 %v5475_v27, %v6795_v22  ;;  %5776 = vmatprep.mubr.msk.f32.mxu1 %vm255_vm1, %v6814_v3  ;;  %v972_v32 = vpop.f32.mrf.mxu0 }
 0x116   : > { %v736_v28 = vpop.f32.mrf.mxu1 }
 0x117   : > { %v7103_v55 = vadd.f32 %v5525_v16, %v742_v58  ;;  %v737_v48 = vadd.f32 %v736_v28, %v6811_v63  ;;  %v5528_v26 = vpop.f32.mrf.mxu0  ;;  %5827 = vmatmul.mubr.msk.f32.gmra.mxu0 %vm255_vm1, %v6856_v36  ;;  %v10311_v16 = vld [vmem:[#allocation9_spill] sm:$0xff] }
 0x118   : > { %v5478_v11 = vpop.f32.mrf.mxu1  ;;  %5777 = vmatmul.mubr.msk.f32.gmra.mxu1 %vm255_vm1, %v6831_v20  ;;  %5829 = vmatprep.mubr.msk.f32.mxu0 %vm255_vm1, %v6864_v39  ;;  %v10312_v28 = vld [vmem:[#allocation13_spill] sm:$0xff] }
 0x119   : > { %v7110_v22 = vadd.f32 %v972_v32, %v737_v48  ;;  %v752_v3 = vadd.f32 %v5478_v11, %v6820_v19  ;;  %5779 = vmatprep.mubr.msk.f32.mxu1 %vm255_vm1, %v6839_v40  ;;  %v982_v63 = vpop.f32.mrf.mxu0  ;;  %v2728_v32 = vrot.slane %v10312_v28, 2  ;;  %v2729_v48 = vrot.slane %v10300_v35, 2  ;;  %v10314_v35 = vld [vmem:[#allocation11_spill] sm:$0xff] }
 0x11a   : > { %v746_v1 = vpop.f32.mrf.mxu1  ;;  %v10318_v28 = vld [vmem:[#allocation3_spill] sm:$0xff] }
 0x11b   : > { %v7117_v29 = vadd.f32 %v5528_v26, %v752_v3  ;;  %v747_v53 = vadd.f32 %v746_v1, %v6836_v0  ;;  %v5531_v42 = vpop.f32.mrf.mxu0  ;;  %5830 = vmatmul.mubr.msk.f32.gmra.mxu0 %vm255_vm1, %v6881_v56  ;;  %v10313_v1 = vld [vmem:[#allocation10_spill] sm:$0xff] }
 0x11c   : > { %v5481_v20 = vpop.f32.mrf.mxu1  ;;  %5780 = vmatmul.mubr.msk.f32.gmra.mxu1 %vm255_vm1, %v6856_v36  ;;  %5832 = vmatprep.mubr.msk.f32.mxu0 %vm255_vm1, %v6889_v61 }
 0x11d   : > { %v7124_v19 = vadd.f32 %v982_v63, %v747_v53  ;;  %v762_v40 = vadd.f32 %v5481_v20, %v6845_v50  ;;  %5782 = vmatprep.mubr.msk.f32.mxu1 %vm255_vm1, %v6864_v39  ;;  %v992_v33 = vpop.f32.mrf.mxu0 }
 0x11e   : > { %v756_v0 = vpop.f32.mrf.mxu1 }
 0x11f   : > { %v7131_v38 = vadd.f32 %v5531_v42, %v762_v40  ;;  %v757_v36 = vadd.f32 %v756_v0, %v6861_v7  ;;  %v5534_v25 = vpop.f32.mrf.mxu0  ;;  %5833 = vmatmul.mubr.msk.f32.gmra.mxu0 %vm255_vm1, %v6907_v46  ;;  %v2457_v7 = vrot.slane %v5860_v62, 2  ;;  %v10315_v62 = vld [vmem:[#allocation12_spill] sm:$0xff] }
 0x120   : > { %v5484_v2 = vpop.f32.mrf.mxu1  ;;  %5783 = vmatmul.mubr.msk.f32.gmra.mxu1 %vm255_vm1, %v6881_v56  ;;  %5835 = vmatprep.mubr.msk.f32.mxu0 %vm255_vm1, %v6916_v8 }
 0x121   : > { %v7138_v50 = vadd.f32 %v992_v33, %v757_v36  ;;  %v772_v39 = vadd.f32 %v5484_v2, %v6870_v23  ;;  %5785 = vmatprep.mubr.msk.f32.mxu1 %vm255_vm1, %v6889_v61  ;;  %v1002_v21 = vpop.f32.mrf.mxu0  ;;  %v10310_v23 = vld [vmem:[#allocation18_spill] sm:$0xff]  ;;  %v2459_v26 = vsel %vm2050_vm3, %v2457_v7, %v2458_v52 }
 0x122   : > { %v766_v30 = vpop.f32.mrf.mxu1  ;;  %v2460_v61 = vrot.slane %v10310_v23, 2 }
 0x123   : > { %v7147_v56 = vadd.f32 %v5534_v25, %v772_v39  ;;  %v767_v60 = vadd.f32 %v766_v30, %v10309_v49  ;;  %v5537_v47 = vpop.f32.mrf.mxu0  ;;  %5836 = vmatmul.mubr.msk.f32.gmra.mxu0 %vm255_vm1, %v6936_v44 }
 0x124   : > { %v5487_v5 = vpop.f32.mrf.mxu1  ;;  %5786 = vmatmul.mubr.msk.f32.gmra.mxu1 %vm255_vm1, %v6907_v46  ;;  %5838 = vmatprep.mubr.msk.f32.mxu0 %vm255_vm1, %v6946_v45  ;;  %v2461_v0 = vsel %vm2050_vm3, %v2458_v52, %v2460_v61 }
 0x125   : > { %v7155_v27 = vadd.f32 %v1002_v21, %v767_v60  ;;  %v782_v58 = vadd.f32 %v5487_v5, %v10311_v16  ;;  %5788 = vmatprep.mubr.msk.f32.mxu1 %vm255_vm1, %v6916_v8  ;;  %v1012_v11 = vpop.f32.mrf.mxu0  ;;  %v2731_v8 = vrot.slane %v6921_v41, 2  ;;  %v10316_v21 = vld [vmem:[#allocation15_spill] sm:$0xff] }
 0x126   : > { %v776_v46 = vpop.f32.mrf.mxu1 }
 0x127   : > { %v7165_v3 = vadd.f32 %v5537_v47, %v782_v58  ;;  %v777_v63 = vadd.f32 %v776_v46, %v10313_v1  ;;  %v5540_v20 = vpop.f32.mrf.mxu0  ;;  %5839 = vmatmul.mubr.msk.f32.gmra.mxu0 %vm255_vm1, %v6961_v17  ;;  %v2732_v18 = vsel %vm2050_vm3, %v2729_v48, %v2731_v8  ;;  %v10317_v47 = vld [vmem:[#allocation2_spill] sm:$0xff] }
 0x128   : > { %v5490_v53 = vpop.f32.mrf.mxu1  ;;  %5789 = vmatmul.mubr.msk.f32.gmra.mxu1 %vm255_vm1, %v6936_v44  ;;  %5841 = vmatprep.mubr.msk.f32.mxu0 %vm255_vm1, %v2459_v26  ;;  %v2730_v44 = vsel %vm2050_vm3, %v2728_v32, %v2729_v48 }
 0x129   : > { %v7173_v42 = vadd.f32 %v1012_v11, %v777_v63  ;;  %v792_v40 = vadd.f32 %v5490_v53, %v10314_v35  ;;  %5791 = vmatprep.mubr.msk.f32.mxu1 %vm255_vm1, %v6946_v45  ;;  %v1022_v36 = vpop.f32.mrf.mxu0 }
 0x12a   : > { %v786_v33 = vpop.f32.mrf.mxu1 }
 0x12b   : > { %v7181_v2 = vadd.f32 %v5540_v20, %v792_v40  ;;  %v787_v25 = vadd.f32 %v786_v33, %v6942_v57  ;;  %v5543_v39 = vpop.f32.mrf.mxu0  ;;  %5842 = vmatmul.mubr.msk.f32.gmra.mxu0 %vm255_vm1, %v2461_v0 }
 0x12c   : > { %v5493_v41 = vpop.f32.mrf.mxu1  ;;  %5792 = vmatmul.mubr.msk.f32.gmra.mxu1 %vm255_vm1, %v6961_v17  ;;  %5844 = vmatprep.mubr.msk.f32.mxu0 %vm255_vm1, %v2730_v44 }
 0x12d   : > { %v7187_v45 = vadd.f32 %v1022_v36, %v787_v25  ;;  %v802_v7 = vadd.f32 %v5493_v41, %v10315_v62  ;;  %5794 = vmatprep.mubr.msk.f32.mxu1 %vm255_vm1, %v2459_v26  ;;  %v1032_v30 = vpop.f32.mrf.mxu0 }
 0x12e   : > { %v796_v52 = vpop.f32.mrf.mxu1 }
 0x12f   : > { %v7193_v57 = vadd.f32 %v5543_v39, %v802_v7  ;;  %v797_v49 = vadd.f32 %v796_v52, %v10316_v21  ;;  %v5546_v17 = vpop.f32.mrf.mxu0  ;;  %5845 = vmatmul.mubr.msk.f32.gmra.mxu0 %vm255_vm1, %v2732_v18 }
 0x130   : > { %v5496_v60 = vpop.f32.mrf.mxu1  ;;  %5795 = vmatmul.mubr.msk.f32.gmra.mxu1 %vm255_vm1, %v2461_v0 }
 0x131   : > { %v7198_v5 = vadd.f32 %v1032_v30, %v797_v49  ;;  %v812_v23 = vadd.f32 %v5496_v60, %v10317_v47  ;;  %v1042_v16 = vpop.f32.mrf.mxu0 }
 0x132   : > { %v806_v61 = vpop.f32.mrf.mxu1 }
 0x133   : > { %v7201_v58 = vadd.f32 %v5546_v17, %v812_v23  ;;  %v807_v32 = vadd.f32 %v806_v61, %v10318_v28  ;;  %v5601_v46 = vpop.f32.mrf.mxu0 }
 0x134   : > { %v5551_v48 = vpop.f32.mrf.mxu1 }
 0x135   : > { %v7204_v11 = vadd.f32 %v1042_v16, %v807_v32  ;;  %v1475_v26 = vadd.f32 %v5551_v48, %v6991_v54  ;;  %v1587_v63 = vpop.f32.mrf.mxu0 }
 0x136   : > { %v1315_v1 = vpop.f32.mrf.mxu1 }
 0x137   : > { %v7207_v53 = vadd.f32 %v5601_v46, %v1475_v26  ;;  %v1474_v20 = vadd.f32 %v1315_v1, %v6998_v10  ;;  %v5604_v35 = vpop.f32.mrf.mxu0 }
 0x138   : > { %v5554_v8 = vpop.f32.mrf.mxu1 }
 0x139   : > { %v7210_v40 = vadd.f32 %v1587_v63, %v1474_v20  ;;  %v1477_v0 = vadd.f32 %v5554_v8, %v7005_v15  ;;  %v1597_v36 = vpop.f32.mrf.mxu0 }
 0x13a   : > { %v1325_v33 = vpop.f32.mrf.mxu1 }
 0x13b   : > { %v7213_v44 = vadd.f32 %v5604_v35, %v1477_v0  ;;  %v1476_v25 = vadd.f32 %v1325_v33, %v7012_v24  ;;  %v5607_v54 = vpop.f32.mrf.mxu0 }
 0x13c   : > { %v5557_v41 = vpop.f32.mrf.mxu1 }
 0x13d   : > { %v7216_v39 = vadd.f32 %v1597_v36, %v1476_v25  ;;  %v1479_v62 = vadd.f32 %v5557_v41, %v7019_v31  ;;  %v1607_v10 = vpop.f32.mrf.mxu0 }
 0x13e   : > { %v1335_v7 = vpop.f32.mrf.mxu1 }
 0x13f   : > { %v7219_v18 = vadd.f32 %v5607_v54, %v1479_v62  ;;  %v1478_v52 = vadd.f32 %v1335_v7, %v7026_v51  ;;  %v5610_v15 = vpop.f32.mrf.mxu0 }
 0x140   : > { %v5560_v30 = vpop.f32.mrf.mxu1 }
 0x141   : > { %v7222_v21 = vadd.f32 %v1607_v10, %v1478_v52  ;;  %v1481_v49 = vadd.f32 %v5560_v30, %v7033_v6  ;;  %v1617_v24 = vpop.f32.mrf.mxu0 }
 0x142   : > { %v1345_v60 = vpop.f32.mrf.mxu1 }
 0x143   : > { %v7225_v17 = vadd.f32 %v5610_v15, %v1481_v49  ;;  %v1480_v47 = vadd.f32 %v1345_v60, %v7040_v37  ;;  %v5613_v31 = vpop.f32.mrf.mxu0 }
 0x144   : > { %v5563_v23 = vpop.f32.mrf.mxu1 }
 0x145   : > { %v7228_v61 = vadd.f32 %v1617_v24, %v1480_v47  ;;  %v1483_v16 = vadd.f32 %v5563_v23, %v7047_v14  ;;  %v1627_v51 = vpop.f32.mrf.mxu0 }
 0x146   : > { %v1355_v28 = vpop.f32.mrf.mxu1 }
 0x147   : > { %v7231_v32 = vadd.f32 %v5613_v31, %v1483_v16  ;;  %v1482_v48 = vadd.f32 %v1355_v28, %v7054_v43  ;;  %v5616_v6 = vpop.f32.mrf.mxu0 }
 0x148   : > { %v5566_v46 = vpop.f32.mrf.mxu1 }
 0x149   : > { %v7234_v26 = vadd.f32 %v1627_v51, %v1482_v48  ;;  %v1485_v1 = vadd.f32 %v5566_v46, %v7061_v34  ;;  %v1637_v37 = vpop.f32.mrf.mxu0 }
 0x14a   : > { %v1365_v63 = vpop.f32.mrf.mxu1 }
 0x14b   : > { %v7237_v20 = vadd.f32 %v5616_v6, %v1485_v1  ;;  %v1484_v8 = vadd.f32 %v1365_v63, %v7068_v4  ;;  %v5619_v14 = vpop.f32.mrf.mxu0 }
 0x14c   : > { %v5569_v35 = vpop.f32.mrf.mxu1 }
 0x14d   : > { %v7240_v0 = vadd.f32 %v1637_v37, %v1484_v8  ;;  %v1487_v33 = vadd.f32 %v5569_v35, %v7075_v9  ;;  %v1647_v43 = vpop.f32.mrf.mxu0 }
 0x14e   : > { %v1375_v36 = vpop.f32.mrf.mxu1 }
 0x14f   : > { %v7243_v25 = vadd.f32 %v5619_v14, %v1487_v33  ;;  %v1486_v41 = vadd.f32 %v1375_v36, %v7082_v59  ;;  %v5622_v34 = vpop.f32.mrf.mxu0 }
 0x150   : > { %v5572_v54 = vpop.f32.mrf.mxu1 }
 0x151   : > { %v7246_v62 = vadd.f32 %v1647_v43, %v1486_v41  ;;  %v1489_v7 = vadd.f32 %v5572_v54, %v7089_v13  ;;  %v1657_v4 = vpop.f32.mrf.mxu0 }
 0x152   : > { %v1385_v10 = vpop.f32.mrf.mxu1 }
 0x153   : > { %v7249_v52 = vadd.f32 %v5622_v34, %v1489_v7  ;;  %v1488_v30 = vadd.f32 %v1385_v10, %v7096_v12  ;;  %v5625_v9 = vpop.f32.mrf.mxu0 }
 0x154   : > { %v5575_v15 = vpop.f32.mrf.mxu1 }
 0x155   : > { %v7252_v49 = vadd.f32 %v1657_v4, %v1488_v30  ;;  %v1491_v60 = vadd.f32 %v5575_v15, %v7103_v55  ;;  %v1667_v59 = vpop.f32.mrf.mxu0 }
 0x156   : > { %v1395_v24 = vpop.f32.mrf.mxu1 }
 0x157   : > { %v7255_v47 = vadd.f32 %v5625_v9, %v1491_v60  ;;  %v1490_v23 = vadd.f32 %v1395_v24, %v7110_v22  ;;  %v5628_v13 = vpop.f32.mrf.mxu0 }
 0x158   : > { %v5578_v31 = vpop.f32.mrf.mxu1 }
 0x159   : > { %v7258_v16 = vadd.f32 %v1667_v59, %v1490_v23  ;;  %v1493_v28 = vadd.f32 %v5578_v31, %v7117_v29  ;;  %v1677_v12 = vpop.f32.mrf.mxu0 }
 0x15a   : > { %v1405_v51 = vpop.f32.mrf.mxu1 }
 0x15b   : > { %v7261_v48 = vadd.f32 %v5628_v13, %v1493_v28  ;;  %v1492_v46 = vadd.f32 %v1405_v51, %v7124_v19  ;;  %v5631_v55 = vpop.f32.mrf.mxu0 }
 0x15c   : > { %v5581_v6 = vpop.f32.mrf.mxu1 }
 0x15d   : > { %v7264_v1 = vadd.f32 %v1677_v12, %v1492_v46  ;;  %v1495_v63 = vadd.f32 %v5581_v6, %v7131_v38  ;;  %v1687_v22 = vpop.f32.mrf.mxu0 }
 0x15e   : > { %v1415_v37 = vpop.f32.mrf.mxu1 }
 0x15f   : > { %v7267_v8 = vadd.f32 %v5631_v55, %v1495_v63  ;;  %v1494_v35 = vadd.f32 %v1415_v37, %v7138_v50  ;;  %v5634_v29 = vpop.f32.mrf.mxu0 }
 0x160   : > { %v5584_v14 = vpop.f32.mrf.mxu1 }
 0x161   : > { %v7270_v33 = vadd.f32 %v1687_v22, %v1494_v35  ;;  %v1497_v36 = vadd.f32 %v5584_v14, %v7147_v56  ;;  %v1697_v19 = vpop.f32.mrf.mxu0 }
 0x162   : > { %v1425_v43 = vpop.f32.mrf.mxu1 }
 0x163   : > { %v7273_v41 = vadd.f32 %v5634_v29, %v1497_v36  ;;  %v1496_v54 = vadd.f32 %v1425_v43, %v7155_v27  ;;  %v5637_v38 = vpop.f32.mrf.mxu0 }
 0x164   : > { %v5587_v34 = vpop.f32.mrf.mxu1 }
 0x165   : > { %v7276_v7 = vadd.f32 %v1697_v19, %v1496_v54  ;;  %v1499_v10 = vadd.f32 %v5587_v34, %v7165_v3  ;;  %v1707_v50 = vpop.f32.mrf.mxu0 }
 0x166   : > { %v1435_v4 = vpop.f32.mrf.mxu1 }
 0x167   : > { %v7279_v30 = vadd.f32 %v5637_v38, %v1499_v10  ;;  %v1498_v15 = vadd.f32 %v1435_v4, %v7173_v42  ;;  %v5640_v56 = vpop.f32.mrf.mxu0 }
 0x168   : > { %v5590_v9 = vpop.f32.mrf.mxu1 }
 0x169   : > { %v7282_v60 = vadd.f32 %v1707_v50, %v1498_v15  ;;  %v1501_v24 = vadd.f32 %v5590_v9, %v7181_v2  ;;  %v1717_v27 = vpop.f32.mrf.mxu0 }
 0x16a   : > { %v1445_v59 = vpop.f32.mrf.mxu1 }
 0x16b   : > { %10319 = vst [vmem:[#allocation16_spill] sm:$0xff] %v7282_v60  ;;  %v7285_v23 = vadd.f32 %v5640_v56, %v1501_v24  ;;  %v1500_v31 = vadd.f32 %v1445_v59, %v7187_v45  ;;  %v5643_v3 = vpop.f32.mrf.mxu0 }
 0x16c   : > { %v5593_v13 = vpop.f32.mrf.mxu1 }
 0x16d   : > { %v7288_v28 = vadd.f32 %v1717_v27, %v1500_v31  ;;  %v1503_v51 = vadd.f32 %v5593_v13, %v7193_v57  ;;  %v1727_v42 = vpop.f32.mrf.mxu0 }
 0x16e   : > { %v1455_v12 = vpop.f32.mrf.mxu1 }
 0x16f   : > { %10320 = vst [vmem:[#allocation4_spill] sm:$0xff] %v7288_v28  ;;  %v7291_v46 = vadd.f32 %v5643_v3, %v1503_v51  ;;  %v1502_v6 = vadd.f32 %v1455_v12, %v7198_v5  ;;  %v5646_v2 = vpop.f32.mrf.mxu0 }
 0x170   : > { %v5596_v55 = vpop.f32.mrf.mxu1 }
 0x171   : > { %v7294_v63 = vadd.f32 %v1727_v42, %v1502_v6  ;;  %v1505_v37 = vadd.f32 %v5596_v55, %v7201_v58  ;;  %v1737_v45 = vpop.f32.mrf.mxu0 }
 0x172   : > { %v1465_v22 = vpop.f32.mrf.mxu1 }
 0x173   : > { %10321 = vst [vmem:[#allocation5_spill] sm:$0xff] %v7294_v63  ;;  %v7297_v35 = vadd.f32 %v5646_v2, %v1505_v37  ;;  %v1504_v14 = vadd.f32 %v1465_v22, %v7204_v11  ;;  %v5701_v57 = vpop.f32.mrf.mxu0 }
 0x174   : > { %v5651_v29 = vpop.f32.mrf.mxu1 }
 0x175   : > { %v7300_v36 = vadd.f32 %v1737_v45, %v1504_v14  ;;  %v2019_v43 = vadd.f32 %v5651_v29, %v7207_v53  ;;  %v7305_v5 = vpop.f32.mrf.mxu0 }
 0x176   : > { %v7303_v19 = vpop.f32.mrf.mxu1 }
 0x177   : > { %10322 = vst [vmem:[#allocation17_spill] sm:$0xff] %v7300_v36  ;;  %v7307_v54 = vadd.f32 %v5701_v57, %v2019_v43  ;;  %v5704_v58 = vpop.f32.mrf.mxu0 }
 0x178   : > { %v5654_v34 = vpop.f32.mrf.mxu1 }
 0x179   : > { %v2021_v38 = vadd.f32 %v5654_v34, %v7213_v44  ;;  %v7312_v4 = vpop.f32.mrf.mxu0 }
 0x17a   : > { %v7310_v10 = vpop.f32.mrf.mxu1 }
 0x17b   : > { %v7314_v11 = vadd.f32 %v5704_v58, %v2021_v38  ;;  %v5707_v15 = vpop.f32.mrf.mxu0 }
 0x17c   : > { %v5657_v50 = vpop.f32.mrf.mxu1 }
 0x17d   : > { %v2023_v53 = vadd.f32 %v5657_v50, %v7219_v18  ;;  %v7319_v56 = vpop.f32.mrf.mxu0 }
 0x17e   : > { %v7317_v9 = vpop.f32.mrf.mxu1 }
 0x17f   : > { %v7321_v24 = vadd.f32 %v5707_v15, %v2023_v53  ;;  %v5710_v27 = vpop.f32.mrf.mxu0 }
 0x180   : > { %v5660_v59 = vpop.f32.mrf.mxu1 }
 0x181   : > { %v2025_v44 = vadd.f32 %v5660_v59, %v7225_v17  ;;  %v7326_v13 = vpop.f32.mrf.mxu0 }
 0x182   : > { %v7324_v31 = vpop.f32.mrf.mxu1 }
 0x183   : > { %v7328_v3 = vadd.f32 %v5710_v27, %v2025_v44  ;;  %v5713_v12 = vpop.f32.mrf.mxu0 }
 0x184   : > { %v5663_v51 = vpop.f32.mrf.mxu1 }
 0x185   : > { %v2027_v18 = vadd.f32 %v5663_v51, %v7231_v32  ;;  %v7333_v6 = vpop.f32.mrf.mxu0 }
 0x186   : > { %v7331_v42 = vpop.f32.mrf.mxu1 }
 0x187   : > { %v7335_v55 = vadd.f32 %v5713_v12, %v2027_v18  ;;  %v5716_v37 = vpop.f32.mrf.mxu0 }
 0x188   : > { %v5666_v2 = vpop.f32.mrf.mxu1 }
 0x189   : > { %v2029_v17 = vadd.f32 %v5666_v2, %v7237_v20  ;;  %v7340_v45 = vpop.f32.mrf.mxu0 }
 0x18a   : > { %v7338_v22 = vpop.f32.mrf.mxu1 }
 0x18b   : > { %v7342_v14 = vadd.f32 %v5716_v37, %v2029_v17  ;;  %v5719_v57 = vpop.f32.mrf.mxu0 }
 0x18c   : > { %v5669_v29 = vpop.f32.mrf.mxu1 }
 0x18d   : > { %v2031_v32 = vadd.f32 %v5669_v29, %v7243_v25  ;;  %v7347_v34 = vpop.f32.mrf.mxu0 }
 0x18e   : > { %v7345_v43 = vpop.f32.mrf.mxu1 }
 0x18f   : > { %v7349_v58 = vadd.f32 %v5719_v57, %v2031_v32  ;;  %v5722_v50 = vpop.f32.mrf.mxu0 }
 0x190   : > { %v5672_v38 = vpop.f32.mrf.mxu1 }
 0x191   : > { %v2033_v20 = vadd.f32 %v5672_v38, %v7249_v52  ;;  %v7354_v53 = vpop.f32.mrf.mxu0 }
 0x192   : > { %v7352_v15 = vpop.f32.mrf.mxu1 }
 0x193   : > { %v7356_v59 = vadd.f32 %v5722_v50, %v2033_v20  ;;  %v5725_v44 = vpop.f32.mrf.mxu0 }
 0x194   : > { %v5675_v27 = vpop.f32.mrf.mxu1 }
 0x195   : > { %v2035_v25 = vadd.f32 %v5675_v27, %v7255_v47  ;;  %v7361_v12 = vpop.f32.mrf.mxu0 }
 0x196   : > { %v7359_v51 = vpop.f32.mrf.mxu1 }
 0x197   : > { %v7363_v18 = vadd.f32 %v5725_v44, %v2035_v25  ;;  %v5728_v37 = vpop.f32.mrf.mxu0 }
 0x198   : > { %v5678_v2 = vpop.f32.mrf.mxu1 }
 0x199   : > { %v2037_v52 = vadd.f32 %v5678_v2, %v7261_v48  ;;  %v7368_v29 = vpop.f32.mrf.mxu0 }
 0x19a   : > { %v7366_v17 = vpop.f32.mrf.mxu1 }
 0x19b   : > { %v7370_v57 = vadd.f32 %v5728_v37, %v2037_v52  ;;  %v5731_v38 = vpop.f32.mrf.mxu0 }
 0x19c   : > { %v5681_v32 = vpop.f32.mrf.mxu1 }
 0x19d   : > { %v2039_v47 = vadd.f32 %v5681_v32, %v7267_v8  ;;  %v7375_v20 = vpop.f32.mrf.mxu0 }
 0x19e   : > { %v7373_v50 = vpop.f32.mrf.mxu1 }
 0x19f   : > { %v7377_v27 = vadd.f32 %v5731_v38, %v2039_v47  ;;  %v5734_v25 = vpop.f32.mrf.mxu0 }
 0x1a0   : > { %v5684_v44 = vpop.f32.mrf.mxu1 }
 0x1a1   : > { %10323 = vst [vmem:[#allocation14_spill] sm:$0xff] %v7377_v27  ;;  %v2041_v48 = vadd.f32 %v5684_v44, %v7273_v41  ;;  %v7382_v36 = vpop.f32.mrf.mxu0 }
 0x1a2   : > { %v7380_v2 = vpop.f32.mrf.mxu1 }
 0x1a3   : > { %v7384_v37 = vadd.f32 %v5734_v25, %v2041_v48  ;;  %v5737_v63 = vpop.f32.mrf.mxu0 }
 0x1a4   : > { %v5687_v52 = vpop.f32.mrf.mxu1 }
 0x1a5   : > { %10324 = vst [vmem:[#allocation6_spill] sm:$0xff] %v7384_v37  ;;  %v2043_v8 = vadd.f32 %v5687_v52, %v7279_v30  ;;  %v7389_v28 = vpop.f32.mrf.mxu0 }
 0x1a6   : > { %v7387_v32 = vpop.f32.mrf.mxu1 }
 0x1a7   : > { %10325 = vst [vmem:[#allocation7_spill] sm:$0xff] %v7387_v32  ;;  %v7391_v38 = vadd.f32 %v5737_v63, %v2043_v8  ;;  %v5740_v60 = vpop.f32.mrf.mxu0 }
 0x1a8   : > { %v5690_v47 = vpop.f32.mrf.mxu1 }
 0x1a9   : > { %10326 = vst [vmem:[#allocation8_spill] sm:$0xff] %v7391_v38  ;;  %v2045_v41 = vadd.f32 %v5690_v47, %v7285_v23  ;;  %v7396_v27 = vpop.f32.mrf.mxu0  ;;  %v2018_v23 = vadd.f32 %v7303_v19, %v7210_v40 }
 0x1aa   : > { %v7394_v44 = vpop.f32.mrf.mxu1  ;;  %10327 = vst [vmem:[#allocation18_spill] sm:$0xff] %v7396_v27 }
 0x1ab   : > { %v7398_v25 = vadd.f32 %v5740_v60, %v2045_v41  ;;  %v5743_v37 = vpop.f32.mrf.mxu0 }
 0x1ac   : > { %v5693_v48 = vpop.f32.mrf.mxu1 }
 0x1ad   : > { %10328 = vst [vmem:[#allocation9_spill] sm:$0xff] %v7398_v25  ;;  %v2047_v30 = vadd.f32 %v5693_v48, %v7291_v46  ;;  %v7403_v32 = vpop.f32.mrf.mxu0  ;;  %v2425_v25 = vadd.f32 %v7305_v5, %v2018_v23 }
 0x1ae   : > { %v7401_v52 = vpop.f32.mrf.mxu1  ;;  %10329 = vst [vmem:[#allocation13_spill] sm:$0xff] %v7403_v32 }
 0x1af   : > { %v7405_v63 = vadd.f32 %v5743_v37, %v2047_v30  ;;  %v5746_v38 = vpop.f32.mrf.mxu0  ;;  %v2020_v37 = vadd.f32 %v7310_v10, %v7216_v39 }
 0x1b0   : > { %v5696_v8 = vpop.f32.mrf.mxu1 }
 0x1b1   : > { %10330 = vst [vmem:[#allocation10_spill] sm:$0xff] %v7405_v63  ;;  %v2049_v47 = vadd.f32 %v5696_v8, %v7297_v35  ;;  %v7412_v60 = vpop.f32.mrf.mxu0  ;;  %v2022_v35 = vadd.f32 %v7317_v9, %v7222_v21  ;;  %v2024_v21 = vadd.f32 %v7324_v31, %v7228_v61  ;;  %v2026_v31 = vadd.f32 %v7331_v42, %v7234_v26 }
 0x1b2   : > { %v7410_v27 = vpop.f32.mrf.mxu1  ;;  %v2028_v42 = vadd.f32 %v7338_v22, %v7240_v0  ;;  %v2030_v22 = vadd.f32 %v7345_v43, %v7246_v62  ;;  %v2032_v43 = vadd.f32 %v7352_v15, %v7252_v49  ;;  %v2034_v15 = vadd.f32 %v7359_v51, %v7258_v16 }
 0x1b3   : > { %v7414_v41 = vadd.f32 %v5746_v38, %v2049_v47  ;;  %v5801_v48 = vpop.f32.mrf.mxu0  ;;  %v2427_v38 = vadd.f32 %v7312_v4, %v2020_v37  ;;  %v2431_v61 = vadd.f32 %v7326_v13, %v2024_v21  ;;  %v2433_v26 = vadd.f32 %v7333_v6, %v2026_v31 }
 0x1b4   : > { %v5751_v46 = vpop.f32.mrf.mxu1  ;;  %v2435_v0 = vadd.f32 %v7340_v45, %v2028_v42  ;;  %v2437_v62 = vadd.f32 %v7347_v34, %v2030_v22  ;;  %v2439_v49 = vadd.f32 %v7354_v53, %v2032_v43  ;;  %v2441_v16 = vadd.f32 %v7361_v12, %v2034_v15 }
 0x1b5   : > { %10331 = vst [vmem:[#allocation11_spill] sm:$0xff] %v7414_v41  ;;  %v2697_v30 = vadd.f32 %v5751_v46, %v7307_v54  ;;  %v2808_v32 = vpop.f32.mrf.mxu0  ;;  %v2036_v51 = vadd.f32 %v7366_v17, %v7264_v1  ;;  %v2038_v17 = vadd.f32 %v7373_v50, %v7270_v33  ;;  %v2040_v50 = vadd.f32 %v7380_v2, %v7276_v7  ;;  %v10333_v2 = vld [vmem:[#allocation16_spill] sm:$0xff] }
 0x1b6   : > { %v2537_v63 = vpop.f32.mrf.mxu1 }
 0x1b7   : > { %v2696_v40 = vadd.f32 %v2537_v63, %v2425_v25  ;;  %v5804_v8 = vpop.f32.mrf.mxu0  ;;  %v7423_v47 = vadd.f32 %v5801_v48, %v2697_v30  ;;  %v2429_v63 = vadd.f32 %v7319_v56, %v2022_v35  ;;  %v2443_v1 = vadd.f32 %v7368_v29, %v2036_v51  ;;  %v10334_v51 = vld [vmem:[#allocation7_spill] sm:$0xff] }
 0x1b8   : > { %v5754_v19 = vpop.f32.mrf.mxu1  ;;  %v2445_v33 = vadd.f32 %v7375_v20, %v2038_v17  ;;  %v2447_v7 = vadd.f32 %v7382_v36, %v2040_v50 }
 0x1b9   : > { %v7425_v41 = vadd.f32 %v2808_v32, %v2696_v40  ;;  %v2699_v5 = vadd.f32 %v5754_v19, %v7314_v11  ;;  %v2818_v10 = vpop.f32.mrf.mxu0  ;;  %v3001_v32 = vsel %vm10004_vm4, %v7423_v47, 0.0 }
 0x1ba   : > { %v2547_v39 = vpop.f32.mrf.mxu1 }
 0x1bb   : > { %v3000_v54 = vsel %vm10004_vm4, %v7425_v41, 0.0  ;;  %v2698_v25 = vadd.f32 %v2547_v39, %v2427_v38  ;;  %v5807_v4 = vpop.f32.mrf.mxu0  ;;  %v7435_v23 = vadd.f32 %v5804_v8, %v2699_v5 }
 0x1bc   : > { %v5757_v9 = vpop.f32.mrf.mxu1  ;;  %v3002_v48 = vadd.f32 %v3001_v32, %v3000_v54 }
 0x1bd   : > { %v7437_v11 = vadd.f32 %v2818_v10, %v2698_v25  ;;  %v2701_v46 = vadd.f32 %v5757_v9, %v7321_v24  ;;  %v2828_v30 = vpop.f32.mrf.mxu0  ;;  %v3005_v38 = vsel %vm10004_vm4, %v7435_v23, 0.0 }
 0x1be   : > { %v2557_v37 = vpop.f32.mrf.mxu1 }
 0x1bf   : > { %v3003_v56 = vsel %vm10004_vm4, %v7437_v11, 0.0  ;;  %v2700_v40 = vadd.f32 %v2557_v37, %v2429_v63  ;;  %v5810_v8 = vpop.f32.mrf.mxu0  ;;  %v7447_v5 = vadd.f32 %v5807_v4, %v2701_v46 }
 0x1c0   : > { %v3004_v35 = vadd.f32 %v3003_v56, %v3002_v48  ;;  %v5760_v19 = vpop.f32.mrf.mxu1 }
 0x1c1   : > { %v7449_v24 = vadd.f32 %v2828_v30, %v2700_v40  ;;  %v2703_v39 = vadd.f32 %v5760_v19, %v7328_v3  ;;  %v2838_v25 = vpop.f32.mrf.mxu0  ;;  %v3009_v32 = vsel %vm10004_vm4, %v7447_v5, 0.0 }
 0x1c2   : > { %v3006_v10 = vadd.f32 %v3005_v38, %v3004_v35  ;;  %v2567_v54 = vpop.f32.mrf.mxu1 }
 0x1c3   : > { %v3007_v13 = vsel %vm10004_vm4, %v7449_v24, 0.0  ;;  %v2702_v63 = vadd.f32 %v2567_v54, %v2431_v61  ;;  %v5813_v4 = vpop.f32.mrf.mxu0  ;;  %v7459_v46 = vadd.f32 %v5810_v8, %v2703_v39 }
 0x1c4   : > { %v3008_v21 = vadd.f32 %v3007_v13, %v3006_v10  ;;  %v5763_v9 = vpop.f32.mrf.mxu1 }
 0x1c5   : > { %v7461_v3 = vadd.f32 %v2838_v25, %v2702_v63  ;;  %v2705_v48 = vadd.f32 %v5763_v9, %v7335_v55  ;;  %v2848_v56 = vpop.f32.mrf.mxu0  ;;  %v3013_v19 = vsel %vm10004_vm4, %v7459_v46, 0.0 }
 0x1c6   : > { %v3010_v37 = vadd.f32 %v3009_v32, %v3008_v21  ;;  %v2577_v30 = vpop.f32.mrf.mxu1 }
 0x1c7   : > { %v3011_v6 = vsel %vm10004_vm4, %v7461_v3, 0.0  ;;  %v2704_v40 = vadd.f32 %v2577_v30, %v2433_v26  ;;  %v5816_v35 = vpop.f32.mrf.mxu0  ;;  %v7471_v8 = vadd.f32 %v5813_v4, %v2705_v48 }
 0x1c8   : > { %v3012_v61 = vadd.f32 %v3011_v6, %v3010_v37  ;;  %v5766_v31 = vpop.f32.mrf.mxu1 }
 0x1c9   : > { %v7473_v55 = vadd.f32 %v2848_v56, %v2704_v40  ;;  %v2707_v38 = vadd.f32 %v5766_v31, %v7342_v14  ;;  %v2858_v54 = vpop.f32.mrf.mxu0  ;;  %v3017_v42 = vsel %vm10004_vm4, %v7471_v8, 0.0 }
 0x1ca   : > { %v3014_v39 = vadd.f32 %v3013_v19, %v3012_v61  ;;  %v2587_v10 = vpop.f32.mrf.mxu1 }
 0x1cb   : > { %v3015_v45 = vsel %vm10004_vm4, %v7473_v55, 0.0  ;;  %v2706_v25 = vadd.f32 %v2587_v10, %v2435_v0  ;;  %v5819_v26 = vpop.f32.mrf.mxu0  ;;  %v7483_v21 = vadd.f32 %v5816_v35, %v2707_v38 }
 0x1cc   : > { %v3016_v13 = vadd.f32 %v3015_v45, %v3014_v39  ;;  %v5769_v63 = vpop.f32.mrf.mxu1 }
 0x1cd   : > { %v7485_v14 = vadd.f32 %v2858_v54, %v2706_v25  ;;  %v2709_v9 = vadd.f32 %v5769_v63, %v7349_v58  ;;  %v2868_v48 = vpop.f32.mrf.mxu0  ;;  %v3021_v40 = vsel %vm10004_vm4, %v7483_v21, 0.0 }
 0x1ce   : > { %v3018_v4 = vadd.f32 %v3017_v42, %v3016_v13  ;;  %v2597_v32 = vpop.f32.mrf.mxu1 }
 0x1cf   : > { %v3019_v34 = vsel %vm10004_vm4, %v7485_v14, 0.0  ;;  %v2708_v37 = vadd.f32 %v2597_v32, %v2437_v62  ;;  %v5822_v6 = vpop.f32.mrf.mxu0  ;;  %v7495_v0 = vadd.f32 %v5819_v26, %v2709_v9 }
 0x1d0   : > { %v3020_v30 = vadd.f32 %v3019_v34, %v3018_v4  ;;  %v5772_v56 = vpop.f32.mrf.mxu1 }
 0x1d1   : > { %v7497_v58 = vadd.f32 %v2868_v48, %v2708_v37  ;;  %v2711_v22 = vadd.f32 %v5772_v56, %v7356_v59  ;;  %v2878_v35 = vpop.f32.mrf.mxu0  ;;  %v3025_v54 = vsel %vm10004_vm4, %v7495_v0, 0.0 }
 0x1d2   : > { %v3022_v61 = vadd.f32 %v3021_v40, %v3020_v30  ;;  %v2607_v31 = vpop.f32.mrf.mxu1 }
 0x1d3   : > { %v3023_v53 = vsel %vm10004_vm4, %v7497_v58, 0.0  ;;  %v2710_v19 = vadd.f32 %v2607_v31, %v2439_v49  ;;  %v5825_v10 = vpop.f32.mrf.mxu0  ;;  %v7507_v45 = vadd.f32 %v5822_v6, %v2711_v22 }
 0x1d4   : > { %v3024_v38 = vadd.f32 %v3023_v53, %v3022_v61  ;;  %v5775_v39 = vpop.f32.mrf.mxu1  ;;  %v10332_v61 = vld [vmem:[#allocation14_spill] sm:$0xff] }
 0x1d5   : > { %v7509_v59 = vadd.f32 %v2878_v35, %v2710_v19  ;;  %v2713_v25 = vadd.f32 %v5775_v39, %v7363_v18  ;;  %v2888_v13 = vpop.f32.mrf.mxu0  ;;  %v3029_v4 = vsel %vm10004_vm4, %v7507_v45, 0.0 }
 0x1d6   : > { %v3026_v62 = vadd.f32 %v3025_v54, %v3024_v38  ;;  %v2617_v43 = vpop.f32.mrf.mxu1  ;;  %v2042_v38 = vadd.f32 %v10334_v51, %v10333_v2  ;;  %v10340_v51 = vld [vmem:[#allocation9_spill] sm:$0xff] }
 0x1d7   : > { %v3027_v12 = vsel %vm10004_vm4, %v7509_v59, 0.0  ;;  %v2712_v63 = vadd.f32 %v2617_v43, %v2441_v16  ;;  %v5828_v9 = vpop.f32.mrf.mxu0  ;;  %v7519_v32 = vadd.f32 %v5825_v10, %v2713_v25 }
 0x1d8   : > { %v3028_v26 = vadd.f32 %v3027_v12, %v3026_v62  ;;  %v5778_v42 = vpop.f32.mrf.mxu1 }
 0x1d9   : > { %v7521_v18 = vadd.f32 %v2888_v13, %v2712_v63  ;;  %v2715_v48 = vadd.f32 %v5778_v42, %v7370_v57  ;;  %v2898_v49 = vpop.f32.mrf.mxu0  ;;  %v3033_v40 = vsel %vm10004_vm4, %v7519_v32, 0.0  ;;  %v10335_v13 = vld [vmem:[#allocation6_spill] sm:$0xff]  ;;  %v2449_v42 = vadd.f32 %v7389_v28, %v2042_v38 }
 0x1da   : > { %v3030_v34 = vadd.f32 %v3029_v4, %v3028_v26  ;;  %v2627_v37 = vpop.f32.mrf.mxu1 }
 0x1db   : > { %v3031_v29 = vsel %vm10004_vm4, %v7521_v18, 0.0  ;;  %v2714_v15 = vadd.f32 %v2627_v37, %v2443_v1  ;;  %v5831_v6 = vpop.f32.mrf.mxu0  ;;  %v7531_v22 = vadd.f32 %v5828_v9, %v2715_v48  ;;  %v10336_v9 = vld [vmem:[#allocation4_spill] sm:$0xff] }
 0x1dc   : > { %v3032_v30 = vadd.f32 %v3031_v29, %v3030_v34  ;;  %v5781_v56 = vpop.f32.mrf.mxu1  ;;  %v2044_v4 = vadd.f32 %v7394_v44, %v10336_v9  ;;  %v10338_v44 = vld [vmem:[#allocation18_spill] sm:$0xff] }
 0x1dd   : > { %v7533_v57 = vadd.f32 %v2898_v49, %v2714_v15  ;;  %v2717_v31 = vadd.f32 %v5781_v56, %v10332_v61  ;;  %v2908_v19 = vpop.f32.mrf.mxu0  ;;  %v3037_v25 = vsel %vm10004_vm4, %v7531_v22, 0.0 }
 0x1de   : > { %v3034_v35 = vadd.f32 %v3033_v40, %v3032_v30  ;;  %v2637_v53 = vpop.f32.mrf.mxu1  ;;  %v2451_v61 = vadd.f32 %v10338_v44, %v2044_v4 }
 0x1df   : > { %v3035_v20 = vsel %vm10004_vm4, %v7533_v57, 0.0  ;;  %v2716_v16 = vadd.f32 %v2637_v53, %v2445_v33  ;;  %v5834_v54 = vpop.f32.mrf.mxu0  ;;  %v7543_v62 = vadd.f32 %v5831_v6, %v2717_v31  ;;  %v10337_v33 = vld [vmem:[#allocation8_spill] sm:$0xff]  ;;  %v10339_v31 = vld [vmem:[#allocation5_spill] sm:$0xff] }
 0x1e0   : > { %v3036_v39 = vadd.f32 %v3035_v20, %v3034_v35  ;;  %v5784_v10 = vpop.f32.mrf.mxu1  ;;  %v2046_v35 = vadd.f32 %v7401_v52, %v10339_v31  ;;  %v10341_v52 = vld [vmem:[#allocation13_spill] sm:$0xff]  ;;  %v10344_v31 = vld [vmem:[#allocation11_spill] sm:$0xff] }
 0x1e1   : > { %v7545_v43 = vadd.f32 %v2908_v19, %v2716_v16  ;;  %v2719_v12 = vadd.f32 %v5784_v10, %v10335_v13  ;;  %v2918_v17 = vpop.f32.mrf.mxu0  ;;  %v3041_v49 = vsel %vm10004_vm4, %v7543_v62, 0.0 }
 0x1e2   : > { %v3038_v63 = vadd.f32 %v3037_v25, %v3036_v39  ;;  %v2647_v1 = vpop.f32.mrf.mxu1 }
 0x1e3   : > { %v3039_v36 = vsel %vm10004_vm4, %v7545_v43, 0.0  ;;  %v2718_v26 = vadd.f32 %v2647_v1, %v2447_v7  ;;  %v5837_v37 = vpop.f32.mrf.mxu0  ;;  %v7555_v29 = vadd.f32 %v5834_v54, %v2719_v12  ;;  %v2453_v12 = vadd.f32 %v10341_v52, %v2046_v35 }
 0x1e4   : > { %v3040_v48 = vadd.f32 %v3039_v36, %v3038_v63  ;;  %v5787_v34 = vpop.f32.mrf.mxu1  ;;  %v10342_v63 = vld [vmem:[#allocation17_spill] sm:$0xff] }
 0x1e5   : > { %v7557_v15 = vadd.f32 %v2918_v17, %v2718_v26  ;;  %v2721_v50 = vadd.f32 %v5787_v34, %v10337_v33  ;;  %v2928_v6 = vpop.f32.mrf.mxu0  ;;  %v3045_v16 = vsel %vm10004_vm4, %v7555_v29, 0.0  ;;  %v2048_v1 = vadd.f32 %v7410_v27, %v10342_v63 }
 0x1e6   : > { %v3042_v30 = vadd.f32 %v3041_v49, %v3040_v48  ;;  %v2657_v56 = vpop.f32.mrf.mxu1  ;;  %v10343_v48 = vld [vmem:[#allocation10_spill] sm:$0xff] }
 0x1e7   : > { %v3043_v28 = vsel %vm10004_vm4, %v7557_v15, 0.0  ;;  %v2720_v40 = vadd.f32 %v2657_v56, %v2449_v42  ;;  %v5840_v20 = vpop.f32.mrf.mxu0  ;;  %v7567_v7 = vadd.f32 %v5837_v37, %v2721_v50  ;;  %v2455_v56 = vadd.f32 %v7412_v60, %v2048_v1 }
 0x1e8   : > { %v3044_v53 = vadd.f32 %v3043_v28, %v3042_v30  ;;  %v5790_v19 = vpop.f32.mrf.mxu1 }
 0x1e9   : > { %v7569_v2 = vadd.f32 %v2928_v6, %v2720_v40  ;;  %v2723_v38 = vadd.f32 %v5790_v19, %v10340_v51  ;;  %v2938_v54 = vpop.f32.mrf.mxu0  ;;  %v3049_v42 = vsel %vm10004_vm4, %v7567_v7, 0.0 }
 0x1ea   : > { %v3046_v39 = vadd.f32 %v3045_v16, %v3044_v53  ;;  %v2667_v10 = vpop.f32.mrf.mxu1 }
 0x1eb   : > { %v3047_v25 = vsel %vm10004_vm4, %v7569_v2, 0.0  ;;  %v2722_v13 = vadd.f32 %v2667_v10, %v2451_v61  ;;  %v5843_v26 = vpop.f32.mrf.mxu0  ;;  %v2994_v9 = vadd.f32 %v5840_v20, %v2723_v38 }
 0x1ec   : > { %v3048_v17 = vadd.f32 %v3047_v25, %v3046_v39  ;;  %v5793_v36 = vpop.f32.mrf.mxu1 }
 0x1ed   : > { %v2993_v4 = vadd.f32 %v2938_v54, %v2722_v13  ;;  %v2725_v34 = vadd.f32 %v5793_v36, %v10343_v48  ;;  %v2948_v33 = vpop.f32.mrf.mxu0  ;;  %v3053_v40 = vsel %vm10004_vm4, %v2994_v9, 0.0 }
 0x1ee   : > { %v3050_v37 = vadd.f32 %v3049_v42, %v3048_v17  ;;  %v2677_v49 = vpop.f32.mrf.mxu1 }
 0x1ef   : > { %v3051_v50 = vsel %vm10004_vm4, %v2993_v4, 0.0  ;;  %v2724_v30 = vadd.f32 %v2677_v49, %v2453_v12  ;;  %v5846_v28 = vpop.f32.mrf.mxu0  ;;  %v2996_v44 = vadd.f32 %v5843_v26, %v2725_v34 }
 0x1f0   : > { %v3052_v6 = vadd.f32 %v3051_v50, %v3050_v37  ;;  %v5796_v27 = vpop.f32.mrf.mxu1 }
 0x1f1   : > { %v2995_v61 = vadd.f32 %v2948_v33, %v2724_v30  ;;  %v2727_v35 = vadd.f32 %v5796_v27, %v10344_v31  ;;  %v2958_v38 = vpop.f32.mrf.mxu0  ;;  %v3057_v39 = vsel %vm10004_vm4, %v2996_v44, 0.0 }
 0x1f2   : > { %v3054_v53 = vadd.f32 %v3053_v40, %v3052_v6  ;;  %v2687_v19 = vpop.f32.mrf.mxu1 }
 0x1f3   : > { %v3055_v20 = vsel %vm10004_vm4, %v2995_v61, 0.0  ;;  %v2726_v16 = vadd.f32 %v2687_v19, %v2455_v56  ;;  %v2998_v10 = vadd.f32 %v5846_v28, %v2727_v35 }
 0x1f4   : > { %v3056_v51 = vadd.f32 %v3055_v20, %v3054_v53 }
 0x1f5   : > { %v2997_v60 = vadd.f32 %v2958_v38, %v2726_v16  ;;  %v3061_v52 = vsel %vm10004_vm4, %v2998_v10, 0.0 }
 0x1f6   : > { %v3058_v54 = vadd.f32 %v3057_v39, %v3056_v51 }
 0x1f7   : > { %v3059_v25 = vsel %vm10004_vm4, %v2997_v60, 0.0 }
 0x1f8   : > { %v3060_v13 = vadd.f32 %v3059_v25, %v3058_v54 }
 0x1fa   : > { %v3062_v12 = vadd.f32 %v3061_v52, %v3060_v13 }
 0x1fc   : > { %v3063_v63 = vrot.slane %v3062_v12, 4 }
 0x1fe   : > { %v3064_v1 = vadd.f32 %v3063_v63, %v3062_v12 }
 0x200   : > { %v3065_v17 = vrot.slane %v3064_v1, 2 }
 0x202   : > { %v3066_v36 = vadd.f32 %v3065_v17, %v3064_v1 }
 0x204   : > { %v3067_v26 = vrot.slane %v3066_v36, 1 }
 0x206   : > { %v3068_v42 = vadd.f32 %v3067_v26, %v3066_v36 }
 0x208   : > { %v3069_v48 = vmul.f32 0.00390625, %v3068_v42 }
 0x20a   : > { %v7589_v34 = vsub.f32 %v7485_v14, %v3069_v48  ;;  %v7592_v37 = vsub.f32 %v7483_v21, %v3069_v48  ;;  %v7595_v49 = vsub.f32 %v7497_v58, %v3069_v48  ;;  %v7598_v33 = vsub.f32 %v7495_v0, %v3069_v48 }
 0x20b   : > { %v7601_v50 = vsub.f32 %v7509_v59, %v3069_v48  ;;  %v7604_v30 = vsub.f32 %v7507_v45, %v3069_v48  ;;  %v7607_v56 = vsub.f32 %v7521_v18, %v3069_v48  ;;  %v7610_v14 = vsub.f32 %v7519_v32, %v3069_v48 }
 0x20c   : > { %v7613_v21 = vsub.f32 %v7533_v57, %v3069_v48  ;;  %v7616_v58 = vsub.f32 %v7531_v22, %v3069_v48  ;;  %v7619_v0 = vsub.f32 %v7545_v43, %v3069_v48  ;;  %v7622_v59 = vsub.f32 %v7543_v62, %v3069_v48 }
 0x20d   : > { %v7625_v45 = vsub.f32 %v7557_v15, %v3069_v48  ;;  %v7628_v18 = vsub.f32 %v7555_v29, %v3069_v48  ;;  %v7631_v32 = vsub.f32 %v7569_v2, %v3069_v48  ;;  %v7634_v57 = vsub.f32 %v7567_v7, %v3069_v48 }
 0x20e   : > { %v7636_v22 = vsub.f32 %v2993_v4, %v3069_v48  ;;  %v7638_v6 = vsub.f32 %v2994_v9, %v3069_v48  ;;  %v7640_v43 = vsub.f32 %v2995_v61, %v3069_v48  ;;  %v7642_v62 = vsub.f32 %v2996_v44, %v3069_v48 }
 0x20f   : > { %10345 = vst [vmem:[#allocation12_spill] sm:$0xff] %v7625_v45  ;;  %10346 = vst [vmem:[#allocation15_spill] sm:$0xff] %v7628_v18  ;;  %v7644_v27 = vsub.f32 %v2997_v60, %v3069_v48  ;;  %v7646_v15 = vsub.f32 %v2998_v10, %v3069_v48  ;;  %v7649_v29 = vsub.f32 %v7425_v41, %v3069_v48 }
 0x210   : > { %10347 = vst [vmem:[#allocation2_spill] sm:$0xff] %v7631_v32  ;;  %10348 = vst [vmem:[#allocation3_spill] sm:$0xff] %v7634_v57  ;;  %v7652_v2 = vsub.f32 %v7423_v47, %v3069_v48  ;;  %v7655_v7 = vsub.f32 %v7437_v11, %v3069_v48  ;;  %v7658_v9 = vsub.f32 %v7435_v23, %v3069_v48 }
 0x211   : > { %10349 = vst [vmem:[#allocation14_spill] sm:$0xff] %v7636_v22  ;;  %10350 = vst [vmem:[#allocation16_spill] sm:$0xff] %v7638_v6  ;;  %v3102_v4 = vmul.f32 %v7649_v29, %v7649_v29  ;;  %v7665_v40 = vsub.f32 %v7449_v24, %v3069_v48  ;;  %v7670_v47 = vsub.f32 %v7447_v5, %v3069_v48 }
 0x212   : > { %10351 = vst [vmem:[#allocation7_spill] sm:$0xff] %v7640_v43  ;;  %10352 = vst [vmem:[#allocation6_spill] sm:$0xff] %v7642_v62  ;;  %v3103_v28 = vmul.f32 %v7652_v2, %v7652_v2  ;;  %v3104_v41 = vmul.f32 %v7655_v7, %v7655_v7  ;;  %v3105_v11 = vmul.f32 %v7658_v9, %v7658_v9 }
 0x213   : > { %10353 = vst [vmem:[#allocation4_spill] sm:$0xff] %v7644_v27  ;;  %10354 = vst [vmem:[#allocation8_spill] sm:$0xff] %v7646_v15  ;;  %v3134_v23 = vsel %vm10004_vm4, %v3102_v4, 0.0  ;;  %v7677_v31 = vsub.f32 %v7461_v3, %v3069_v48  ;;  %v3106_v24 = vmul.f32 %v7665_v40, %v7665_v40  ;;  %v7683_v5 = vsub.f32 %v7459_v46, %v3069_v48 }
 0x214   : > { %v3135_v44 = vsel %vm10004_vm4, %v3103_v28, 0.0  ;;  %v3137_v35 = vsel %vm10004_vm4, %v3104_v41, 0.0  ;;  %v3107_v19 = vmul.f32 %v7670_v47, %v7670_v47  ;;  %v3139_v20 = vsel %vm10004_vm4, %v3105_v11, 0.0 }
 0x215   : > { %v3136_v61 = vadd.f32 %v3135_v44, %v3134_v23  ;;  %v7689_v51 = vsub.f32 %v7473_v55, %v3069_v48  ;;  %v3108_v3 = vmul.f32 %v7677_v31, %v7677_v31  ;;  %v3141_v38 = vsel %vm10004_vm4, %v3106_v24, 0.0 }
 0x216   : > { %v7695_v10 = vsub.f32 %v7471_v8, %v3069_v48  ;;  %v3109_v46 = vmul.f32 %v7683_v5, %v7683_v5  ;;  %v3143_v60 = vsel %vm10004_vm4, %v3107_v19, 0.0  ;;  %v3112_v8 = vmul.f32 %v7589_v34, %v7589_v34 }
 0x217   : > { %v3138_v53 = vadd.f32 %v3137_v35, %v3136_v61  ;;  %v3110_v25 = vmul.f32 %v7689_v51, %v7689_v51  ;;  %v3145_v55 = vsel %vm10004_vm4, %v3108_v3, 0.0  ;;  %v3113_v36 = vmul.f32 %v7592_v37, %v7592_v37 }
 0x218   : > { %v3111_v52 = vmul.f32 %v7695_v10, %v7695_v10  ;;  %v3147_v12 = vsel %vm10004_vm4, %v3109_v46, 0.0  ;;  %v3114_v48 = vmul.f32 %v7595_v49, %v7595_v49  ;;  %v3153_v4 = vsel %vm10004_vm4, %v3112_v8, 0.0 }
 0x219   : > { %v3140_v16 = vadd.f32 %v3139_v20, %v3138_v53  ;;  %v3149_v1 = vsel %vm10004_vm4, %v3110_v25, 0.0  ;;  %v3115_v41 = vmul.f32 %v7598_v33, %v7598_v33  ;;  %v3155_v11 = vsel %vm10004_vm4, %v3113_v36, 0.0 }
 0x21a   : > { %v3151_v26 = vsel %vm10004_vm4, %v3111_v52, 0.0  ;;  %v3116_v44 = vmul.f32 %v7601_v50, %v7601_v50  ;;  %v3157_v61 = vsel %vm10004_vm4, %v3114_v48, 0.0  ;;  %v3117_v35 = vmul.f32 %v7604_v30, %v7604_v30 }
 0x21b   : > { %v3142_v39 = vadd.f32 %v3141_v38, %v3140_v16  ;;  %v3159_v53 = vsel %vm10004_vm4, %v3115_v41, 0.0  ;;  %v3118_v20 = vmul.f32 %v7607_v56, %v7607_v56  ;;  %v3119_v38 = vmul.f32 %v7610_v14, %v7610_v14 }
 0x21c   : > { %v3161_v16 = vsel %vm10004_vm4, %v3116_v44, 0.0 }
 0x21d   : > { %v3144_v54 = vadd.f32 %v3143_v60, %v3142_v39  ;;  %v3163_v39 = vsel %vm10004_vm4, %v3117_v35, 0.0  ;;  %v3120_v60 = vmul.f32 %v7613_v21, %v7613_v21 }
 0x21f   : > { %v3146_v13 = vadd.f32 %v3145_v55, %v3144_v54  ;;  %v3165_v54 = vsel %vm10004_vm4, %v3118_v20, 0.0  ;;  %v3121_v55 = vmul.f32 %v7616_v58, %v7616_v58 }
 0x221   : > { %v3148_v63 = vadd.f32 %v3147_v12, %v3146_v13  ;;  %v3167_v13 = vsel %vm10004_vm4, %v3119_v38, 0.0  ;;  %v3122_v12 = vmul.f32 %v7619_v0, %v7619_v0 }
 0x223   : > { %v3150_v17 = vadd.f32 %v3149_v1, %v3148_v63  ;;  %v3169_v63 = vsel %vm10004_vm4, %v3120_v60, 0.0  ;;  %v3123_v1 = vmul.f32 %v7622_v59, %v7622_v59 }
 0x225   : > { %v3152_v42 = vadd.f32 %v3151_v26, %v3150_v17  ;;  %v3171_v17 = vsel %vm10004_vm4, %v3121_v55, 0.0  ;;  %v3124_v26 = vmul.f32 %v7625_v45, %v7625_v45 }
 0x227   : > { %v3154_v28 = vadd.f32 %v3153_v4, %v3152_v42  ;;  %v3173_v42 = vsel %vm10004_vm4, %v3122_v12, 0.0  ;;  %v3125_v4 = vmul.f32 %v7628_v18, %v7628_v18 }
 0x229   : > { %v3156_v23 = vadd.f32 %v3155_v11, %v3154_v28  ;;  %v3175_v28 = vsel %vm10004_vm4, %v3123_v1, 0.0  ;;  %v3126_v11 = vmul.f32 %v7631_v32, %v7631_v32  ;;  %v3206_v32 = vld [vmem:[%s9941_s2] sm:$0x1] }
 0x22b   : > { %v3158_v24 = vadd.f32 %v3157_v61, %v3156_v23  ;;  %v3177_v23 = vsel %vm10004_vm4, %v3124_v26, 0.0  ;;  %v3127_v61 = vmul.f32 %v7634_v57, %v7634_v57 }
 0x22d   : > { %v3160_v19 = vadd.f32 %v3159_v53, %v3158_v24  ;;  %v3179_v24 = vsel %vm10004_vm4, %v3125_v4, 0.0  ;;  %v3128_v53 = vmul.f32 %v7636_v22, %v7636_v22 }
 0x22f   : > { %v3162_v3 = vadd.f32 %v3161_v16, %v3160_v19  ;;  %v3181_v19 = vsel %vm10004_vm4, %v3126_v11, 0.0  ;;  %v3129_v16 = vmul.f32 %v7638_v6, %v7638_v6 }
 0x231   : > { %v3164_v46 = vadd.f32 %v3163_v39, %v3162_v3  ;;  %v3183_v3 = vsel %vm10004_vm4, %v3127_v61, 0.0  ;;  %v3130_v39 = vmul.f32 %v7640_v43, %v7640_v43 }
 0x233   : > { %v3166_v25 = vadd.f32 %v3165_v54, %v3164_v46  ;;  %v3185_v46 = vsel %vm10004_vm4, %v3128_v53, 0.0  ;;  %v3131_v54 = vmul.f32 %v7642_v62, %v7642_v62  ;;  %v10379_v62 = vld [vmem:[#allocation3_spill] sm:$0xff] }
 0x235   : > { %v3168_v52 = vadd.f32 %v3167_v13, %v3166_v25  ;;  %v3187_v25 = vsel %vm10004_vm4, %v3129_v16, 0.0  ;;  %v3132_v13 = vmul.f32 %v7644_v27, %v7644_v27 }
 0x237   : > { %v3170_v8 = vadd.f32 %v3169_v63, %v3168_v52  ;;  %v3189_v52 = vsel %vm10004_vm4, %v3130_v39, 0.0  ;;  %v3133_v63 = vmul.f32 %v7646_v15, %v7646_v15 }
 0x239   : > { %v3172_v36 = vadd.f32 %v3171_v17, %v3170_v8  ;;  %v3191_v8 = vsel %vm10004_vm4, %v3131_v54, 0.0  ;;  %v3193_v17 = vsel %vm10004_vm4, %v3132_v13, 0.0  ;;  %v3195_v26 = vsel %vm10004_vm4, %v3133_v63, 0.0 }
 0x23b   : > { %v3174_v48 = vadd.f32 %v3173_v42, %v3172_v36 }
 0x23d   : > { %v3176_v41 = vadd.f32 %v3175_v28, %v3174_v48 }
 0x23f   : > { %v3178_v44 = vadd.f32 %v3177_v23, %v3176_v41  ;;  %v3208_v23 = vlaneseq }
 0x241   : > { %v3180_v35 = vadd.f32 %v3179_v24, %v3178_v44  ;;  %v7774_v24 = vshrl.u32 %v3208_v23, 7 }
 0x243   : > { %v3182_v20 = vadd.f32 %v3181_v19, %v3180_v35  ;;  %v3210_v53 = vsub.s32 0, %v7774_v24  ;;  %v7778_v19 = vadd.s32 8, %v7774_v24  ;;  %v7784_v16 = vadd.s32 24, %v7774_v24 }
 0x244   : > { %v7793_v39 = vadd.s32 48, %v7774_v24  ;;  %v7802_v54 = vadd.s32 72, %v7774_v24  ;;  %v7811_v13 = vadd.s32 96, %v7774_v24  ;;  %v7820_v63 = vadd.s32 120, %v7774_v24 }
 0x245   : > { %v3184_v38 = vadd.f32 %v3183_v3, %v3182_v20  ;;  %10355 = vst [vmem:[#allocation18_spill] sm:$0xff] %v7778_v19  ;;  %v7781_v20 = vadd.s32 16, %v7774_v24  ;;  %10356 = vst [vmem:[#allocation5_spill] sm:$0xff] %v7784_v16  ;;  %v7787_v3 = vadd.s32 32, %v7774_v24  ;;  %v7856_v23 = vadd.s32 216, %v7774_v24  ;;  %v10377_v16 = vld [vmem:[#allocation15_spill] sm:$0xff] }
 0x246   : > { %10359 = vst [vmem:[#allocation17_spill] sm:$0xff] %v7802_v54  ;;  %10362 = vst [vmem:[#allocation19_spill] sm:$0xff] %v7820_v63  ;;  %v7868_v15 = vadd.s32 248, %v7774_v24 }
 0x247   : > { %v3186_v60 = vadd.f32 %v3185_v46, %v3184_v38  ;;  %v7790_v38 = vadd.s32 40, %v7774_v24  ;;  %v7796_v46 = vadd.s32 56, %v7774_v24  ;;  %10372 = vst [vmem:[#allocation29_spill] sm:$0xff] %v7856_v23  ;;  %v10382_v23 = vld [vmem:[#allocation7_spill] sm:$0xff] }
 0x248   : > { %10376 = vst [vmem:[#allocation33_spill] sm:$0xff] %v7868_v15  ;;  %v10380_v15 = vld [vmem:[#allocation14_spill] sm:$0xff] }
 0x249   : > { %v3188_v55 = vadd.f32 %v3187_v25, %v3186_v60  ;;  %10357 = vst [vmem:[#allocation9_spill] sm:$0xff] %v7790_v38  ;;  %10358 = vst [vmem:[#allocation13_spill] sm:$0xff] %v7796_v46  ;;  %v7799_v60 = vadd.s32 64, %v7774_v24  ;;  %v7805_v25 = vadd.s32 80, %v7774_v24 }
 0x24b   : > { %v3190_v12 = vadd.f32 %v3189_v52, %v3188_v55  ;;  %v7808_v55 = vadd.s32 88, %v7774_v24  ;;  %v7814_v52 = vadd.s32 104, %v7774_v24 }
 0x24d   : > { %v3192_v1 = vadd.f32 %v3191_v8, %v3190_v12  ;;  %10360 = vst [vmem:[#allocation10_spill] sm:$0xff] %v7808_v55  ;;  %10361 = vst [vmem:[#allocation11_spill] sm:$0xff] %v7814_v52  ;;  %v7817_v12 = vadd.s32 112, %v7774_v24  ;;  %v7823_v8 = vadd.s32 128, %v7774_v24 }
 0x24f   : > { %v3194_v36 = vadd.f32 %v3193_v17, %v3192_v1  ;;  %v7826_v1 = vadd.s32 136, %v7774_v24  ;;  %v7829_v17 = vadd.s32 144, %v7774_v24 }
 0x251   : > { %v3196_v42 = vadd.f32 %v3195_v26, %v3194_v36  ;;  %10363 = vst [vmem:[#allocation20_spill] sm:$0xff] %v7826_v1  ;;  %v7832_v36 = vadd.s32 152, %v7774_v24  ;;  %v7835_v26 = vadd.s32 160, %v7774_v24 }
 0x253   : > { %v3197_v48 = vrot.slane %v3196_v42, 4  ;;  %10364 = vst [vmem:[#allocation21_spill] sm:$0xff] %v7832_v36  ;;  %10365 = vst [vmem:[#allocation22_spill] sm:$0xff] %v7835_v26 }
 0x255   : > { %v3198_v4 = vadd.f32 %v3197_v48, %v3196_v42  ;;  %v7838_v42 = vadd.s32 168, %v7774_v24  ;;  %v7841_v48 = vadd.s32 176, %v7774_v24 }
 0x257   : > { %v3199_v28 = vrot.slane %v3198_v4, 2  ;;  %10366 = vst [vmem:[#allocation23_spill] sm:$0xff] %v7838_v42  ;;  %10367 = vst [vmem:[#allocation24_spill] sm:$0xff] %v7841_v48  ;;  %v10385_v42 = vld [vmem:[#allocation8_spill] sm:$0xff] }
 0x259   : > { %v3200_v41 = vadd.f32 %v3199_v28, %v3198_v4  ;;  %v7844_v4 = vadd.s32 184, %v7774_v24  ;;  %v7847_v28 = vadd.s32 192, %v7774_v24 }
 0x25b   : > { %v3201_v11 = vrot.slane %v3200_v41, 1  ;;  %10368 = vst [vmem:[#allocation25_spill] sm:$0xff] %v7844_v4  ;;  %10369 = vst [vmem:[#allocation26_spill] sm:$0xff] %v7847_v28  ;;  %v10384_v4 = vld [vmem:[#allocation4_spill] sm:$0xff] }
 0x25d   : > { %v3202_v44 = vadd.f32 %v3201_v11, %v3200_v41  ;;  %v7850_v41 = vadd.s32 200, %v7774_v24  ;;  %v7853_v11 = vadd.s32 208, %v7774_v24 }
 0x25f   : > { %v3203_v61 = vmul.f32 0.00390625, %v3202_v44  ;;  %10370 = vst [vmem:[#allocation27_spill] sm:$0xff] %v7850_v41  ;;  %10371 = vst [vmem:[#allocation28_spill] sm:$0xff] %v7853_v11  ;;  %v7859_v44 = vadd.s32 224, %v7774_v24  ;;  %v10383_v41 = vld [vmem:[#allocation6_spill] sm:$0xff] }
 0x261   : > { %v3204_v35 = vadd.f32 1e-05, %v3203_v61  ;;  %10373 = vst [vmem:[#allocation30_spill] sm:$0xff] %v7859_v44  ;;  %v7862_v61 = vadd.s32 232, %v7774_v24 }
 0x263   : > { %5858 = vrsqrt.f32 %v3204_v35  ;;  %10374 = vst [vmem:[#allocation31_spill] sm:$0xff] %v7862_v61  ;;  %v7865_v35 = vadd.s32 240, %v7774_v24  ;;  %v10381_v61 = vld [vmem:[#allocation16_spill] sm:$0xff] }
 0x265   : > { %10375 = vst [vmem:[#allocation32_spill] sm:$0xff] %v7865_v35 }
 0x270   : > { %v5859_v38 = vpop.eup %5858 }
 0x271   : > { %v3207_v27 = vmul.f32 %v5859_v38, %v3206_v32 }
 0x273   : > { %v3211_v19 = vrot.slane %v3207_v27, %v3210_v53 }
 0x275   : > { %v3212_v57 = vmul.f32 %v3211_v19, %v7649_v29  ;;  %v3213_v52 = vmul.f32 %v3211_v19, %v7652_v2  ;;  %v3214_v27 = vmul.f32 %v3211_v19, %v7655_v7  ;;  %v3215_v53 = vmul.f32 %v3211_v19, %v7658_v9 }
 0x276   : > { %v3216_v18 = vmul.f32 %v3211_v19, %v7665_v40  ;;  %v3217_v32 = vmul.f32 %v3211_v19, %v7670_v47  ;;  %v3218_v38 = vmul.f32 %v3211_v19, %v7677_v31  ;;  %v3219_v43 = vmul.f32 %v3211_v19, %v7683_v5 }
 0x277   : > { %v3220_v6 = vmul.f32 %v3211_v19, %v7689_v51  ;;  %v3221_v22 = vmul.f32 %v3211_v19, %v7695_v10  ;;  %v3222_v29 = vmul.f32 %v3211_v19, %v7589_v34  ;;  %v3223_v2 = vmul.f32 %v3211_v19, %v7592_v37 }
 0x278   : > { %v3224_v7 = vmul.f32 %v3211_v19, %v7595_v49  ;;  %v3225_v9 = vmul.f32 %v3211_v19, %v7598_v33  ;;  %v3226_v40 = vmul.f32 %v3211_v19, %v7601_v50  ;;  %v3227_v47 = vmul.f32 %v3211_v19, %v7604_v30  ;;  %v5000_v50 = vld [vmem:[%s9942_s3] ss:$0 sm:$0xff] }
 0x279   : > { %v3228_v31 = vmul.f32 %v3211_v19, %v7607_v56  ;;  %v3229_v5 = vmul.f32 %v3211_v19, %v7610_v14  ;;  %v3230_v51 = vmul.f32 %v3211_v19, %v7613_v21  ;;  %v3231_v10 = vmul.f32 %v3211_v19, %v7616_v58  ;;  %v10378_v30 = vld [vmem:[#allocation2_spill] sm:$0xff] }
 0x27a   : > { %v3232_v34 = vmul.f32 %v3211_v19, %v7619_v0  ;;  %v3233_v37 = vmul.f32 %v3211_v19, %v7622_v59  ;;  %v3234_v49 = vmul.f32 %v3211_v19, %v7625_v45  ;;  %v3235_v33 = vmul.f32 %v3211_v19, %v10377_v16 }
 0x27b   : > { %v3236_v56 = vmul.f32 %v3211_v19, %v10378_v30  ;;  %v3237_v14 = vmul.f32 %v3211_v19, %v10379_v62  ;;  %v3238_v21 = vmul.f32 %v3211_v19, %v10380_v15  ;;  %v3239_v58 = vmul.f32 %v3211_v19, %v10381_v61 }
 0x27c   : > { %v3240_v0 = vmul.f32 %v3211_v19, %v10382_v23  ;;  %v3241_v59 = vmul.f32 %v3211_v19, %v10383_v41  ;;  %v3242_v45 = vmul.f32 %v3211_v19, %v10384_v4  ;;  %v3243_v16 = vmul.f32 %v3211_v19, %v10385_v42 }
 0x27d   : > { %v3251_v36 = vadd.f32 %v5000_v50, %v3212_v57  ;;  %v3252_v1 = vadd.f32 %v5000_v50, %v3213_v52  ;;  %v3253_v63 = vadd.f32 %v5000_v50, %v3214_v27  ;;  %v3254_v55 = vadd.f32 %v5000_v50, %v3215_v53 }
 0x27e   : > { %v3255_v54 = vadd.f32 %v5000_v50, %v3216_v18  ;;  %v3256_v30 = vadd.f32 %v5000_v50, %v3217_v32  ;;  %v3257_v46 = vadd.f32 %v5000_v50, %v3218_v38  ;;  %v3258_v62 = vadd.f32 %v5000_v50, %v3219_v43 }
 0x27f   : > { %v3259_v35 = vadd.f32 %v5000_v50, %v3220_v6  ;;  %v3260_v15 = vadd.f32 %v5000_v50, %v3221_v22  ;;  %v3261_v44 = vadd.f32 %v5000_v50, %v3222_v29  ;;  %v3262_v61 = vadd.f32 %v5000_v50, %v3223_v2 }
 0x280   : > { %v3263_v11 = vadd.f32 %v5000_v50, %v3224_v7  ;;  %v3264_v23 = vadd.f32 %v5000_v50, %v3225_v9  ;;  %v3265_v28 = vadd.f32 %v5000_v50, %v3226_v40  ;;  %v3266_v41 = vadd.f32 %v5000_v50, %v3227_v47 }
 0x281   : > { %v3267_v48 = vadd.f32 %v5000_v50, %v3228_v31  ;;  %v3268_v4 = vadd.f32 %v5000_v50, %v3229_v5  ;;  %v3269_v26 = vadd.f32 %v5000_v50, %v3230_v51  ;;  %v3270_v19 = vadd.f32 %v5000_v50, %v3231_v10 }
 0x282   : > { %v3271_v57 = vadd.f32 %v5000_v50, %v3232_v34  ;;  %v3272_v52 = vadd.f32 %v5000_v50, %v3233_v37  ;;  %v3273_v42 = vadd.f32 %v5000_v50, %v3234_v49  ;;  %v3274_v27 = vadd.f32 %v5000_v50, %v3235_v33 }
 0x283   : > { %v3275_v18 = vadd.f32 %v5000_v50, %v3236_v56  ;;  %v3276_v32 = vadd.f32 %v5000_v50, %v3237_v14  ;;  %v3277_v38 = vadd.f32 %v5000_v50, %v3238_v21  ;;  %v3278_v43 = vadd.f32 %v5000_v50, %v3239_v58 }
 0x284   : > { %v3279_v6 = vadd.f32 %v5000_v50, %v3240_v0  ;;  %v3280_v22 = vadd.f32 %v5000_v50, %v3241_v59  ;;  %v3281_v53 = vadd.f32 %v5000_v50, %v3242_v45  ;;  %v3282_v29 = vadd.f32 %v5000_v50, %v3243_v16 }
 0x285   : > { %v7940_v2 = vmax.f32 %v3251_v36, 0.0  ;;  %v7942_v7 = vmax.f32 %v3252_v1, 0.0  ;;  %v7944_v9 = vmax.f32 %v3253_v63, 0.0  ;;  %v7946_v40 = vmax.f32 %v3254_v55, 0.0 }
 0x286   : > { %v7948_v47 = vmax.f32 %v3255_v54, 0.0  ;;  %v7950_v31 = vmax.f32 %v3256_v30, 0.0  ;;  %v7952_v5 = vmax.f32 %v3257_v46, 0.0  ;;  %v7954_v51 = vmax.f32 %v3258_v62, 0.0 }
 0x287   : > { %10386 = vst [vmem:[#allocation12_spill] sm:$0xff] %v7942_v7  ;;  %10387 = vst [vmem:[#allocation15_spill] sm:$0xff] %v7946_v40  ;;  %v7956_v10 = vmax.f32 %v3259_v35, 0.0  ;;  %v7958_v34 = vmax.f32 %v3260_v15, 0.0  ;;  %v7960_v36 = vmax.f32 %v3261_v44, 0.0  ;;  %v7962_v1 = vmax.f32 %v3262_v61, 0.0 }
 0x288   : > { %10388 = vst [vmem:[#allocation2_spill] sm:$0xff] %v7950_v31  ;;  %10389 = vst [vmem:[#allocation3_spill] sm:$0xff] %v7954_v51  ;;  %v7964_v63 = vmax.f32 %v3263_v11, 0.0  ;;  %v7966_v55 = vmax.f32 %v3264_v23, 0.0  ;;  %v7968_v54 = vmax.f32 %v3265_v28, 0.0  ;;  %v7970_v37 = vmax.f32 %v3266_v41, 0.0 }
 0x289   : > { %10390 = vst [vmem:[#allocation14_spill] sm:$0xff] %v7958_v34  ;;  %10391 = vst [vmem:[#allocation16_spill] sm:$0xff] %v7962_v1  ;;  %v7972_v46 = vmax.f32 %v3267_v48, 0.0  ;;  %v7974_v49 = vmax.f32 %v3268_v4, 0.0  ;;  %v7976_v35 = vmax.f32 %v3269_v26, 0.0  ;;  %v7978_v33 = vmax.f32 %v3270_v19, 0.0 }
 0x28a   : > { %10392 = vst [vmem:[#allocation7_spill] sm:$0xff] %v7964_v63  ;;  %10393 = vst [vmem:[#allocation6_spill] sm:$0xff] %v7966_v55  ;;  %v7980_v44 = vmax.f32 %v3271_v57, 0.0  ;;  %v7982_v50 = vmax.f32 %v3272_v52, 0.0  ;;  %v7984_v11 = vmax.f32 %v3273_v42, 0.0  ;;  %v7986_v56 = vmax.f32 %v3274_v27, 0.0 }
 0x28b   : > { %10394 = vst [vmem:[#allocation4_spill] sm:$0xff] %v7968_v54  ;;  %10395 = vst [vmem:[#allocation8_spill] sm:$0xff] %v7970_v37  ;;  %v7988_v28 = vmax.f32 %v3275_v18, 0.0  ;;  %v7990_v14 = vmax.f32 %v3276_v32, 0.0  ;;  %v7992_v48 = vmax.f32 %v3277_v38, 0.0  ;;  %v7994_v21 = vmax.f32 %v3278_v43, 0.0 }
 0x28c   : > { %10396 = vst [vmem:[#allocation34_spill] sm:$0xff] %v7972_v46  ;;  %10397 = vst [vmem:[#allocation35_spill] sm:$0xff] %v7974_v49  ;;  %v7996_v26 = vmax.f32 %v3279_v6, 0.0  ;;  %v7998_v58 = vmax.f32 %v3280_v22, 0.0  ;;  %v8000_v0 = vmax.f32 %v3281_v53, 0.0  ;;  %v8002_v59 = vmax.f32 %v3282_v29, 0.0 }
 0x28d   : > { %10398 = vst [vmem:[#allocation36_spill] sm:$0xff] %v7976_v35  ;;  %10399 = vst [vmem:[#allocation37_spill] sm:$0xff] %v7978_v33  ;;  %v10003_v45 = vrot.slane %v7940_v2, 7  ;;  %v3766_v16 = vrot.slane %v7942_v7, 7  ;;  %v3768_v30 = vrot.slane %v7944_v9, 7  ;;  %v3770_v62 = vrot.slane %v7946_v40, 7 }
 0x28e   : > { %10400 = vst [vmem:[#allocation38_spill] sm:$0xff] %v7980_v44  ;;  %10401 = vst [vmem:[#allocation39_spill] sm:$0xff] %v7982_v50  ;;  %v3772_v15 = vrot.slane %v7948_v47, 7  ;;  %v3774_v61 = vrot.slane %v7950_v31, 7  ;;  %v3776_v23 = vrot.slane %v7952_v5, 7  ;;  %v3778_v41 = vrot.slane %v7954_v51, 7 }
 0x28f   : > { %10402 = vst [vmem:[#allocation40_spill] sm:$0xff] %v7984_v11  ;;  %10403 = vst [vmem:[#allocation41_spill] sm:$0xff] %v7986_v56  ;;  %v8015_v4 = vsel %vm10012_vm5, %v10003_v45, %v3766_v16  ;;  %v8018_v19 = vsel %vm10012_vm5, %v3766_v16, %v3768_v30  ;;  %v8021_v57 = vsel %vm10012_vm5, %v3768_v30, %v3770_v62  ;;  %v3780_v52 = vrot.slane %v7956_v10, 7 }
 0x290   : > { %10404 = vst [vmem:[#allocation42_spill] sm:$0xff] %v7988_v28  ;;  %10405 = vst [vmem:[#allocation43_spill] sm:$0xff] %v7990_v14  ;;  %v8025_v42 = vsel %vm10012_vm5, %v3770_v62, %v3772_v15  ;;  %v8028_v27 = vsel %vm10012_vm5, %v3772_v15, %v3774_v61  ;;  %v8031_v18 = vsel %vm10012_vm5, %v3774_v61, %v3776_v23  ;;  %v3782_v43 = vrot.slane %v7958_v34, 7 }
 0x291   : > { %10406 = vst [vmem:[#allocation44_spill] sm:$0xff] %v7992_v48  ;;  %10407 = vst [vmem:[#allocation45_spill] sm:$0xff] %v7994_v21  ;;  %v8034_v32 = vsel %vm10012_vm5, %v3776_v23, %v3778_v41  ;;  %v8037_v38 = vsel %vm10012_vm5, %v3778_v41, %v3780_v52  ;;  %v3784_v6 = vrot.slane %v7960_v36, 7  ;;  %v3786_v22 = vrot.slane %v7962_v1, 7 }
 0x292   : > { %10408 = vst [vmem:[#allocation46_spill] sm:$0xff] %v7996_v26  ;;  %10409 = vst [vmem:[#allocation47_spill] sm:$0xff] %v7998_v58  ;;  %v3788_v53 = vrot.slane %v7964_v63, 7  ;;  %v3790_v29 = vrot.slane %v7966_v55, 7  ;;  %v3792_v16 = vrot.slane %v7968_v54, 7  ;;  %v3794_v30 = vrot.slane %v7970_v37, 7 }
 0x293   : > { %10410 = vst [vmem:[#allocation48_spill] sm:$0xff] %v8000_v0  ;;  %10411 = vst [vmem:[#allocation49_spill] sm:$0xff] %v8002_v59  ;;  %v10420_v62 = vand.u32 15, %v7774_v24  ;;  %v10421_v15 = vmov 0  ;;  %v10424_v61 = vand.u32 15, %v7781_v20  ;;  %v10425_v23 = vmov 0 }
 0x294   : > { %10412 = vst [vmem:[#allocation50_spill] sm:$0xff] %v8015_v4  ;;  %10413 = vst [vmem:[#allocation51_spill] sm:$0xff] %v8018_v19  ;;  %v10428_v41 = vand.u32 15, %v7787_v3  ;;  %v10429_v45 = vmov 0  ;;  %v10433_v24 = vmov 0  ;;  %v8074_v20 = vsel %vm10012_vm5, %v3782_v43, %v3784_v6  ;;  %v10493_v37 = vld [vmem:[#allocation32_spill] sm:$0xff] }
 0x295   : > { %10414 = vst [vmem:[#allocation52_spill] sm:$0xff] %v8021_v57  ;;  %10415 = vst [vmem:[#allocation53_spill] sm:$0xff] %v8025_v42  ;;  %vm8048_vm6 = vcmp.eq.s32.totalorder %v10420_v62, 0  ;;  %vm8054_vm7 = vcmp.eq.s32.totalorder %v10424_v61, 0  ;;  %v8071_v62 = vsel %vm10012_vm5, %v3780_v52, %v3782_v43  ;;  %v8077_v61 = vsel %vm10012_vm5, %v3784_v6, %v3786_v22  ;;  %v10648_v19 = vld [vmem:[#allocation33_spill] sm:$0xff] }
 0x296   : > { %10416 = vst [vmem:[#allocation54_spill] sm:$0xff] %v8028_v27  ;;  %10417 = vst [vmem:[#allocation55_spill] sm:$0xff] %v8031_v18  ;;  %v10422_v15 = vsel %vm8048_vm6, 4294967295, %v10421_v15  ;;  %v10426_v23 = vsel %vm8054_vm7, 4294967295, %v10425_v23  ;;  %vm8060_vm8 = vcmp.eq.s32.totalorder %v10428_v41, 0  ;;  %v3796_v3 = vrot.slane %v7972_v46, 7 }
 0x297   : > { %10418 = vst [vmem:[#allocation56_spill] sm:$0xff] %v8034_v32  ;;  %10419 = vst [vmem:[#allocation57_spill] sm:$0xff] %v8037_v38  ;;  %v10430_v45 = vsel %vm8060_vm8, 4294967295, %v10429_v45  ;;  %v10432_v32 = vand.u32 15, %v7793_v39  ;;  %v10439_v41 = vand.u32 15, %v7799_v60  ;;  %v10440_v27 = vmov 0 }
 0x298   : > { %10423 = vst [vmem:[#allocation58_spill] sm:$0xff] %v10422_v15  ;;  %10427 = vst [vmem:[#allocation59_spill] sm:$0xff] %v10426_v23  ;;  %v10443_v39 = vand.u32 15, %v7805_v25  ;;  %v10447_v52 = vand.u32 15, %v7811_v13  ;;  %v10448_v43 = vmov 0  ;;  %v10451_v6 = vand.u32 15, %v7817_v12 }
 0x299   : > { %10431 = vst [vmem:[#allocation60_spill] sm:$0xff] %v10430_v45  ;;  %vm8066_vm9 = vcmp.eq.s32.totalorder %v10432_v32, 0  ;;  %10436 = vst [vmem:[#allocation62_spill] sm:$0xff] %v8071_v62  ;;  %vm8082_vm10 = vcmp.eq.s32.totalorder %v10439_v41, 0  ;;  %v10444_v32 = vmov 0  ;;  %v10452_v60 = vmov 0 }
 0x29a   : > { %v10434_v24 = vsel %vm8066_vm9, 4294967295, %v10433_v24  ;;  %10437 = vst [vmem:[#allocation63_spill] sm:$0xff] %v8074_v20  ;;  %10438 = vst [vmem:[#allocation64_spill] sm:$0xff] %v8077_v61  ;;  %v10441_v27 = vsel %vm8082_vm10, 4294967295, %v10440_v27  ;;  %vm8088_vm11 = vcmp.eq.s32.totalorder %v10443_v39, 0  ;;  %vm8094_vm12 = vcmp.eq.s32.totalorder %v10447_v52, 0 }
 0x29b   : > { %10435 = vst [vmem:[#allocation61_spill] sm:$0xff] %v10434_v24  ;;  %10442 = vst [vmem:[#allocation65_spill] sm:$0xff] %v10441_v27  ;;  %v10445_v32 = vsel %vm8088_vm11, 4294967295, %v10444_v32  ;;  %v10449_v43 = vsel %vm8094_vm12, 4294967295, %v10448_v43  ;;  %vm8100_vm13 = vcmp.eq.s32.totalorder %v10451_v6, 0  ;;  %v8105_v41 = vsel %vm10012_vm5, %v3786_v22, %v3788_v53  ;;  %v10632_v38 = vld [vmem:[#allocation37_spill] sm:$0xff] }
 0x29c   : > { %10446 = vst [vmem:[#allocation66_spill] sm:$0xff] %v10445_v32  ;;  %10450 = vst [vmem:[#allocation67_spill] sm:$0xff] %v10449_v43  ;;  %v10453_v60 = vsel %vm8100_vm13, 4294967295, %v10452_v60  ;;  %v8108_v25 = vsel %vm10012_vm5, %v3788_v53, %v3790_v29  ;;  %v8111_v39 = vsel %vm10012_vm5, %v3790_v29, %v3792_v16  ;;  %v8114_v13 = vsel %vm10012_vm5, %v3792_v16, %v3794_v30  ;;  %v10467_v53 = vld [vmem:[#allocation22_spill] sm:$0xff]  ;;  %v10472_v16 = vld [vmem:[#allocation24_spill] sm:$0xff] }
 0x29d   : > { %10454 = vst [vmem:[#allocation68_spill] sm:$0xff] %v10453_v60  ;;  %10455 = vst [vmem:[#allocation69_spill] sm:$0xff] %v8105_v41  ;;  %v10459_v52 = vand.u32 15, %v7823_v8  ;;  %v10460_v12 = vmov 0  ;;  %v10463_v6 = vand.u32 15, %v7829_v17  ;;  %v10464_v22 = vmov 0 }
 0x29e   : > { %10456 = vst [vmem:[#allocation70_spill] sm:$0xff] %v8108_v25  ;;  %10457 = vst [vmem:[#allocation71_spill] sm:$0xff] %v8111_v39  ;;  %v10468_v25 = vand.u32 15, %v10467_v53  ;;  %v10469_v29 = vmov 0  ;;  %v10474_v8 = vmov 0  ;;  %v3798_v17 = vrot.slane %v7974_v49, 7 }
 0x29f   : > { %10458 = vst [vmem:[#allocation72_spill] sm:$0xff] %v8114_v13  ;;  %vm8118_vm14 = vcmp.eq.s32.totalorder %v10459_v52, 0  ;;  %vm8124_vm15 = vcmp.eq.s32.totalorder %v10463_v6, 0  ;;  %v10473_v13 = vand.u32 15, %v10472_v16  ;;  %v8141_v52 = vsel %vm10012_vm5, %v3794_v30, %v3796_v3  ;;  %v10478_v53 = vld [vmem:[#allocation26_spill] sm:$0xff]  ;;  %v10483_v16 = vld [vmem:[#allocation28_spill] sm:$0xff] }
 0x2a0   : > { %v10461_v12 = vsel %vm8118_vm14, 4294967295, %v10460_v12  ;;  %v10465_v22 = vsel %vm8124_vm15, 4294967295, %v10464_v22  ;;  %vm8130_vm0 = vcmp.eq.s32.totalorder %v10468_v25, 0  ;;  %10477 = vst [vmem:[#allocation75_spill] sm:$0xff] %v8141_v52  ;;  %v3800_v6 = vrot.slane %v7976_v35, 7  ;;  %v10488_v30 = vld [vmem:[#allocation30_spill] sm:$0xff] }
 0x2a1   : > { %10462 = vst [vmem:[#allocation73_spill] sm:$0xff] %v10461_v12  ;;  %10466 = vst [vmem:[#allocation74_spill] sm:$0xff] %v10465_v22  ;;  %v10470_v29 = vsel %vm8130_vm0, 4294967295, %v10469_v29  ;;  %vm8136_vm1 = vcmp.eq.s32.totalorder %v10473_v13, 0  ;;  %v3802_v61 = vrot.slane %v7978_v33, 7  ;;  %v10479_v25 = vand.u32 15, %v10478_v53 }
 0x2a2   : > { %10471 = vst [vmem:[#allocation22_spill] sm:$0xff] %v10470_v29  ;;  %v10475_v8 = vsel %vm8136_vm1, 4294967295, %v10474_v8  ;;  %v10480_v62 = vmov 0  ;;  %v10484_v13 = vand.u32 15, %v10483_v16  ;;  %v10485_v57 = vmov 0 }
 0x2a3   : > { %10476 = vst [vmem:[#allocation24_spill] sm:$0xff] %v10475_v8  ;;  %vm8148_vm3 = vcmp.eq.s32.totalorder %v10479_v25, 0  ;;  %v10489_v4 = vand.u32 15, %v10488_v30  ;;  %v10490_v49 = vmov 0  ;;  %v10494_v33 = vand.u32 15, %v10493_v37 }
 0x2a4   : > { %v10481_v62 = vsel %vm8148_vm3, 4294967295, %v10480_v62  ;;  %vm8154_vm4 = vcmp.eq.s32.totalorder %v10484_v13, 0  ;;  %v10495_v53 = vmov 0  ;;  %v3804_v25 = vrot.slane %v7980_v44, 7 }
 0x2a5   : > { %10482 = vst [vmem:[#allocation26_spill] sm:$0xff] %v10481_v62  ;;  %v10486_v57 = vsel %vm8154_vm4, 4294967295, %v10485_v57  ;;  %vm8160_vm2 = vcmp.eq.s32.totalorder %v10489_v4, 0  ;;  %vm8166_vm5 = vcmp.eq.s32.totalorder %v10494_v33, 0  ;;  %v3806_v16 = vrot.slane %v7982_v50, 7  ;;  %v10562_v62 = vld [vmem:[#allocation5_spill] sm:$0xff] }
 0x2a6   : > { %10487 = vst [vmem:[#allocation28_spill] sm:$0xff] %v10486_v57  ;;  %v10491_v49 = vsel %vm8160_vm2, 4294967295, %v10490_v49  ;;  %v10496_v53 = vsel %vm8166_vm5, 4294967295, %v10495_v53  ;;  %v3808_v13 = vrot.slane %v7984_v11, 7  ;;  %v3810_v55 = vrot.slane %v7986_v56, 7 }
 0x2a7   : > { %10492 = vst [vmem:[#allocation30_spill] sm:$0xff] %v10491_v49  ;;  %10497 = vst [vmem:[#allocation32_spill] sm:$0xff] %v10496_v53  ;;  %vm10498_vm4 = vcmask 1040384   ;;  %v3812_v33 = vrot.slane %v7988_v28, 7  ;;  %v3940_v53 = vrot.slane %v7956_v10, 1  ;;  %v10553_v57 = vmov 0 }
 0x2a8   : > { %v8175_v30 = vsel %vm10498_vm4, %v3796_v3, %v3798_v17  ;;  %vm10500_vm3 = vmmov %vm10498_vm4  ;;  %v10564_v8 = vmov 0  ;;  %v10569_v29 = vmov 0  ;;  %v10574_v52 = vmov 0 }
 0x2a9   : > { %10499 = vst [vmem:[#allocation76_spill] sm:$0xff] %v8175_v30  ;;  %v8178_v4 = vsel %vm10500_vm3, %v3798_v17, %v3800_v6  ;;  %vm10502_vm2 = vmmov %vm10500_vm3  ;;  %v3818_v30 = vrot.slane %v7994_v21, 7  ;;  %v10584_v60 = vmov 0  ;;  %v10589_v41 = vmov 0 }
 0x2aa   : > { %10501 = vst [vmem:[#allocation77_spill] sm:$0xff] %v8178_v4  ;;  %v8181_v37 = vsel %vm10502_vm2, %v3800_v6, %v3802_v61  ;;  %vm10504_vm5 = vmmov %vm10502_vm2  ;;  %v3814_v6 = vrot.slane %v7990_v14, 7  ;;  %v10520_v14 = vrot.slane %v7940_v2, 7  ;;  %v10572_v4 = vld [vmem:[#allocation13_spill] sm:$0xff]  ;;  %v3960_v32 = vrot.slane %v7976_v35, 1 }
 0x2ab   : > { %10503 = vst [vmem:[#allocation78_spill] sm:$0xff] %v8181_v37  ;;  %v8185_v1 = vsel %vm10504_vm5, %v3802_v61, %v3804_v25  ;;  %vm10506_vm1 = vmmov %vm10502_vm2  ;;  %v3816_v37 = vrot.slane %v7992_v48, 7  ;;  %v3820_v61 = vrot.slane %v7996_v26, 7  ;;  %v10573_v22 = vand.u32 15, %v10572_v4 }
 0x2ac   : > { %10505 = vst [vmem:[#allocation79_spill] sm:$0xff] %v8185_v1  ;;  %v8188_v50 = vsel %vm10506_vm1, %v3804_v25, %v3806_v16  ;;  %vm10508_vm0 = vmmov %vm10506_vm1  ;;  %v3822_v25 = vrot.slane %v7998_v58, 7  ;;  %v3962_v27 = vrot.slane %v10632_v38, 1  ;;  %v10635_v18 = vmov 0 }
 0x2ad   : > { %10507 = vst [vmem:[#allocation80_spill] sm:$0xff] %v8188_v50  ;;  %v8191_v34 = vsel %vm10508_vm0, %v3806_v16, %v3808_v13  ;;  %vm10510_vm15 = vmmov %vm10508_vm0  ;;  %v3824_v50 = vrot.slane %v8000_v0, 7  ;;  %v3826_v16 = vrot.slane %v8002_v59, 7  ;;  %v8219_v21 = vsel %vm10508_vm0, %v7940_v2, %v10520_v14 }
 0x2ae   : > { %10509 = vst [vmem:[#allocation81_spill] sm:$0xff] %v8191_v34  ;;  %v8194_v3 = vsel %vm10510_vm15, %v3808_v13, %v3810_v55  ;;  %vm10512_vm4 = vmmov %vm10508_vm0  ;;  %v3926_v14 = vrot.slane %v7942_v7, 1  ;;  %v10563_v34 = vand.u32 15, %v10562_v62  ;;  %v10640_v24 = vmov 0 }
 0x2af   : > { %10511 = vst [vmem:[#allocation82_spill] sm:$0xff] %v8194_v3  ;;  %v8197_v17 = vsel %vm10512_vm4, %v3810_v55, %v3812_v33  ;;  %vm10514_vm2 = vmmov %vm10508_vm0  ;;  %v10645_v45 = vmov 0  ;;  %v10649_v23 = vand.u32 15, %v10648_v19  ;;  %v3970_v15 = vrot.slane %v7986_v56, 1 }
 0x2b0   : > { %10513 = vst [vmem:[#allocation83_spill] sm:$0xff] %v8197_v17  ;;  %v8207_v13 = vsel %vm10514_vm2, %v3812_v33, %v3814_v6  ;;  %vm10516_vm5 = vmmov %vm10508_vm0  ;;  %v10560_v17 = vld [vmem:[#allocation6_spill] sm:$0xff] }
 0x2b1   : > { %10515 = vst [vmem:[#allocation84_spill] sm:$0xff] %v8207_v13  ;;  %v8210_v55 = vsel %vm10516_vm5, %v3814_v6, %v3816_v37  ;;  %vm10518_vm15 = vmmov %vm10508_vm0  ;;  %vm8457_vm6 = vcmp.eq.s32.totalorder %v10649_v23, 15  ;;  %v3972_v23 = vrot.slane %v7988_v28, 1  ;;  %v10671_v28 = vld [vmem:[#allocation45_spill] sm:$0xff] }
 0x2b2   : > { %10517 = vst [vmem:[#allocation85_spill] sm:$0xff] %v8210_v55  ;;  %v8213_v3 = vsel %vm10518_vm15, %v3816_v37, %v3818_v30  ;;  %10521 = vst [vmem:[#allocation87_spill] sm:$0xff] %v8219_v21  ;;  %v3930_v37 = vrot.slane %v7946_v40, 1  ;;  %v10653_v21 = vld [vmem:[#allocation39_spill] sm:$0xff] }
 0x2b3   : > { %10519 = vst [vmem:[#allocation86_spill] sm:$0xff] %v8213_v3  ;;  %vm10522_vm1 = vmmov %vm10508_vm0 }
 0x2b4   : > { %v8222_v58 = vsel %vm10522_vm1, %v3818_v30, %v3820_v61  ;;  %vm10524_vm3 = vmmov %vm10508_vm0  ;;  %v3925_v30 = vrot.slane %v7940_v2, 1 }
 0x2b5   : > { %10523 = vst [vmem:[#allocation88_spill] sm:$0xff] %v8222_v58  ;;  %v8225_v59 = vsel %vm10524_vm3, %v3820_v61, %v3822_v25  ;;  %vm10526_vm4 = vmmov %vm10508_vm0  ;;  %v3928_v61 = vrot.slane %v7944_v9, 1 }
 0x2b6   : > { %10525 = vst [vmem:[#allocation89_spill] sm:$0xff] %v8225_v59  ;;  %v8228_v33 = vsel %vm10526_vm4, %v3822_v25, %v3824_v50  ;;  %vm10528_vm2 = vmmov %vm10508_vm0  ;;  %v3932_v25 = vrot.slane %v7948_v47, 1  ;;  %v3936_v59 = vrot.slane %v7952_v5, 1  ;;  %vm10537_vm4 = vcmask 1046528  }
 0x2b7   : > { %10527 = vst [vmem:[#allocation90_spill] sm:$0xff] %v8228_v33  ;;  %v8231_v6 = vsel %vm10528_vm2, %v3824_v50, %v3826_v16  ;;  %v3938_v16 = vrot.slane %v7954_v51, 1  ;;  %v8306_v58 = vsel %vm10537_vm4, %v3925_v30, %v3926_v14  ;;  %vm10539_vm2 = vmmov %vm10537_vm4 }
 0x2b8   : > { %10529 = vst [vmem:[#allocation91_spill] sm:$0xff] %v8231_v6  ;;  %v3934_v6 = vrot.slane %v7950_v31, 1  ;;  %10538 = vst [vmem:[#allocation92_spill] sm:$0xff] %v8306_v58  ;;  %v8309_v50 = vsel %vm10539_vm2, %v3926_v14, %v3928_v61  ;;  %v10551_v58 = vld [vmem:[#allocation18_spill] sm:$0xff] }
 0x2b9   : > { %10540 = vst [vmem:[#allocation93_spill] sm:$0xff] %v8309_v50  ;;  %vm10541_vm3 = vmmov %vm10539_vm2  ;;  %v10552_v14 = vand.u32 15, %v10551_v58  ;;  %v10561_v58 = vld [vmem:[#allocation8_spill] sm:$0xff] }
 0x2ba   : > { %v8312_v33 = vsel %vm10541_vm3, %v3928_v61, %v3930_v37  ;;  %vm10543_vm1 = vmmov %vm10539_vm2  ;;  %v10730_v50 = vld [vmem:[#allocation60_spill] sm:$0xff] }
 0x2bb   : > { %10542 = vst [vmem:[#allocation94_spill] sm:$0xff] %v8312_v33  ;;  %v8316_v49 = vsel %vm10543_vm1, %v3930_v37, %v3932_v25  ;;  %vm10545_vm0 = vmmov %vm10543_vm1  ;;  %vm8329_vm4 = vcmp.eq.s32.totalorder %v10552_v14, 15  ;;  %v10558_v37 = vld [vmem:[#allocation14_spill] sm:$0xff]  ;;  %v3954_v14 = vrot.slane %v10561_v58, 1 }
 0x2bc   : > { %10544 = vst [vmem:[#allocation95_spill] sm:$0xff] %v8316_v49  ;;  %v8319_v3 = vsel %vm10545_vm0, %v3932_v25, %v3934_v6  ;;  %vm10547_vm15 = vmmov %vm10545_vm0  ;;  %v10554_v57 = vsel %vm8329_vm4, 4294967295, %v10553_v57  ;;  %v3942_v33 = vrot.slane %v10558_v37, 1  ;;  %v3944_v25 = vrot.slane %v7960_v36, 1 }
 0x2bd   : > { %10546 = vst [vmem:[#allocation96_spill] sm:$0xff] %v8319_v3  ;;  %v8322_v55 = vsel %vm10547_vm15, %v3934_v6, %v3936_v59  ;;  %vm10549_vm5 = vmmov %vm10545_vm0  ;;  %v10559_v3 = vld [vmem:[#allocation16_spill] sm:$0xff]  ;;  %v3948_v6 = vrot.slane %v7964_v63, 1 }
 0x2be   : > { %10548 = vst [vmem:[#allocation97_spill] sm:$0xff] %v8322_v55  ;;  %v8325_v30 = vsel %vm10549_vm5, %v3936_v59, %v3938_v16  ;;  %10555 = vst [vmem:[#allocation18_spill] sm:$0xff] %v10554_v57  ;;  %v3946_v13 = vrot.slane %v10559_v3, 1  ;;  %v3950_v59 = vrot.slane %v10560_v17, 1  ;;  %vm8345_vm5 = vcmp.eq.s32.totalorder %v10563_v34, 15  ;;  %v10734_v57 = vld [vmem:[#allocation54_spill] sm:$0xff] }
 0x2bf   : > { %10550 = vst [vmem:[#allocation98_spill] sm:$0xff] %v8325_v30  ;;  %vm10556_vm3 = vmmov %vm10545_vm0  ;;  %v3952_v30 = vrot.slane %v7968_v54, 1  ;;  %v10565_v8 = vsel %vm8345_vm5, 4294967295, %v10564_v8  ;;  %vm8357_vm0 = vcmp.eq.s32.totalorder %v10573_v22, 15  ;;  %v8362_v12 = vsel %vm10543_vm1, %v3940_v53, %v3942_v33  ;;  %v10587_v22 = vld [vmem:[#allocation10_spill] sm:$0xff]  ;;  %v10672_v54 = vld [vmem:[#allocation47_spill] sm:$0xff] }
 0x2c0   : > { %v8334_v61 = vsel %vm10556_vm3, %v3938_v16, %v3940_v53  ;;  %10566 = vst [vmem:[#allocation5_spill] sm:$0xff] %v10565_v8  ;;  %v10567_v16 = vld [vmem:[#allocation9_spill] sm:$0xff]  ;;  %v10575_v52 = vsel %vm8357_vm0, 4294967295, %v10574_v52  ;;  %10577 = vst [vmem:[#allocation100_spill] sm:$0xff] %v8362_v12  ;;  %v10588_v4 = vand.u32 15, %v10587_v22  ;;  %v10592_v53 = vld [vmem:[#allocation11_spill] sm:$0xff] }
 0x2c1   : > { %10557 = vst [vmem:[#allocation99_spill] sm:$0xff] %v8334_v61  ;;  %v10568_v1 = vand.u32 15, %v10567_v16  ;;  %10576 = vst [vmem:[#allocation13_spill] sm:$0xff] %v10575_v52  ;;  %v10582_v16 = vld [vmem:[#allocation17_spill] sm:$0xff]  ;;  %v10594_v12 = vmov 0  ;;  %v10722_v61 = vld [vmem:[#allocation87_spill] sm:$0xff] }
 0x2c2   : > { %vm10578_vm2 = vmmov %vm10543_vm1  ;;  %v10583_v39 = vand.u32 15, %v10582_v16  ;;  %vm8379_vm13 = vcmp.eq.s32.totalorder %v10588_v4, 15  ;;  %v10599_v16 = vmov 0 }
 0x2c3   : > { %vm8351_vm15 = vcmp.eq.s32.totalorder %v10568_v1, 15  ;;  %v8365_v34 = vsel %vm10578_vm2, %v3942_v33, %v3944_v25  ;;  %vm10580_vm3 = vmmov %vm10543_vm1  ;;  %v3956_v1 = vrot.slane %v7972_v46, 1  ;;  %v10590_v41 = vsel %vm8379_vm13, 4294967295, %v10589_v41 }
 0x2c4   : > { %v10570_v29 = vsel %vm8351_vm15, 4294967295, %v10569_v29  ;;  %10579 = vst [vmem:[#allocation101_spill] sm:$0xff] %v8365_v34  ;;  %v8368_v62 = vsel %vm10580_vm3, %v3944_v25, %v3946_v13  ;;  %vm8373_vm14 = vcmp.eq.s32.totalorder %v10583_v39, 15  ;;  %10591 = vst [vmem:[#allocation10_spill] sm:$0xff] %v10590_v41  ;;  %v10593_v33 = vand.u32 15, %v10592_v53  ;;  %v10597_v25 = vld [vmem:[#allocation19_spill] sm:$0xff] }
 0x2c5   : > { %10571 = vst [vmem:[#allocation9_spill] sm:$0xff] %v10570_v29  ;;  %10581 = vst [vmem:[#allocation102_spill] sm:$0xff] %v8368_v62  ;;  %v10585_v60 = vsel %vm8373_vm14, 4294967295, %v10584_v60  ;;  %v10598_v62 = vand.u32 15, %v10597_v25  ;;  %v8396_v39 = vsel %vm10580_vm3, %v3946_v13, %v3948_v6  ;;  %v10611_v25 = vmov 0  ;;  %v10727_v29 = vld [vmem:[#allocation51_spill] sm:$0xff] }
 0x2c6   : > { %10586 = vst [vmem:[#allocation17_spill] sm:$0xff] %v10585_v60  ;;  %vm8385_vm1 = vcmp.eq.s32.totalorder %v10593_v33, 15  ;;  %10602 = vst [vmem:[#allocation103_spill] sm:$0xff] %v8396_v39  ;;  %v10609_v33 = vld [vmem:[#allocation20_spill] sm:$0xff]  ;;  %v10616_v13 = vmov 0  ;;  %v3978_v46 = vrot.slane %v10671_v28, 1 }
 0x2c7   : > { %v10595_v12 = vsel %vm8385_vm1, 4294967295, %v10594_v12  ;;  %vm8391_vm2 = vcmp.eq.s32.totalorder %v10598_v62, 15  ;;  %vm10603_vm12 = vmmov %vm10580_vm3  ;;  %v10610_v43 = vand.u32 15, %v10609_v33  ;;  %v10614_v62 = vld [vmem:[#allocation21_spill] sm:$0xff]  ;;  %v10626_v33 = vmov 0 }
 0x2c8   : > { %10596 = vst [vmem:[#allocation11_spill] sm:$0xff] %v10595_v12  ;;  %v10600_v16 = vsel %vm8391_vm2, 4294967295, %v10599_v16  ;;  %v8399_v22 = vsel %vm10603_vm12, %v3948_v6, %v3950_v59  ;;  %vm10605_vm11 = vmmov %vm10580_vm3  ;;  %v10615_v20 = vand.u32 15, %v10614_v62  ;;  %v10619_v6 = vld [vmem:[#allocation23_spill] sm:$0xff]  ;;  %v8674_v34 = vmul.f32 0.75, %v10672_v54 }
 0x2c9   : > { %10601 = vst [vmem:[#allocation19_spill] sm:$0xff] %v10600_v16  ;;  %10604 = vst [vmem:[#allocation104_spill] sm:$0xff] %v8399_v22  ;;  %v8402_v4 = vsel %vm10605_vm11, %v3950_v59, %v3952_v30  ;;  %vm8409_vm9 = vcmp.eq.s32.totalorder %v10610_v43, 15  ;;  %v10620_v22 = vand.u32 15, %v10619_v6  ;;  %v10621_v59 = vmov 0  ;;  %v10631_v62 = vld [vmem:[#allocation35_spill] sm:$0xff] }
 0x2ca   : > { %10606 = vst [vmem:[#allocation105_spill] sm:$0xff] %v8402_v4  ;;  %vm10607_vm10 = vmmov %vm10580_vm3  ;;  %v10612_v25 = vsel %vm8409_vm9, 4294967295, %v10611_v25  ;;  %vm8415_vm8 = vcmp.eq.s32.totalorder %v10615_v20, 15  ;;  %v3958_v20 = vrot.slane %v10631_v62, 1  ;;  %v10633_v6 = vld [vmem:[#allocation27_spill] sm:$0xff]  ;;  %v8656_v4 = vmul.f32 0.75, %v7986_v56 }
 0x2cb   : > { %v8405_v53 = vsel %vm10607_vm10, %v3952_v30, %v3954_v14  ;;  %10613 = vst [vmem:[#allocation20_spill] sm:$0xff] %v10612_v25  ;;  %v10617_v13 = vsel %vm8415_vm8, 4294967295, %v10616_v13  ;;  %vm8421_vm12 = vcmp.eq.s32.totalorder %v10620_v22, 15  ;;  %v10624_v30 = vld [vmem:[#allocation25_spill] sm:$0xff]  ;;  %vm10629_vm11 = vmmov %vm10580_vm3  ;;  %v10634_v22 = vand.u32 15, %v10633_v6  ;;  %v10717_v56 = vld [vmem:[#allocation48_spill] sm:$0xff] }
 0x2cc   : > { %10608 = vst [vmem:[#allocation106_spill] sm:$0xff] %v8405_v53  ;;  %10618 = vst [vmem:[#allocation21_spill] sm:$0xff] %v10617_v13  ;;  %v10622_v59 = vsel %vm8421_vm12, 4294967295, %v10621_v59  ;;  %v10625_v53 = vand.u32 15, %v10624_v30  ;;  %v8432_v43 = vsel %vm10629_vm11, %v3954_v14, %v3956_v1  ;;  %v10638_v30 = vld [vmem:[#allocation29_spill] sm:$0xff]  ;;  %v10643_v14 = vld [vmem:[#allocation31_spill] sm:$0xff] }
 0x2cd   : > { %10623 = vst [vmem:[#allocation23_spill] sm:$0xff] %v10622_v59  ;;  %10630 = vst [vmem:[#allocation107_spill] sm:$0xff] %v8432_v43  ;;  %vm8439_vm3 = vcmp.eq.s32.totalorder %v10634_v22, 15  ;;  %v10644_v42 = vand.u32 15, %v10643_v14  ;;  %v10650_v6 = vmov 0  ;;  %v3964_v22 = vrot.slane %v7980_v44, 1 }
 0x2ce   : > { %vm8427_vm10 = vcmp.eq.s32.totalorder %v10625_v53, 15  ;;  %v10636_v18 = vsel %vm8439_vm3, 4294967295, %v10635_v18  ;;  %v10639_v53 = vand.u32 15, %v10638_v30  ;;  %v10651_v6 = vsel %vm8457_vm6, 4294967295, %v10650_v6  ;;  %10716 = vst [vmem:[#allocation126_spill] sm:$0xff] %v8674_v34 }
 0x2cf   : > { %v10627_v33 = vsel %vm8427_vm10, 4294967295, %v10626_v33  ;;  %10637 = vst [vmem:[#allocation27_spill] sm:$0xff] %v10636_v18  ;;  %vm8451_vm11 = vcmp.eq.s32.totalorder %v10644_v42, 15  ;;  %10652 = vst [vmem:[#allocation33_spill] sm:$0xff] %v10651_v6  ;;  %v3966_v30 = vrot.slane %v10653_v21, 1  ;;  %v8611_v6 = vmul.f32 0.75, %v7956_v10 }
 0x2d0   : > { %10628 = vst [vmem:[#allocation25_spill] sm:$0xff] %v10627_v33  ;;  %vm8445_vm7 = vcmp.eq.s32.totalorder %v10639_v53, 15  ;;  %v10646_v45 = vsel %vm8451_vm11, 4294967295, %v10645_v45  ;;  %v3968_v53 = vrot.slane %v7984_v11, 1  ;;  %v8650_v43 = vmul.f32 0.75, %v10653_v21  ;;  %v10714_v21 = vld [vmem:[#allocation46_spill] sm:$0xff] }
 0x2d1   : > { %v10641_v24 = vsel %vm8445_vm7, 4294967295, %v10640_v24  ;;  %10647 = vst [vmem:[#allocation31_spill] sm:$0xff] %v10646_v45  ;;  %vm10654_vm7 = vcmask 1046528   ;;  %v8617_v45 = vmul.f32 0.75, %v7960_v36  ;;  %v8671_v41 = vmul.f32 0.75, %v10714_v21 }
 0x2d2   : > { %10642 = vst [vmem:[#allocation29_spill] sm:$0xff] %v10641_v24  ;;  %v8466_v14 = vsel %vm10654_vm7, %v3956_v1, %v3958_v20  ;;  %vm10656_vm3 = vmmov %vm10654_vm7 }
 0x2d3   : > { %10655 = vst [vmem:[#allocation108_spill] sm:$0xff] %v8466_v14  ;;  %v8469_v42 = vsel %vm10656_vm3, %v3958_v20, %v3960_v32  ;;  %vm10658_vm11 = vmmov %vm10656_vm3  ;;  %v10670_v14 = vld [vmem:[#allocation43_spill] sm:$0xff] }
 0x2d4   : > { %10657 = vst [vmem:[#allocation109_spill] sm:$0xff] %v8469_v42  ;;  %v8472_v19 = vsel %vm10658_vm11, %v3960_v32, %v3962_v27  ;;  %vm10660_vm6 = vmmov %vm10656_vm3  ;;  %v3974_v32 = vrot.slane %v10670_v14, 1  ;;  %v10702_v42 = vld [vmem:[#allocation38_spill] sm:$0xff]  ;;  %v8662_v12 = vmul.f32 0.75, %v10670_v14 }
 0x2d5   : > { %10659 = vst [vmem:[#allocation110_spill] sm:$0xff] %v8472_v19  ;;  %v8476_v35 = vsel %vm10660_vm6, %v3962_v27, %v3964_v22  ;;  %vm10662_vm10 = vmmov %vm10656_vm3  ;;  %v3976_v19 = vrot.slane %v7992_v48, 1  ;;  %v3980_v27 = vrot.slane %v7996_v26, 1  ;;  %v8593_v26 = vmul.f32 0.75, %v7944_v9  ;;  %v10720_v14 = vld [vmem:[#allocation58_spill] sm:$0xff] }
 0x2d6   : > { %10661 = vst [vmem:[#allocation111_spill] sm:$0xff] %v8476_v35  ;;  %v8479_v44 = vsel %vm10662_vm10, %v3964_v22, %v3966_v30  ;;  %vm10664_vm12 = vmmov %vm10656_vm3  ;;  %v3982_v22 = vrot.slane %v10672_v54, 1  ;;  %v8647_v25 = vmul.f32 0.75, %v10702_v42 }
 0x2d7   : > { %10663 = vst [vmem:[#allocation112_spill] sm:$0xff] %v8479_v44  ;;  %v8482_v11 = vsel %vm10664_vm12, %v3966_v30, %v3968_v53  ;;  %vm10666_vm8 = vmmov %vm10656_vm3  ;;  %v3984_v44 = vrot.slane %v8000_v0, 1  ;;  %v10673_v30 = vld [vmem:[#allocation49_spill] sm:$0xff] }
 0x2d8   : > { %10665 = vst [vmem:[#allocation113_spill] sm:$0xff] %v8482_v11  ;;  %v8485_v1 = vsel %vm10666_vm8, %v3968_v53, %v3970_v15  ;;  %vm10668_vm7 = vmmov %vm10656_vm3  ;;  %v3986_v63 = vrot.slane %v10673_v30, 1  ;;  %v8514_v0 = vsel %vm10656_vm3, %v3980_v27, %v3982_v22  ;;  %v8638_v11 = vmul.f32 0.75, %v10631_v62  ;;  %v10708_v62 = vld [vmem:[#allocation42_spill] sm:$0xff] }
 0x2d9   : > { %10667 = vst [vmem:[#allocation114_spill] sm:$0xff] %v8485_v1  ;;  %v8488_v20 = vsel %vm10668_vm7, %v3970_v15, %v3972_v23  ;;  %vm10674_vm6 = vmmov %vm10656_vm3  ;;  %v8680_v60 = vmul.f32 0.75, %v10673_v30 }
 0x2da   : > { %10669 = vst [vmem:[#allocation115_spill] sm:$0xff] %v8488_v20  ;;  %v8498_v53 = vsel %vm10674_vm6, %v3972_v23, %v3974_v32  ;;  %vm10676_vm8 = vmmov %vm10656_vm3  ;;  %v10698_v20 = vld [vmem:[#allocation34_spill] sm:$0xff] }
 0x2db   : > { %10675 = vst [vmem:[#allocation116_spill] sm:$0xff] %v8498_v53  ;;  %v8501_v15 = vsel %vm10676_vm8, %v3974_v32, %v3976_v19  ;;  %vm10678_vm12 = vmmov %vm10656_vm3  ;;  %vm10689_vm8 = vnez %v10617_v13  ;;  %v8632_v53 = vmul.f32 0.75, %v10561_v58  ;;  %v8644_v13 = vmul.f32 0.75, %v10632_v38  ;;  %v10705_v58 = vld [vmem:[#allocation40_spill] sm:$0xff] }
 0x2dc   : > { %10677 = vst [vmem:[#allocation117_spill] sm:$0xff] %v8501_v15  ;;  %v8504_v1 = vsel %vm10678_vm12, %v3976_v19, %v3978_v46  ;;  %vm10680_vm10 = vmmov %vm10656_vm3  ;;  %vm10690_vm12 = vnez %v10622_v59  ;;  %v10697_v15 = vld [vmem:[#allocation4_spill] sm:$0xff]  ;;  %v8653_v16 = vmul.f32 0.75, %v10705_v58 }
 0x2dd   : > { %10679 = vst [vmem:[#allocation118_spill] sm:$0xff] %v8504_v1  ;;  %v8511_v48 = vsel %vm10680_vm10, %v3978_v46, %v3980_v27  ;;  %10682 = vst [vmem:[#allocation120_spill] sm:$0xff] %v8514_v0  ;;  %vm10691_vm10 = vnez %v10627_v33  ;;  %v8587_v46 = vmul.f32 0.75, %v7940_v2  ;;  %v8596_v27 = vmul.f32 0.75, %v7946_v40  ;;  %v10699_v59 = vld [vmem:[#allocation36_spill] sm:$0xff] }
 0x2de   : > { %10681 = vst [vmem:[#allocation119_spill] sm:$0xff] %v8511_v48  ;;  %vm10683_vm11 = vmmov %vm10656_vm3  ;;  %v8620_v0 = vmul.f32 0.75, %v10559_v3  ;;  %v10696_v48 = vld [vmem:[#allocation7_spill] sm:$0xff]  ;;  %v8626_v1 = vmul.f32 0.75, %v10560_v17  ;;  %v8635_v33 = vmul.f32 0.75, %v10698_v20  ;;  %v8641_v35 = vmul.f32 0.75, %v10699_v59 }
 0x2df   : > { %v8517_v23 = vsel %vm10683_vm11, %v3982_v22, %v3984_v44  ;;  %vm10685_vm7 = vmmov %vm10656_vm3  ;;  %v8602_v22 = vmul.f32 0.75, %v7950_v31  ;;  %v8623_v24 = vmul.f32 0.75, %v10696_v48  ;;  %10701 = vst [vmem:[#allocation4_spill] sm:$0xff] %v8644_v13  ;;  %v8659_v17 = vmul.f32 0.75, %v10708_v62  ;;  %v10711_v38 = vld [vmem:[#allocation44_spill] sm:$0xff]  ;;  %v10725_v31 = vld [vmem:[#allocation59_spill] sm:$0xff] }
 0x2e0   : > { %10684 = vst [vmem:[#allocation121_spill] sm:$0xff] %v8517_v23  ;;  %v8520_v32 = vsel %vm10685_vm7, %v3984_v44, %v3986_v63  ;;  %vm10687_vm6 = vmmov %vm10656_vm3  ;;  %vm10692_vm3 = vnez %v10636_v18  ;;  %v8605_v44 = vmul.f32 0.75, %v7952_v5  ;;  %v8614_v23 = vmul.f32 0.75, %v10558_v37  ;;  %v10729_v40 = vld [vmem:[#allocation52_spill] sm:$0xff] }
 0x2e1   : > { %10686 = vst [vmem:[#allocation122_spill] sm:$0xff] %v8520_v32  ;;  %v8524_v19 = vsel %vm10687_vm6, %v3986_v63, %v10673_v30  ;;  %v8590_v63 = vmul.f32 0.75, %v7942_v7  ;;  %v8599_v32 = vmul.f32 0.75, %v7948_v47  ;;  %v8629_v18 = vmul.f32 0.75, %v10697_v15  ;;  %10700 = vst [vmem:[#allocation7_spill] sm:$0xff] %v8641_v35  ;;  %v10732_v30 = vld [vmem:[#allocation53_spill] sm:$0xff] }
 0x2e2   : > { %10688 = vst [vmem:[#allocation123_spill] sm:$0xff] %v8524_v19  ;;  %v8608_v19 = vmul.f32 0.75, %v7954_v51  ;;  %10703 = vst [vmem:[#allocation34_spill] sm:$0xff] %v8647_v25  ;;  %v8665_v39 = vmul.f32 0.75, %v10711_v38  ;;  %v8668_v3 = vmul.f32 0.75, %v10671_v28  ;;  %v8677_v37 = vmul.f32 0.75, %v10717_v56 }
 0x2e3   : > { %10704 = vst [vmem:[#allocation36_spill] sm:$0xff] %v8650_v43  ;;  %10706 = vst [vmem:[#allocation38_spill] sm:$0xff] %v8653_v16  ;;  %vm10721_vm6 = vnez %v10720_v14  ;;  %v10724_v28 = vld [vmem:[#allocation50_spill] sm:$0xff]  ;;  %vm10726_vm7 = vnez %v10725_v31  ;;  %v4120_v8 = vmul.f32 0.25, %v10729_v40  ;;  %vm10731_vm11 = vnez %v10730_v50  ;;  %v10742_v40 = vld [vmem:[#allocation57_spill] sm:$0xff] }
 0x2e4   : > { %10707 = vst [vmem:[#allocation40_spill] sm:$0xff] %v8656_v4  ;;  %10709 = vst [vmem:[#allocation42_spill] sm:$0xff] %v8659_v17  ;;  %v10723_v51 = vsel %vm10721_vm6, %v7940_v2, %v10722_v61  ;;  %v4118_v55 = vmul.f32 0.25, %v10724_v28  ;;  %v10728_v54 = vsel %vm10726_vm7, %v7944_v9, %v10727_v29  ;;  %v10733_v7 = vsel %vm10731_vm11, %v7948_v47, %v10732_v30  ;;  %v10735_v2 = vld [vmem:[#allocation61_spill] sm:$0xff]  ;;  %v10739_v61 = vld [vmem:[#allocation56_spill] sm:$0xff] }
 0x2e5   : > { %10710 = vst [vmem:[#allocation124_spill] sm:$0xff] %v8662_v12  ;;  %10712 = vst [vmem:[#allocation44_spill] sm:$0xff] %v8665_v39  ;;  %v4117_v52 = vmul.f32 0.25, %v10723_v51  ;;  %v4119_v49 = vmul.f32 0.25, %v10728_v54  ;;  %v4121_v14 = vmul.f32 0.25, %v10733_v7  ;;  %vm10736_vm6 = vnez %v10735_v2  ;;  %v10737_v51 = vld [vmem:[#allocation55_spill] sm:$0xff] }
 0x2e6   : > { %10713 = vst [vmem:[#allocation125_spill] sm:$0xff] %v8668_v3  ;;  %10715 = vst [vmem:[#allocation46_spill] sm:$0xff] %v8671_v41  ;;  %v10738_v28 = vsel %vm10736_vm6, %v7952_v5, %v10737_v51  ;;  %v10740_v9 = vld [vmem:[#allocation65_spill] sm:$0xff]  ;;  %v10744_v50 = vld [vmem:[#allocation62_spill] sm:$0xff] }
 0x2e7   : > { %10718 = vst [vmem:[#allocation48_spill] sm:$0xff] %v8677_v37  ;;  %10719 = vst [vmem:[#allocation127_spill] sm:$0xff] %v8680_v60  ;;  %v4122_v60 = vmul.f32 0.25, %v10734_v57  ;;  %v4123_v31 = vmul.f32 0.25, %v10738_v28  ;;  %v4124_v37 = vmul.f32 0.25, %v10739_v61  ;;  %vm10741_vm7 = vnez %v10740_v9  ;;  %v10745_v47 = vld [vmem:[#allocation66_spill] sm:$0xff] }
 0x2e8   : > { %v10743_v54 = vsel %vm10741_vm7, %v7956_v10, %v10742_v40  ;;  %v4126_v34 = vmul.f32 0.25, %v10744_v50  ;;  %vm10746_vm11 = vnez %v10745_v47  ;;  %v10747_v7 = vld [vmem:[#allocation63_spill] sm:$0xff]  ;;  %v10749_v2 = vld [vmem:[#allocation64_spill] sm:$0xff]  ;;  %v10752_v51 = vld [vmem:[#allocation69_spill] sm:$0xff] }
 0x2e9   : > { %v4125_v29 = vmul.f32 0.25, %v10743_v54  ;;  %v10748_v57 = vsel %vm10746_vm11, %v7960_v36, %v10747_v7  ;;  %v4128_v41 = vmul.f32 0.25, %v10749_v2  ;;  %v10750_v5 = vld [vmem:[#allocation67_spill] sm:$0xff]  ;;  %v10754_v9 = vld [vmem:[#allocation70_spill] sm:$0xff]  ;;  %v10755_v10 = vld [vmem:[#allocation68_spill] sm:$0xff] }
 0x2ea   : > { %v4127_v30 = vmul.f32 0.25, %v10748_v57  ;;  %vm10751_vm6 = vnez %v10750_v5  ;;  %v4130_v3 = vmul.f32 0.25, %v10754_v9  ;;  %vm10756_vm7 = vnez %v10755_v10  ;;  %v10757_v40 = vld [vmem:[#allocation71_spill] sm:$0xff]  ;;  %v10759_v47 = vld [vmem:[#allocation72_spill] sm:$0xff]  ;;  %v10760_v36 = vld [vmem:[#allocation73_spill] sm:$0xff] }
 0x2eb   : > { %v10753_v28 = vsel %vm10751_vm6, %v10696_v48, %v10752_v51  ;;  %v10758_v54 = vsel %vm10756_vm7, %v10697_v15, %v10757_v40  ;;  %v4132_v39 = vmul.f32 0.25, %v10759_v47  ;;  %vm10761_vm11 = vnez %v10760_v36  ;;  %v10762_v7 = vld [vmem:[#allocation75_spill] sm:$0xff]  ;;  %v10764_v5 = vld [vmem:[#allocation76_spill] sm:$0xff]  ;;  %v10765_v48 = vld [vmem:[#allocation74_spill] sm:$0xff] }
 0x2ec   : > { %v4129_v61 = vmul.f32 0.25, %v10753_v28  ;;  %v4131_v50 = vmul.f32 0.25, %v10758_v54  ;;  %v10763_v57 = vsel %vm10761_vm11, %v10698_v20, %v10762_v7  ;;  %v4134_v12 = vmul.f32 0.25, %v10764_v5  ;;  %v10767_v51 = vld [vmem:[#allocation77_spill] sm:$0xff]  ;;  %v10769_v10 = vld [vmem:[#allocation78_spill] sm:$0xff]  ;;  %v10772_v40 = vld [vmem:[#allocation79_spill] sm:$0xff] }
 0x2ed   : > { %v4133_v2 = vmul.f32 0.25, %v10763_v57  ;;  %vm10766_vm6 = vnez %v10765_v48  ;;  %v4136_v17 = vmul.f32 0.25, %v10769_v10  ;;  %v10770_v15 = vld [vmem:[#allocation22_spill] sm:$0xff]  ;;  %v10774_v36 = vld [vmem:[#allocation80_spill] sm:$0xff]  ;;  %v10777_v7 = vld [vmem:[#allocation81_spill] sm:$0xff] }
 0x2ee   : > { %v10768_v28 = vsel %vm10766_vm6, %v10699_v59, %v10767_v51  ;;  %vm10771_vm7 = vnez %v10770_v15  ;;  %v4138_v4 = vmul.f32 0.25, %v10774_v36  ;;  %v10775_v20 = vld [vmem:[#allocation24_spill] sm:$0xff]  ;;  %v10779_v48 = vld [vmem:[#allocation82_spill] sm:$0xff]  ;;  %v10782_v51 = vld [vmem:[#allocation83_spill] sm:$0xff] }
 0x2ef   : > { %v4135_v9 = vmul.f32 0.25, %v10768_v28  ;;  %v10773_v54 = vsel %vm10771_vm7, %v10702_v42, %v10772_v40  ;;  %vm10776_vm11 = vnez %v10775_v20  ;;  %v4140_v16 = vmul.f32 0.25, %v10779_v48  ;;  %v10780_v59 = vld [vmem:[#allocation26_spill] sm:$0xff]  ;;  %v10784_v15 = vld [vmem:[#allocation84_spill] sm:$0xff]  ;;  %v10787_v40 = vld [vmem:[#allocation85_spill] sm:$0xff] }
 0x2f0   : > { %v4137_v47 = vmul.f32 0.25, %v10773_v54  ;;  %v10778_v57 = vsel %vm10776_vm11, %v10705_v58, %v10777_v7  ;;  %vm10781_vm6 = vnez %v10780_v59  ;;  %v4142_v43 = vmul.f32 0.25, %v10784_v15  ;;  %v10785_v42 = vld [vmem:[#allocation28_spill] sm:$0xff]  ;;  %v10789_v20 = vld [vmem:[#allocation86_spill] sm:$0xff]  ;;  %v10794_v59 = vld [vmem:[#allocation89_spill] sm:$0xff] }
 0x2f1   : > { %v4139_v5 = vmul.f32 0.25, %v10778_v57  ;;  %v10783_v28 = vsel %vm10781_vm6, %v10708_v62, %v10782_v51  ;;  %vm10786_vm7 = vnez %v10785_v42  ;;  %v4144_v25 = vmul.f32 0.25, %v10789_v20  ;;  %v10790_v58 = vld [vmem:[#allocation30_spill] sm:$0xff]  ;;  %v10792_v7 = vld [vmem:[#allocation88_spill] sm:$0xff]  ;;  %v10799_v42 = vld [vmem:[#allocation91_spill] sm:$0xff] }
 0x2f2   : > { %v4141_v10 = vmul.f32 0.25, %v10783_v28  ;;  %v10788_v54 = vsel %vm10786_vm7, %v10711_v38, %v10787_v40  ;;  %vm10791_vm11 = vnez %v10790_v58  ;;  %v4146_v13 = vmul.f32 0.25, %v10794_v59  ;;  %v10795_v62 = vld [vmem:[#allocation32_spill] sm:$0xff]  ;;  %v10797_v51 = vld [vmem:[#allocation90_spill] sm:$0xff] }
 0x2f3   : > { %v4143_v36 = vmul.f32 0.25, %v10788_v54  ;;  %v10793_v57 = vsel %vm10791_vm11, %v10714_v21, %v10792_v7  ;;  %vm10796_vm6 = vnez %v10795_v62  ;;  %v4148_v35 = vmul.f32 0.25, %v10799_v42 }
 0x2f4   : > { %v4145_v48 = vmul.f32 0.25, %v10793_v57  ;;  %v10798_v28 = vsel %vm10796_vm6, %v10717_v56, %v10797_v51  ;;  %v8779_v38 = vadd.f32 %v4117_v52, %v8587_v46  ;;  %v8782_v40 = vadd.f32 %v4118_v55, %v8590_v63 }
 0x2f5   : > { %v4147_v15 = vmul.f32 0.25, %v10798_v28  ;;  %v8785_v54 = vadd.f32 %v4119_v49, %v8593_v26  ;;  %v8788_v21 = vadd.f32 %v4120_v8, %v8596_v27  ;;  %v8791_v20 = vadd.f32 %v4121_v14, %v8599_v32 }
 0x2f6   : > { %10800 = vst [vmem:[#allocation58_spill] sm:$0xff] %v8779_v38  ;;  %10801 = vst [vmem:[#allocation87_spill] sm:$0xff] %v8782_v40  ;;  %v8794_v56 = vadd.f32 %v4122_v60, %v8602_v22  ;;  %v8797_v58 = vadd.f32 %v4123_v31, %v8605_v44  ;;  %v8800_v52 = vadd.f32 %v4124_v37, %v8608_v19  ;;  %v10891_v38 = vld [vmem:[#allocation110_spill] sm:$0xff] }
 0x2f7   : > { %10802 = vst [vmem:[#allocation50_spill] sm:$0xff] %v8785_v54  ;;  %10803 = vst [vmem:[#allocation59_spill] sm:$0xff] %v8788_v21  ;;  %v8803_v55 = vadd.f32 %v4125_v29, %v8611_v6  ;;  %v8806_v49 = vadd.f32 %v4126_v34, %v8614_v23  ;;  %v8809_v8 = vadd.f32 %v4127_v30, %v8617_v45  ;;  %v10886_v54 = vld [vmem:[#allocation108_spill] sm:$0xff] }
 0x2f8   : > { %10804 = vst [vmem:[#allocation51_spill] sm:$0xff] %v8791_v20  ;;  %10805 = vst [vmem:[#allocation52_spill] sm:$0xff] %v8794_v56  ;;  %v8812_v14 = vadd.f32 %v4128_v41, %v8620_v0  ;;  %v8815_v60 = vadd.f32 %v4129_v61, %v8623_v24  ;;  %v8818_v31 = vadd.f32 %v4130_v3, %v8626_v1  ;;  %v10818_v41 = vld [vmem:[#allocation7_spill] sm:$0xff]  ;;  %v10820_v61 = vld [vmem:[#allocation4_spill] sm:$0xff]  ;;  %v4197_v40 = vmul.f32 0.25, %v10886_v54 }
 0x2f9   : > { %10806 = vst [vmem:[#allocation60_spill] sm:$0xff] %v8797_v58  ;;  %10807 = vst [vmem:[#allocation53_spill] sm:$0xff] %v8800_v52  ;;  %v8821_v37 = vadd.f32 %v4131_v50, %v8629_v18  ;;  %v8824_v29 = vadd.f32 %v4132_v39, %v8632_v53  ;;  %v8827_v34 = vadd.f32 %v4133_v2, %v8635_v33  ;;  %v10822_v3 = vld [vmem:[#allocation34_spill] sm:$0xff]  ;;  %v10824_v50 = vld [vmem:[#allocation36_spill] sm:$0xff] }
 0x2fa   : > { %10808 = vst [vmem:[#allocation54_spill] sm:$0xff] %v8803_v55  ;;  %10809 = vst [vmem:[#allocation61_spill] sm:$0xff] %v8806_v49  ;;  %v8830_v30 = vadd.f32 %v4134_v12, %v8638_v11  ;;  %v8833_v7 = vadd.f32 %v4135_v9, %v10818_v41  ;;  %v8836_v57 = vadd.f32 %v4136_v17, %v10820_v61  ;;  %v10826_v39 = vld [vmem:[#allocation38_spill] sm:$0xff]  ;;  %v10828_v2 = vld [vmem:[#allocation40_spill] sm:$0xff] }
 0x2fb   : > { %10810 = vst [vmem:[#allocation55_spill] sm:$0xff] %v8809_v8  ;;  %10811 = vst [vmem:[#allocation56_spill] sm:$0xff] %v8812_v14  ;;  %v8839_v59 = vadd.f32 %v4137_v47, %v10822_v3  ;;  %v8842_v62 = vadd.f32 %v4138_v4, %v10824_v50  ;;  %v8845_v51 = vadd.f32 %v4139_v5, %v10826_v39  ;;  %v10830_v12 = vld [vmem:[#allocation42_spill] sm:$0xff]  ;;  %v10832_v9 = vld [vmem:[#allocation124_spill] sm:$0xff] }
 0x2fc   : > { %10812 = vst [vmem:[#allocation65_spill] sm:$0xff] %v8815_v60  ;;  %10813 = vst [vmem:[#allocation57_spill] sm:$0xff] %v8818_v31  ;;  %v8848_v28 = vadd.f32 %v4140_v16, %v10828_v2  ;;  %v8851_v42 = vadd.f32 %v4141_v10, %v10830_v12  ;;  %v10834_v17 = vld [vmem:[#allocation44_spill] sm:$0xff]  ;;  %v10836_v47 = vld [vmem:[#allocation125_spill] sm:$0xff] }
 0x2fd   : > { %10814 = vst [vmem:[#allocation62_spill] sm:$0xff] %v8821_v37  ;;  %10815 = vst [vmem:[#allocation66_spill] sm:$0xff] %v8824_v29  ;;  %v10838_v4 = vld [vmem:[#allocation46_spill] sm:$0xff]  ;;  %v10842_v16 = vld [vmem:[#allocation48_spill] sm:$0xff] }
 0x2fe   : > { %10816 = vst [vmem:[#allocation63_spill] sm:$0xff] %v8827_v34  ;;  %10817 = vst [vmem:[#allocation64_spill] sm:$0xff] %v8830_v30  ;;  %v10840_v5 = vld [vmem:[#allocation126_spill] sm:$0xff]  ;;  %v10844_v10 = vld [vmem:[#allocation127_spill] sm:$0xff] }
 0x2ff   : > { %10819 = vst [vmem:[#allocation67_spill] sm:$0xff] %v8833_v7  ;;  %10821 = vst [vmem:[#allocation69_spill] sm:$0xff] %v8836_v57  ;;  %v8854_v7 = vadd.f32 %v4142_v43, %v10832_v9  ;;  %v8857_v57 = vadd.f32 %v4143_v36, %v10834_v17  ;;  %v10846_v43 = vld [vmem:[#allocation92_spill] sm:$0xff]  ;;  %v10851_v34 = vld [vmem:[#allocation94_spill] sm:$0xff] }
 0x300   : > { %10823 = vst [vmem:[#allocation70_spill] sm:$0xff] %v8839_v59  ;;  %10825 = vst [vmem:[#allocation68_spill] sm:$0xff] %v8842_v62  ;;  %v8860_v59 = vadd.f32 %v4144_v25, %v10836_v47  ;;  %v8863_v62 = vadd.f32 %v4145_v48, %v10838_v4  ;;  %v10848_v36 = vld [vmem:[#allocation12_spill] sm:$0xff]  ;;  %v4183_v48 = vmul.f32 0.25, %v10851_v34  ;;  %v10861_v60 = vld [vmem:[#allocation98_spill] sm:$0xff] }
 0x301   : > { %10827 = vst [vmem:[#allocation71_spill] sm:$0xff] %v8845_v51  ;;  %10829 = vst [vmem:[#allocation72_spill] sm:$0xff] %v8848_v28  ;;  %v8866_v51 = vadd.f32 %v4146_v13, %v10840_v5  ;;  %v8869_v28 = vadd.f32 %v4147_v15, %v10842_v16  ;;  %v10853_v13 = vld [vmem:[#allocation15_spill] sm:$0xff]  ;;  %v4187_v14 = vmul.f32 0.25, %v10861_v60  ;;  %v10866_v8 = vld [vmem:[#allocation100_spill] sm:$0xff] }
 0x302   : > { %10831 = vst [vmem:[#allocation73_spill] sm:$0xff] %v8851_v42  ;;  %10833 = vst [vmem:[#allocation75_spill] sm:$0xff] %v8854_v7  ;;  %v8872_v42 = vadd.f32 %v4148_v35, %v10844_v10  ;;  %v4181_v7 = vmul.f32 0.25, %v10846_v43  ;;  %v10859_v43 = vld [vmem:[#allocation97_spill] sm:$0xff]  ;;  %v10864_v34 = vld [vmem:[#allocation99_spill] sm:$0xff]  ;;  %v4189_v49 = vmul.f32 0.25, %v10866_v8 }
 0x303   : > { %10835 = vst [vmem:[#allocation76_spill] sm:$0xff] %v8857_v57  ;;  %10837 = vst [vmem:[#allocation74_spill] sm:$0xff] %v8860_v59  ;;  %v10849_v57 = vld [vmem:[#allocation93_spill] sm:$0xff]  ;;  %v10871_v55 = vld [vmem:[#allocation102_spill] sm:$0xff]  ;;  %v4199_v10 = vmul.f32 0.25, %v10891_v38 }
 0x304   : > { %10839 = vst [vmem:[#allocation77_spill] sm:$0xff] %v8863_v62  ;;  %10841 = vst [vmem:[#allocation78_spill] sm:$0xff] %v8866_v51  ;;  %v10850_v25 = vsel %vm8329_vm4, %v10848_v36, %v10849_v57  ;;  %v10854_v51 = vld [vmem:[#allocation95_spill] sm:$0xff]  ;;  %v4191_v52 = vmul.f32 0.25, %v10871_v55  ;;  %v10876_v58 = vld [vmem:[#allocation104_spill] sm:$0xff]  ;;  %v8971_v41 = vadd.f32 %v4181_v7, %v8587_v46  ;;  %vm11022_vm4 = vcmask 261120  }
 0x305   : > { %10843 = vst [vmem:[#allocation22_spill] sm:$0xff] %v8869_v28  ;;  %10845 = vst [vmem:[#allocation79_spill] sm:$0xff] %v8872_v42  ;;  %v4182_v59 = vmul.f32 0.25, %v10850_v25  ;;  %v10855_v29 = vsel %vm8345_vm5, %v10853_v13, %v10854_v51  ;;  %v10856_v28 = vld [vmem:[#allocation96_spill] sm:$0xff]  ;;  %v10858_v42 = vld [vmem:[#allocation2_spill] sm:$0xff]  ;;  %v4193_v56 = vmul.f32 0.25, %v10876_v58 }
 0x306   : > { %v4184_v15 = vmul.f32 0.25, %v10855_v29  ;;  %v4185_v37 = vmul.f32 0.25, %v10856_v28  ;;  %v10860_v31 = vsel %vm8351_vm15, %v10858_v42, %v10859_v43  ;;  %v10863_v36 = vld [vmem:[#allocation3_spill] sm:$0xff]  ;;  %v10868_v29 = vld [vmem:[#allocation14_spill] sm:$0xff]  ;;  %v10869_v28 = vld [vmem:[#allocation101_spill] sm:$0xff]  ;;  %10929 = vst [vmem:[#allocation80_spill] sm:$0xff] %v8971_v41 }
 0x307   : > { %v4186_v30 = vmul.f32 0.25, %v10860_v31  ;;  %v10865_v25 = vsel %vm8357_vm0, %v10863_v36, %v10864_v34  ;;  %v10870_v13 = vsel %vm8373_vm14, %v10868_v29, %v10869_v28  ;;  %v10873_v31 = vld [vmem:[#allocation16_spill] sm:$0xff]  ;;  %v10874_v60 = vld [vmem:[#allocation103_spill] sm:$0xff]  ;;  %v10878_v34 = vld [vmem:[#allocation6_spill] sm:$0xff] }
 0x308   : > { %v4188_v62 = vmul.f32 0.25, %v10865_v25  ;;  %v4190_v35 = vmul.f32 0.25, %v10870_v13  ;;  %v10875_v43 = vsel %vm8379_vm13, %v10873_v31, %v10874_v60  ;;  %v10879_v8 = vld [vmem:[#allocation105_spill] sm:$0xff]  ;;  %v10881_v20 = vld [vmem:[#allocation106_spill] sm:$0xff]  ;;  %v10883_v28 = vld [vmem:[#allocation8_spill] sm:$0xff] }
 0x309   : > { %v4192_v57 = vmul.f32 0.25, %v10875_v43  ;;  %v10880_v25 = vsel %vm8385_vm1, %v10878_v34, %v10879_v8  ;;  %v4195_v21 = vmul.f32 0.25, %v10881_v20  ;;  %v10884_v55 = vld [vmem:[#allocation107_spill] sm:$0xff]  ;;  %v10889_v58 = vld [vmem:[#allocation109_spill] sm:$0xff]  ;;  %v10896_v16 = vld [vmem:[#allocation112_spill] sm:$0xff] }
 0x30a   : > { %v4194_v51 = vmul.f32 0.25, %v10880_v25  ;;  %v10885_v13 = vsel %vm8391_vm2, %v10883_v28, %v10884_v55  ;;  %v10888_v60 = vld [vmem:[#allocation35_spill] sm:$0xff]  ;;  %v10893_v8 = vld [vmem:[#allocation37_spill] sm:$0xff]  ;;  %v4201_v5 = vmul.f32 0.25, %v10896_v16  ;;  %v10901_v4 = vld [vmem:[#allocation114_spill] sm:$0xff]  ;;  %v8992_v46 = vadd.f32 %v4188_v62, %v8608_v19 }
 0x30b   : > { %v4196_v42 = vmul.f32 0.25, %v10885_v13  ;;  %v10890_v43 = vsel %vm8409_vm9, %v10888_v60, %v10889_v58  ;;  %v10894_v20 = vld [vmem:[#allocation111_spill] sm:$0xff]  ;;  %v10899_v54 = vld [vmem:[#allocation113_spill] sm:$0xff]  ;;  %v4203_v47 = vmul.f32 0.25, %v10901_v4  ;;  %v10906_v17 = vld [vmem:[#allocation116_spill] sm:$0xff]  ;;  %v9013_v19 = vadd.f32 %v4195_v21, %v8629_v18 }
 0x30c   : > { %v4198_v36 = vmul.f32 0.25, %v10890_v43  ;;  %v10895_v25 = vsel %vm10689_vm8, %v10893_v8, %v10894_v20  ;;  %v10898_v55 = vld [vmem:[#allocation39_spill] sm:$0xff]  ;;  %v10903_v58 = vld [vmem:[#allocation41_spill] sm:$0xff]  ;;  %v4205_v9 = vmul.f32 0.25, %v10906_v17  ;;  %v10911_v12 = vld [vmem:[#allocation118_spill] sm:$0xff]  ;;  %10936 = vst [vmem:[#allocation28_spill] sm:$0xff] %v8992_v46 }
 0x30d   : > { %v4200_v29 = vmul.f32 0.25, %v10895_v25  ;;  %v10900_v13 = vsel %vm10690_vm12, %v10898_v55, %v10899_v54  ;;  %v10904_v38 = vld [vmem:[#allocation115_spill] sm:$0xff]  ;;  %v10909_v16 = vld [vmem:[#allocation117_spill] sm:$0xff]  ;;  %v4207_v2 = vmul.f32 0.25, %v10911_v12  ;;  %v10917_v39 = vld [vmem:[#allocation120_spill] sm:$0xff]  ;;  %10943 = vst [vmem:[#allocation90_spill] sm:$0xff] %v9013_v19 }
 0x30e   : > { %v4202_v31 = vmul.f32 0.25, %v10900_v13  ;;  %v10905_v43 = vsel %vm10691_vm10, %v10903_v58, %v10904_v38  ;;  %v10908_v20 = vld [vmem:[#allocation43_spill] sm:$0xff]  ;;  %v10912_v55 = vld [vmem:[#allocation29_spill] sm:$0xff]  ;;  %v4209_v50 = vmul.f32 0.25, %v10917_v39  ;;  %v10923_v3 = vld [vmem:[#allocation122_spill] sm:$0xff]  ;;  %v8977_v39 = vadd.f32 %v4183_v48, %v8593_v26 }
 0x30f   : > { %v4204_v34 = vmul.f32 0.25, %v10905_v43  ;;  %v10910_v25 = vsel %vm10692_vm3, %v10908_v20, %v10909_v16  ;;  %vm10913_vm9 = vnez %v10912_v55  ;;  %v10914_v54 = vld [vmem:[#allocation45_spill] sm:$0xff]  ;;  %v10915_v4 = vld [vmem:[#allocation119_spill] sm:$0xff]  ;;  %v4211_v61 = vmul.f32 0.25, %v10923_v3  ;;  %v10953_v18 = vld [vmem:[#allocation36_spill] sm:$0xff] }
 0x310   : > { %v4206_v28 = vmul.f32 0.25, %v10910_v25  ;;  %v10916_v13 = vsel %vm10913_vm9, %v10914_v54, %v10915_v4  ;;  %v10918_v58 = vld [vmem:[#allocation31_spill] sm:$0xff]  ;;  %v10921_v17 = vld [vmem:[#allocation121_spill] sm:$0xff]  ;;  %v8974_v54 = vadd.f32 %v4182_v59, %v8590_v63  ;;  %10931 = vst [vmem:[#allocation81_spill] sm:$0xff] %v8977_v39  ;;  %v8980_v4 = vadd.f32 %v4184_v15, %v8596_v27  ;;  %v10961_v7 = vld [vmem:[#allocation124_spill] sm:$0xff] }
 0x311   : > { %v4208_v60 = vmul.f32 0.25, %v10916_v13  ;;  %vm10919_vm13 = vnez %v10918_v58  ;;  %v10920_v38 = vld [vmem:[#allocation47_spill] sm:$0xff]  ;;  %v10924_v20 = vld [vmem:[#allocation33_spill] sm:$0xff]  ;;  %v8983_v3 = vadd.f32 %v4185_v37, %v8599_v32  ;;  %v8986_v13 = vadd.f32 %v4186_v30, %v8602_v22  ;;  %v10967_v30 = vld [vmem:[#allocation46_spill] sm:$0xff] }
 0x312   : > { %v10922_v43 = vsel %vm10919_vm13, %v10920_v38, %v10921_v17  ;;  %vm10925_vm14 = vnez %v10924_v20  ;;  %v10926_v16 = vld [vmem:[#allocation49_spill] sm:$0xff]  ;;  %v10927_v12 = vld [vmem:[#allocation123_spill] sm:$0xff]  ;;  %10930 = vst [vmem:[#allocation24_spill] sm:$0xff] %v8974_v54  ;;  %10932 = vst [vmem:[#allocation82_spill] sm:$0xff] %v8980_v4  ;;  %v8989_v58 = vadd.f32 %v4187_v14, %v8605_v44  ;;  %v8995_v63 = vadd.f32 %v4189_v49, %v8611_v6 }
 0x313   : > { %v4210_v8 = vmul.f32 0.25, %v10922_v43  ;;  %v10928_v25 = vsel %vm10925_vm14, %v10926_v16, %v10927_v12  ;;  %10933 = vst [vmem:[#allocation26_spill] sm:$0xff] %v8983_v3  ;;  %10934 = vst [vmem:[#allocation83_spill] sm:$0xff] %v8986_v13  ;;  %v8998_v26 = vadd.f32 %v4190_v35, %v8614_v23  ;;  %v9001_v27 = vadd.f32 %v4191_v52, %v8617_v45  ;;  %v10980_v38 = vld [vmem:[#allocation51_spill] sm:$0xff]  ;;  %v10984_v16 = vld [vmem:[#allocation53_spill] sm:$0xff] }
 0x314   : > { %v4212_v55 = vmul.f32 0.25, %v10928_v25  ;;  %10935 = vst [vmem:[#allocation84_spill] sm:$0xff] %v8989_v58  ;;  %10937 = vst [vmem:[#allocation85_spill] sm:$0xff] %v8995_v63  ;;  %v9004_v32 = vadd.f32 %v4192_v57, %v8620_v0  ;;  %v9007_v22 = vadd.f32 %v4193_v56, %v8623_v24  ;;  %v9010_v44 = vadd.f32 %v4194_v51, %v8626_v1  ;;  %v10947_v0 = vld [vmem:[#allocation7_spill] sm:$0xff]  ;;  %v10949_v24 = vld [vmem:[#allocation4_spill] sm:$0xff] }
 0x315   : > { %10938 = vst [vmem:[#allocation86_spill] sm:$0xff] %v8998_v26  ;;  %10939 = vst [vmem:[#allocation30_spill] sm:$0xff] %v9001_v27  ;;  %v9016_v6 = vadd.f32 %v4196_v42, %v8632_v53  ;;  %v9019_v23 = vadd.f32 %v4197_v40, %v8635_v33  ;;  %v9022_v45 = vadd.f32 %v4198_v36, %v8638_v11  ;;  %v10951_v1 = vld [vmem:[#allocation34_spill] sm:$0xff]  ;;  %v10957_v33 = vld [vmem:[#allocation40_spill] sm:$0xff]  ;;  %v9079_v17 = vmul.f32 0.75, %v10980_v38 }
 0x316   : > { %10940 = vst [vmem:[#allocation88_spill] sm:$0xff] %v9004_v32  ;;  %10941 = vst [vmem:[#allocation89_spill] sm:$0xff] %v9007_v22  ;;  %v9025_v52 = vadd.f32 %v4199_v10, %v10947_v0  ;;  %v9028_v56 = vadd.f32 %v4200_v29, %v10949_v24  ;;  %v9031_v49 = vadd.f32 %v4201_v5, %v10951_v1  ;;  %v10955_v53 = vld [vmem:[#allocation38_spill] sm:$0xff]  ;;  %v10963_v10 = vld [vmem:[#allocation44_spill] sm:$0xff]  ;;  %v9088_v12 = vmul.f32 0.75, %v10984_v16 }
 0x317   : > { %10942 = vst [vmem:[#allocation32_spill] sm:$0xff] %v9010_v44  ;;  %10944 = vst [vmem:[#allocation91_spill] sm:$0xff] %v9016_v6  ;;  %v9034_v21 = vadd.f32 %v4202_v31, %v10953_v18  ;;  %v9037_v14 = vadd.f32 %v4203_v47, %v10955_v53  ;;  %v9040_v40 = vadd.f32 %v4204_v34, %v10957_v33  ;;  %v10959_v11 = vld [vmem:[#allocation42_spill] sm:$0xff]  ;;  %v10965_v5 = vld [vmem:[#allocation125_spill] sm:$0xff] }
 0x318   : > { %10945 = vst [vmem:[#allocation92_spill] sm:$0xff] %v9019_v23  ;;  %10946 = vst [vmem:[#allocation18_spill] sm:$0xff] %v9022_v45  ;;  %v9043_v37 = vadd.f32 %v4205_v9, %v10959_v11  ;;  %v9046_v59 = vadd.f32 %v4206_v28, %v10961_v7  ;;  %v9049_v48 = vadd.f32 %v4207_v2, %v10963_v10  ;;  %v10969_v47 = vld [vmem:[#allocation126_spill] sm:$0xff]  ;;  %v10971_v57 = vld [vmem:[#allocation48_spill] sm:$0xff] }
 0x319   : > { %10948 = vst [vmem:[#allocation12_spill] sm:$0xff] %v9025_v52  ;;  %10950 = vst [vmem:[#allocation93_spill] sm:$0xff] %v9028_v56  ;;  %v9052_v15 = vadd.f32 %v4208_v60, %v10965_v5  ;;  %v9055_v62 = vadd.f32 %v4209_v50, %v10967_v30  ;;  %v9058_v35 = vadd.f32 %v4210_v8, %v10969_v47  ;;  %v10973_v9 = vld [vmem:[#allocation127_spill] sm:$0xff]  ;;  %v10975_v36 = vld [vmem:[#allocation58_spill] sm:$0xff] }
 0x31a   : > { %10952 = vst [vmem:[#allocation94_spill] sm:$0xff] %v9031_v49  ;;  %10954 = vst [vmem:[#allocation5_spill] sm:$0xff] %v9034_v21  ;;  %v9061_v51 = vadd.f32 %v4211_v61, %v10971_v57  ;;  %v9064_v42 = vadd.f32 %v4212_v55, %v10973_v9  ;;  %v9067_v29 = vmul.f32 0.75, %v10975_v36  ;;  %v10976_v2 = vld [vmem:[#allocation87_spill] sm:$0xff]  ;;  %v10978_v34 = vld [vmem:[#allocation50_spill] sm:$0xff] }
 0x31b   : > { %10956 = vst [vmem:[#allocation15_spill] sm:$0xff] %v9037_v14  ;;  %10958 = vst [vmem:[#allocation95_spill] sm:$0xff] %v9040_v40  ;;  %v9070_v31 = vmul.f32 0.75, %v10976_v2  ;;  %v9073_v28 = vmul.f32 0.75, %v10978_v34  ;;  %v10979_v50 = vld [vmem:[#allocation59_spill] sm:$0xff]  ;;  %v10981_v61 = vld [vmem:[#allocation52_spill] sm:$0xff] }
 0x31c   : > { %10960 = vst [vmem:[#allocation96_spill] sm:$0xff] %v9043_v37  ;;  %10962 = vst [vmem:[#allocation9_spill] sm:$0xff] %v9046_v59  ;;  %v9076_v60 = vmul.f32 0.75, %v10979_v50  ;;  %v9082_v43 = vmul.f32 0.75, %v10981_v61  ;;  %v10982_v8 = vld [vmem:[#allocation60_spill] sm:$0xff]  ;;  %v10986_v25 = vld [vmem:[#allocation54_spill] sm:$0xff] }
 0x31d   : > { %10964 = vst [vmem:[#allocation2_spill] sm:$0xff] %v9049_v48  ;;  %10966 = vst [vmem:[#allocation97_spill] sm:$0xff] %v9052_v15  ;;  %v9085_v20 = vmul.f32 0.75, %v10982_v8  ;;  %v9091_v55 = vmul.f32 0.75, %v10986_v25  ;;  %v10988_v0 = vld [vmem:[#allocation61_spill] sm:$0xff]  ;;  %v10989_v1 = vld [vmem:[#allocation55_spill] sm:$0xff] }
 0x31e   : > { %10968 = vst [vmem:[#allocation98_spill] sm:$0xff] %v9055_v62  ;;  %10970 = vst [vmem:[#allocation13_spill] sm:$0xff] %v9058_v35  ;;  %v9094_v24 = vmul.f32 0.75, %v10988_v0  ;;  %v9097_v18 = vmul.f32 0.75, %v10989_v1  ;;  %v10990_v53 = vld [vmem:[#allocation56_spill] sm:$0xff]  ;;  %v10991_v11 = vld [vmem:[#allocation65_spill] sm:$0xff] }
 0x31f   : > { %10972 = vst [vmem:[#allocation3_spill] sm:$0xff] %v9061_v51  ;;  %10974 = vst [vmem:[#allocation99_spill] sm:$0xff] %v9064_v42  ;;  %v9100_v33 = vmul.f32 0.75, %v10990_v53  ;;  %v9103_v7 = vmul.f32 0.75, %v10991_v11  ;;  %v10992_v10 = vld [vmem:[#allocation57_spill] sm:$0xff]  ;;  %v10994_v30 = vld [vmem:[#allocation62_spill] sm:$0xff] }
 0x320   : > { %10977 = vst [vmem:[#allocation100_spill] sm:$0xff] %v9070_v31  ;;  %10983 = vst [vmem:[#allocation17_spill] sm:$0xff] %v9085_v20  ;;  %v9106_v5 = vmul.f32 0.75, %v10992_v10  ;;  %v9109_v47 = vmul.f32 0.75, %v10994_v30  ;;  %v10995_v57 = vld [vmem:[#allocation66_spill] sm:$0xff]  ;;  %v10996_v42 = vld [vmem:[#allocation63_spill] sm:$0xff] }
 0x321   : > { %10985 = vst [vmem:[#allocation14_spill] sm:$0xff] %v9088_v12  ;;  %10987 = vst [vmem:[#allocation101_spill] sm:$0xff] %v9091_v55  ;;  %v9112_v9 = vmul.f32 0.75, %v10995_v57  ;;  %v9115_v51 = vmul.f32 0.75, %v10996_v42  ;;  %v10997_v35 = vld [vmem:[#allocation64_spill] sm:$0xff]  ;;  %v10998_v15 = vld [vmem:[#allocation67_spill] sm:$0xff] }
 0x322   : > { %10993 = vst [vmem:[#allocation102_spill] sm:$0xff] %v9106_v5  ;;  %v9118_v62 = vmul.f32 0.75, %v10997_v35  ;;  %v9121_v48 = vmul.f32 0.75, %v10998_v15  ;;  %v10999_v59 = vld [vmem:[#allocation69_spill] sm:$0xff]  ;;  %v11000_v40 = vld [vmem:[#allocation70_spill] sm:$0xff]  ;;  %v11002_v21 = vld [vmem:[#allocation68_spill] sm:$0xff] }
 0x323   : > { %v9124_v37 = vmul.f32 0.75, %v10999_v59  ;;  %v9127_v14 = vmul.f32 0.75, %v11000_v40  ;;  %v9130_v49 = vmul.f32 0.75, %v11002_v21  ;;  %v11004_v56 = vld [vmem:[#allocation71_spill] sm:$0xff]  ;;  %v11006_v45 = vld [vmem:[#allocation72_spill] sm:$0xff]  ;;  %v11008_v6 = vld [vmem:[#allocation73_spill] sm:$0xff] }
 0x324   : > { %v9133_v52 = vmul.f32 0.75, %v11004_v56  ;;  %v9136_v23 = vmul.f32 0.75, %v11006_v45  ;;  %v9139_v19 = vmul.f32 0.75, %v11008_v6  ;;  %v11010_v44 = vld [vmem:[#allocation75_spill] sm:$0xff]  ;;  %v11012_v32 = vld [vmem:[#allocation76_spill] sm:$0xff]  ;;  %v11014_v26 = vld [vmem:[#allocation74_spill] sm:$0xff] }
 0x325   : > { %11001 = vst [vmem:[#allocation10_spill] sm:$0xff] %v9127_v14  ;;  %11003 = vst [vmem:[#allocation16_spill] sm:$0xff] %v9130_v49  ;;  %v9142_v22 = vmul.f32 0.75, %v11010_v44  ;;  %v9145_v27 = vmul.f32 0.75, %v11012_v32  ;;  %v9148_v63 = vmul.f32 0.75, %v11014_v26  ;;  %v11016_v46 = vld [vmem:[#allocation77_spill] sm:$0xff] }
 0x326   : > { %11005 = vst [vmem:[#allocation103_spill] sm:$0xff] %v9133_v52  ;;  %11007 = vst [vmem:[#allocation104_spill] sm:$0xff] %v9136_v23  ;;  %v9151_v58 = vmul.f32 0.75, %v11016_v46  ;;  %v11018_v13 = vld [vmem:[#allocation78_spill] sm:$0xff]  ;;  %v11021_v54 = vld [vmem:[#allocation79_spill] sm:$0xff] }
 0x327   : > { %11009 = vst [vmem:[#allocation11_spill] sm:$0xff] %v9139_v19  ;;  %11011 = vst [vmem:[#allocation6_spill] sm:$0xff] %v9142_v22  ;;  %v9154_v3 = vmul.f32 0.75, %v11018_v13  ;;  %v11020_v4 = vld [vmem:[#allocation22_spill] sm:$0xff]  ;;  %v9160_v41 = vmul.f32 0.75, %v11021_v54  ;;  %v4277_v22 = vmul.f32 0.25, %v10975_v36 }
 0x328   : > { %11013 = vst [vmem:[#allocation105_spill] sm:$0xff] %v9145_v27  ;;  %11015 = vst [vmem:[#allocation106_spill] sm:$0xff] %v9148_v63  ;;  %v9157_v39 = vmul.f32 0.75, %v11020_v4  ;;  %v4278_v27 = vmul.f32 0.25, %v10976_v2  ;;  %v9165_v19 = vmul.f32 0.25, %v10978_v34  ;;  %v9168_v63 = vmul.f32 0.25, %v10979_v50 }
 0x329   : > { %11017 = vst [vmem:[#allocation19_spill] sm:$0xff] %v9151_v58  ;;  %11019 = vst [vmem:[#allocation8_spill] sm:$0xff] %v9154_v3  ;;  %v9171_v58 = vmul.f32 0.25, %v10980_v38  ;;  %v9174_v3 = vmul.f32 0.25, %v10981_v61  ;;  %v9177_v4 = vmul.f32 0.25, %v10982_v8  ;;  %v9180_v54 = vmul.f32 0.25, %v10984_v16 }
 0x32a   : > { %v9183_v36 = vmul.f32 0.25, %v10986_v25  ;;  %v9186_v2 = vmul.f32 0.25, %v10988_v0  ;;  %v9189_v34 = vmul.f32 0.25, %v10989_v1  ;;  %v9192_v50 = vmul.f32 0.25, %v10990_v53  ;;  %vm11023_vm5 = vmmov %vm11022_vm4 }
 0x32b   : > { %v9196_v38 = vmul.f32 0.25, %v10991_v11  ;;  %v9199_v61 = vmul.f32 0.25, %v10992_v10  ;;  %v9202_v8 = vmul.f32 0.25, %v10994_v30  ;;  %v9205_v16 = vmul.f32 0.25, %v10995_v57  ;;  %vm11024_vm15 = vmmov %vm11022_vm4 }
 0x32c   : > { %v9208_v25 = vmul.f32 0.25, %v10996_v42  ;;  %v9211_v0 = vmul.f32 0.25, %v10997_v35  ;;  %v9214_v1 = vmul.f32 0.25, %v10998_v15  ;;  %v9217_v53 = vmul.f32 0.25, %v10999_v59  ;;  %vm11025_vm0 = vmmov %vm11022_vm4 }
 0x32d   : > { %v9220_v11 = vmul.f32 0.25, %v11000_v40  ;;  %v9223_v10 = vmul.f32 0.25, %v11002_v21  ;;  %v9226_v30 = vmul.f32 0.25, %v11004_v56  ;;  %v9229_v42 = vmul.f32 0.25, %v11006_v45  ;;  %vm11026_vm1 = vmmov %vm11025_vm0 }
 0x32e   : > { %v9237_v59 = vmul.f32 0.25, %v11008_v6  ;;  %v9240_v40 = vmul.f32 0.25, %v11010_v44  ;;  %v9243_v21 = vmul.f32 0.25, %v11012_v32  ;;  %v9246_v56 = vmul.f32 0.25, %v11014_v26  ;;  %vm11027_vm2 = vmmov %vm11025_vm0 }
 0x32f   : > { %v9249_v45 = vmul.f32 0.25, %v11016_v46  ;;  %v9252_v15 = vmul.f32 0.25, %v11018_v13  ;;  %v4307_v6 = vadd.f32 %v4277_v22, %v9067_v29  ;;  %v4308_v35 = vadd.f32 %v4278_v27, %v9070_v31  ;;  %vm11028_vm8 = vmmov %vm11025_vm0 }
 0x330   : > { %v4309_v44 = vadd.f32 %v4277_v22, %v9073_v28  ;;  %v4310_v32 = vadd.f32 %v4278_v27, %v9076_v60  ;;  %v4311_v26 = vadd.f32 %v9165_v19, %v9079_v17  ;;  %v4312_v46 = vadd.f32 %v9168_v63, %v9082_v43  ;;  %vm11029_vm12 = vmmov %vm11025_vm0 }
 0x331   : > { %v4313_v13 = vadd.f32 %v9171_v58, %v9085_v20  ;;  %v4314_v57 = vadd.f32 %v9174_v3, %v9088_v12  ;;  %v4315_v31 = vadd.f32 %v9177_v4, %v9091_v55  ;;  %v4316_v27 = vadd.f32 %v9180_v54, %v9094_v24  ;;  %4501 = vst.msk [vmem:[%s9234_s21] sm:$0xff] %vm11022_vm4, %v4307_v6  ;;  %vm11030_vm10 = vmmov %vm11025_vm0 }
 0x332   : > { %4502 = vst.msk [vmem:[%s9234_s21 + $0x8] sm:$0xff] %vm11023_vm5, %v4308_v35  ;;  %v4317_v22 = vadd.f32 %v9183_v36, %v9097_v18  ;;  %v4318_v12 = vadd.f32 %v9186_v2, %v9100_v33  ;;  %v4319_v55 = vadd.f32 %v9189_v34, %v9103_v7  ;;  %v4320_v20 = vadd.f32 %v9192_v50, %v9106_v5  ;;  %vm11031_vm3 = vmmov %vm11025_vm0 }
 0x333   : > { %4503 = vst.msk [vmem:[%s9234_s21 + $0x10] sm:$0xff] %vm11024_vm15, %v4309_v44  ;;  %v4321_v6 = vadd.f32 %v9196_v38, %v9109_v47  ;;  %v4322_v35 = vadd.f32 %v9199_v61, %v9112_v9  ;;  %v4323_v5 = vadd.f32 %v9202_v8, %v9115_v51  ;;  %v4324_v44 = vadd.f32 %v9205_v16, %v9118_v62  ;;  %vm11032_vm7 = vmmov %vm11025_vm0 }
 0x334   : > { %4504 = vst.msk [vmem:[%s9234_s21 + $0x18] sm:$0xff] %vm11025_vm0, %v4310_v32  ;;  %v4325_v32 = vadd.f32 %v9208_v25, %v9121_v48  ;;  %vm11033_vm11 = vmmov %vm11025_vm0 }
 0x335   : > { %4505 = vst.msk [vmem:[%s9234_s21 + $0x20] sm:$0xff] %vm11026_vm1, %v4311_v26  ;;  %v4326_v26 = vadd.f32 %v9211_v0, %v9124_v37  ;;  %vm11034_vm6 = vmmov %vm11025_vm0 }
 0x336   : > { %4506 = vst.msk [vmem:[%s9234_s21 + $0x28] sm:$0xff] %vm11027_vm2, %v4312_v46  ;;  %v4327_v46 = vadd.f32 %v9214_v1, %v9127_v14  ;;  %vm11035_vm9 = vmmov %vm11025_vm0 }
 0x337   : > { %4507 = vst.msk [vmem:[%s9234_s21 + $0x30] sm:$0xff] %vm11028_vm8, %v4313_v13  ;;  %v4328_v13 = vadd.f32 %v9217_v53, %v9130_v49  ;;  %vm11038_vm13 = vmmov %vm11025_vm0 }
 0x338   : > { %4508 = vst.msk [vmem:[%s9234_s21 + $0x38] sm:$0xff] %vm11029_vm12, %v4314_v57  ;;  %v4330_v57 = vadd.f32 %v9223_v10, %v9136_v23  ;;  %vm11039_vm14 = vmmov %vm11025_vm0  ;;  %v11044_v23 = vld [vmem:[#allocation19_spill] sm:$0xff] }
 0x339   : > { %4509 = vst.msk [vmem:[%s9234_s21 + $0x40] sm:$0xff] %vm11030_vm10, %v4315_v31  ;;  %v4329_v31 = vadd.f32 %v9220_v11, %v9133_v52  ;;  %vm11040_vm4 = vmmov %vm11025_vm0 }
 0x33a   : > { %4510 = vst.msk [vmem:[%s9234_s21 + $0x48] sm:$0xff] %vm11031_vm3, %v4316_v27  ;;  %v11036_v27 = vld [vmem:[#allocation11_spill] sm:$0xff]  ;;  %vm11041_vm5 = vmmov %vm11025_vm0 }
 0x33b   : > { %4511 = vst.msk [vmem:[%s9234_s21 + $0x50] sm:$0xff] %vm11032_vm7, %v4317_v22  ;;  %v4331_v49 = vadd.f32 %v9226_v30, %v11036_v27  ;;  %v11037_v22 = vld [vmem:[#allocation6_spill] sm:$0xff]  ;;  %vm11046_vm15 = vmmov %vm11025_vm0 }
 0x33c   : > { %4512 = vst.msk [vmem:[%s9234_s21 + $0x58] sm:$0xff] %vm11033_vm11, %v4318_v12  ;;  %v4332_v14 = vadd.f32 %v9229_v42, %v11037_v22  ;;  %v4335_v22 = vadd.f32 %v9243_v21, %v11044_v23  ;;  %vm11047_vm1 = vmmov %vm11025_vm0  ;;  %v11050_v23 = vld [vmem:[#allocation79_spill] sm:$0xff] }
 0x33d   : > { %4513 = vst.msk [vmem:[%s9234_s21 + $0x60] sm:$0xff] %vm11034_vm6, %v4319_v55  ;;  %v11043_v55 = vld [vmem:[#allocation106_spill] sm:$0xff]  ;;  %vm11048_vm2 = vmmov %vm11025_vm0 }
 0x33e   : > { %4514 = vst.msk [vmem:[%s9234_s21 + $0x68] sm:$0xff] %vm11035_vm9, %v4320_v20  ;;  %v11042_v20 = vld [vmem:[#allocation105_spill] sm:$0xff]  ;;  %v4334_v27 = vadd.f32 %v9240_v40, %v11043_v55  ;;  %vm11051_vm8 = vmmov %vm11025_vm0 }
 0x33f   : > { %4515 = vst.msk [vmem:[%s9234_s21 + $0x70] sm:$0xff] %vm11038_vm13, %v4321_v6  ;;  %v4333_v12 = vadd.f32 %v9237_v59, %v11042_v20  ;;  %v11045_v6 = vld [vmem:[#allocation8_spill] sm:$0xff]  ;;  %vm11052_vm12 = vmmov %vm11025_vm0 }
 0x340   : > { %4516 = vst.msk [vmem:[%s9234_s21 + $0x78] sm:$0xff] %vm11039_vm14, %v4322_v35  ;;  %v4336_v52 = vadd.f32 %v9246_v56, %v11045_v6  ;;  %v4338_v35 = vadd.f32 %v9252_v15, %v9160_v41  ;;  %vm11053_vm10 = vmmov %vm11025_vm0 }
 0x341   : > { %4517 = vst.msk [vmem:[%s9234_s21 + $0x80] sm:$0xff] %vm11040_vm4, %v4323_v5  ;;  %v4337_v5 = vadd.f32 %v9249_v45, %v9157_v39  ;;  %vm11054_vm3 = vmmov %vm11025_vm0 }
 0x342   : > { %4518 = vst.msk [vmem:[%s9234_s21 + $0x88] sm:$0xff] %vm11041_vm5, %v4324_v44  ;;  %v11049_v44 = vld [vmem:[#allocation22_spill] sm:$0xff]  ;;  %vm11056_vm7 = vmmov %vm11025_vm0 }
 0x343   : > { %4519 = vst.msk [vmem:[%s9234_s21 + $0x90] sm:$0xff] %vm11046_vm15, %v4325_v32  ;;  %v4339_v6 = vmul.f32 0.25, %v11049_v44  ;;  %v4340_v32 = vmul.f32 0.25, %v11050_v23  ;;  %v4343_v44 = vadd.f32 %v9171_v58, %v9073_v28  ;;  %v4344_v23 = vadd.f32 %v9174_v3, %v9076_v60  ;;  %vm11057_vm11 = vmmov %vm11025_vm0 }
 0x344   : > { %4520 = vst.msk [vmem:[%s9234_s21 + $0x98] sm:$0xff] %vm11025_vm0, %v4326_v26  ;;  %v4341_v26 = vadd.f32 %v9165_v19, %v9067_v29  ;;  %vm11058_vm6 = vmmov %vm11025_vm0  ;;  %v4346_v58 = vadd.f32 %v9180_v54, %v9082_v43  ;;  %v11060_v19 = vld [vmem:[#allocation17_spill] sm:$0xff]  ;;  %v4350_v54 = vadd.f32 %v9192_v50, %v9094_v24  ;;  %v4351_v29 = vadd.f32 %v9196_v38, %v9097_v18  ;;  %v11085_v38 = vld [vmem:[#allocation11_spill] sm:$0xff] }
 0x345   : > { %4521 = vst.msk [vmem:[%s9234_s21 + $0xa0] sm:$0xff] %vm11047_vm1, %v4327_v46  ;;  %v11055_v46 = vld [vmem:[#allocation100_spill] sm:$0xff]  ;;  %vm11059_vm9 = vmmov %vm11025_vm0  ;;  %v4347_v3 = vadd.f32 %v9183_v36, %v11060_v19  ;;  %v4352_v28 = vadd.f32 %v9199_v61, %v9100_v33  ;;  %v4353_v60 = vadd.f32 %v9202_v8, %v9103_v7  ;;  %v4355_v24 = vadd.f32 %v9208_v25, %v9109_v47  ;;  %v11086_v8 = vld [vmem:[#allocation6_spill] sm:$0xff] }
 0x346   : > { %4522 = vst.msk [vmem:[%s9234_s21 + $0xa8] sm:$0xff] %vm11048_vm2, %v4328_v13  ;;  %v4342_v13 = vadd.f32 %v9168_v63, %v11055_v46  ;;  %v4345_v63 = vadd.f32 %v9177_v4, %v9079_v17  ;;  %vm11062_vm13 = vmmov %vm11025_vm0  ;;  %v11068_v17 = vld [vmem:[#allocation102_spill] sm:$0xff]  ;;  %v4356_v18 = vadd.f32 %v9211_v0, %v9112_v9  ;;  %v4357_v33 = vadd.f32 %v9214_v1, %v9115_v51  ;;  %v11078_v36 = vld [vmem:[#allocation16_spill] sm:$0xff] }
 0x347   : > { %4523 = vst.msk [vmem:[%s9234_s21 + $0xb0] sm:$0xff] %vm11051_vm8, %v4329_v31  ;;  %vm11063_vm14 = vmmov %vm11025_vm0  ;;  %v4354_v43 = vadd.f32 %v9205_v16, %v11068_v17  ;;  %v4358_v7 = vadd.f32 %v9217_v53, %v9118_v62  ;;  %v4359_v47 = vadd.f32 %v9220_v11, %v9121_v48  ;;  %v4360_v9 = vadd.f32 %v9223_v10, %v9124_v37  ;;  %v11077_v51 = vld [vmem:[#allocation10_spill] sm:$0xff]  ;;  %v11090_v1 = vld [vmem:[#allocation19_spill] sm:$0xff] }
 0x348   : > { %4524 = vst.msk [vmem:[%s9234_s21 + $0xb8] sm:$0xff] %vm11052_vm12, %v4330_v57  ;;  %vm11065_vm4 = vmmov %vm11025_vm0  ;;  %v4361_v62 = vadd.f32 %v9226_v30, %v11077_v51  ;;  %v4362_v48 = vadd.f32 %v9229_v42, %v11078_v36  ;;  %v4365_v61 = vadd.f32 %v9243_v21, %v11085_v38  ;;  %v4366_v16 = vadd.f32 %v9246_v56, %v11086_v8  ;;  %v11091_v11 = vld [vmem:[#allocation8_spill] sm:$0xff]  ;;  %v11105_v31 = vld [vmem:[#allocation26_spill] sm:$0xff] }
 0x349   : > { %4525 = vst.msk [vmem:[%s9234_s21 + $0xc0] sm:$0xff] %vm11053_vm10, %v4331_v49  ;;  %v11061_v49 = vld [vmem:[#allocation14_spill] sm:$0xff]  ;;  %vm11066_vm5 = vmmov %vm11025_vm0  ;;  %v4367_v25 = vadd.f32 %v9249_v45, %v11042_v20  ;;  %v4368_v0 = vadd.f32 %v9252_v15, %v11043_v55  ;;  %v4369_v53 = vadd.f32 %v4339_v6, %v11090_v1  ;;  %v4370_v10 = vadd.f32 %v4340_v32, %v11091_v11  ;;  %v11097_v21 = vld [vmem:[#allocation24_spill] sm:$0xff] }
 0x34a   : > { %4526 = vst.msk [vmem:[%s9234_s21 + $0xc8] sm:$0xff] %vm11054_vm3, %v4332_v14  ;;  %v4348_v14 = vadd.f32 %v9186_v2, %v11061_v49  ;;  %vm11067_vm15 = vmmov %vm11025_vm0  ;;  %v11079_v2 = vld [vmem:[#allocation103_spill] sm:$0xff]  ;;  %v4371_v30 = vadd.f32 %v4339_v6, %v9157_v39  ;;  %v4372_v42 = vadd.f32 %v4340_v32, %v9160_v41  ;;  %v9492_v56 = vmul.f32 0.75, %v11097_v21  ;;  %v11099_v39 = vld [vmem:[#allocation81_spill] sm:$0xff] }
 0x34b   : > { %4527 = vst.msk [vmem:[%s9234_s21 + $0xd0] sm:$0xff] %vm11056_vm7, %v4333_v12  ;;  %vm11069_vm1 = vmmov %vm11025_vm0  ;;  %v4363_v37 = vadd.f32 %v9237_v59, %v11079_v2  ;;  %v11096_v59 = vld [vmem:[#allocation80_spill] sm:$0xff]  ;;  %v9495_v41 = vmul.f32 0.75, %v11099_v39  ;;  %v11100_v45 = vld [vmem:[#allocation82_spill] sm:$0xff]  ;;  %v9509_v57 = vmul.f32 0.75, %v11105_v31 }
 0x34c   : > { %4528 = vst.msk [vmem:[%s9234_s21 + $0xd8] sm:$0xff] %vm11057_vm11, %v4334_v27  ;;  %vm11070_vm2 = vmmov %vm11025_vm0  ;;  %v9498_v15 = vmul.f32 0.75, %v11100_v45  ;;  %v11106_v27 = vld [vmem:[#allocation83_spill] sm:$0xff]  ;;  %v11107_v20 = vld [vmem:[#allocation84_spill] sm:$0xff] }
 0x34d   : > { %4529 = vst.msk [vmem:[%s9234_s21 + $0xe0] sm:$0xff] %vm11058_vm6, %v4335_v22  ;;  %vm11071_vm8 = vmmov %vm11025_vm0  ;;  %v9512_v22 = vmul.f32 0.75, %v11106_v27  ;;  %v9515_v12 = vmul.f32 0.75, %v11107_v20  ;;  %v11109_v55 = vld [vmem:[#allocation28_spill] sm:$0xff]  ;;  %v11117_v32 = vld [vmem:[#allocation86_spill] sm:$0xff] }
 0x34e   : > { %4530 = vst.msk [vmem:[%s9234_s21 + $0xe8] sm:$0xff] %vm11059_vm9, %v4336_v52  ;;  %v11064_v52 = vld [vmem:[#allocation101_spill] sm:$0xff]  ;;  %vm11072_vm12 = vmmov %vm11025_vm0  ;;  %v9518_v6 = vmul.f32 0.75, %v11109_v55  ;;  %v11118_v46 = vld [vmem:[#allocation30_spill] sm:$0xff] }
 0x34f   : > { %4531 = vst.msk [vmem:[%s9234_s21 + $0xf0] sm:$0xff] %vm11062_vm13, %v4337_v5  ;;  %v4349_v4 = vadd.f32 %v9189_v34, %v11064_v52  ;;  %vm11073_vm10 = vmmov %vm11025_vm0  ;;  %v11080_v34 = vld [vmem:[#allocation104_spill] sm:$0xff]  ;;  %v11115_v5 = vld [vmem:[#allocation85_spill] sm:$0xff] }
 0x350   : > { %4532 = vst.msk [vmem:[%s9234_s21 + $0xf8] sm:$0xff] %vm11063_vm14, %v4338_v35  ;;  %vm11074_vm3 = vmmov %vm11025_vm0  ;;  %v4364_v50 = vadd.f32 %v9240_v40, %v11080_v34  ;;  %v9489_v40 = vmul.f32 0.75, %v11096_v59  ;;  %v9529_v35 = vmul.f32 0.75, %v11115_v5  ;;  %v11121_v19 = vld [vmem:[#allocation32_spill] sm:$0xff]  ;;  %v11123_v49 = vld [vmem:[#allocation90_spill] sm:$0xff] }
 0x351   : > { %5033 = vst.msk [vmem:[%s9234_s21 + $0x200] sm:$0xff] %vm11065_vm4, %v4341_v26  ;;  %vm11075_vm7 = vmmov %vm11025_vm0  ;;  %v9532_v26 = vmul.f32 0.75, %v11117_v32  ;;  %v11124_v52 = vld [vmem:[#allocation91_spill] sm:$0xff]  ;;  %v11127_v17 = vld [vmem:[#allocation12_spill] sm:$0xff] }
 0x352   : > { %5034 = vst.msk [vmem:[%s9234_s21 + $0x208] sm:$0xff] %vm11066_vm5, %v4342_v13  ;;  %vm11076_vm11 = vmmov %vm11025_vm0  ;;  %v9535_v13 = vmul.f32 0.75, %v11118_v46  ;;  %v11133_v51 = vld [vmem:[#allocation15_spill] sm:$0xff]  ;;  %v11137_v2 = vld [vmem:[#allocation96_spill] sm:$0xff] }
 0x353   : > { %5035 = vst.msk [vmem:[%s9234_s21 + $0x210] sm:$0xff] %vm11067_vm15, %v4343_v44  ;;  %vm11081_vm6 = vmmov %vm11025_vm0  ;;  %v11119_v44 = vld [vmem:[#allocation88_spill] sm:$0xff]  ;;  %v11135_v36 = vld [vmem:[#allocation95_spill] sm:$0xff] }
 0x354   : > { %5036 = vst.msk [vmem:[%s9234_s21 + $0x218] sm:$0xff] %vm11025_vm0, %v4344_v23  ;;  %vm11082_vm9 = vmmov %vm11025_vm0  ;;  %v9538_v23 = vmul.f32 0.75, %v11119_v44  ;;  %v11139_v34 = vld [vmem:[#allocation9_spill] sm:$0xff]  ;;  %v11141_v38 = vld [vmem:[#allocation2_spill] sm:$0xff] }
 0x355   : > { %5037 = vst.msk [vmem:[%s9234_s21 + $0x220] sm:$0xff] %vm11069_vm1, %v4345_v63  ;;  %vm11083_vm13 = vmmov %vm11025_vm0  ;;  %v11120_v63 = vld [vmem:[#allocation89_spill] sm:$0xff]  ;;  %v11149_v11 = vld [vmem:[#allocation3_spill] sm:$0xff] }
 0x356   : > { %5038 = vst.msk [vmem:[%s9234_s21 + $0x228] sm:$0xff] %vm11070_vm2, %v4346_v58  ;;  %vm11084_vm14 = vmmov %vm11025_vm0  ;;  %v9541_v58 = vmul.f32 0.75, %v11120_v63  ;;  %v11143_v8 = vld [vmem:[#allocation97_spill] sm:$0xff] }
 0x357   : > { %5039 = vst.msk [vmem:[%s9234_s21 + $0x230] sm:$0xff] %vm11071_vm8, %v4347_v3  ;;  %vm11087_vm4 = vmmov %vm11025_vm0  ;;  %v9544_v3 = vmul.f32 0.75, %v11121_v19  ;;  %v11147_v1 = vld [vmem:[#allocation13_spill] sm:$0xff] }
 0x358   : > { %5040 = vst.msk [vmem:[%s9234_s21 + $0x238] sm:$0xff] %vm11072_vm12, %v4348_v14  ;;  %vm11088_vm5 = vmmov %vm11025_vm0  ;;  %v9547_v14 = vmul.f32 0.75, %v11123_v49 }
 0x359   : > { %5041 = vst.msk [vmem:[%s9234_s21 + $0x240] sm:$0xff] %vm11073_vm10, %v4349_v4  ;;  %vm11089_vm15 = vmmov %vm11025_vm0  ;;  %v9550_v4 = vmul.f32 0.75, %v11124_v52 }
 0x35a   : > { %5042 = vst.msk [vmem:[%s9234_s21 + $0x248] sm:$0xff] %vm11074_vm3, %v4350_v54  ;;  %vm11092_vm1 = vmmov %vm11025_vm0  ;;  %v11125_v54 = vld [vmem:[#allocation92_spill] sm:$0xff] }
 0x35b   : > { %5043 = vst.msk [vmem:[%s9234_s21 + $0x250] sm:$0xff] %vm11075_vm7, %v4351_v29  ;;  %vm11093_vm2 = vmmov %vm11025_vm0  ;;  %v9553_v29 = vmul.f32 0.75, %v11125_v54 }
 0x35c   : > { %5044 = vst.msk [vmem:[%s9234_s21 + $0x258] sm:$0xff] %vm11076_vm11, %v4352_v28  ;;  %vm11094_vm8 = vmmov %vm11025_vm0  ;;  %v11126_v28 = vld [vmem:[#allocation18_spill] sm:$0xff] }
 0x35d   : > { %5045 = vst.msk [vmem:[%s9234_s21 + $0x260] sm:$0xff] %vm11081_vm6, %v4353_v60  ;;  %vm11095_vm12 = vmmov %vm11025_vm0  ;;  %v9556_v60 = vmul.f32 0.75, %v11126_v28 }
 0x35e   : > { %5046 = vst.msk [vmem:[%s9234_s21 + $0x268] sm:$0xff] %vm11082_vm9, %v4354_v43  ;;  %11098 = vst [vmem:[#allocation107_spill] sm:$0xff] %v9492_v56  ;;  %v9559_v43 = vmul.f32 0.75, %v11127_v17 }
 0x35f   : > { %5047 = vst.msk [vmem:[%s9234_s21 + $0x270] sm:$0xff] %vm11083_vm13, %v4355_v24  ;;  %vm11101_vm10 = vmmov %vm11025_vm0  ;;  %v11128_v24 = vld [vmem:[#allocation93_spill] sm:$0xff] }
 0x360   : > { %5048 = vst.msk [vmem:[%s9234_s21 + $0x278] sm:$0xff] %vm11084_vm14, %v4356_v18  ;;  %vm11102_vm3 = vmmov %vm11025_vm0  ;;  %v9562_v18 = vmul.f32 0.75, %v11128_v24 }
 0x361   : > { %5049 = vst.msk [vmem:[%s9234_s21 + $0x280] sm:$0xff] %vm11087_vm4, %v4357_v33  ;;  %vm11103_vm7 = vmmov %vm11025_vm0  ;;  %v11129_v33 = vld [vmem:[#allocation94_spill] sm:$0xff] }
 0x362   : > { %5050 = vst.msk [vmem:[%s9234_s21 + $0x288] sm:$0xff] %vm11088_vm5, %v4358_v7  ;;  %vm11104_vm11 = vmmov %vm11025_vm0  ;;  %v9565_v7 = vmul.f32 0.75, %v11129_v33 }
 0x363   : > { %5051 = vst.msk [vmem:[%s9234_s21 + $0x290] sm:$0xff] %vm11089_vm15, %v4359_v47  ;;  %11108 = vst [vmem:[#allocation108_spill] sm:$0xff] %v9515_v12  ;;  %v11131_v47 = vld [vmem:[#allocation5_spill] sm:$0xff] }
 0x364   : > { %5052 = vst.msk [vmem:[%s9234_s21 + $0x298] sm:$0xff] %vm11025_vm0, %v4360_v9  ;;  %11110 = vst [vmem:[#allocation20_spill] sm:$0xff] %v9518_v6  ;;  %v9568_v9 = vmul.f32 0.75, %v11131_v47 }
 0x365   : > { %5053 = vst.msk [vmem:[%s9234_s21 + $0x2a0] sm:$0xff] %vm11092_vm1, %v4361_v62  ;;  %vm11111_vm6 = vmmov %vm11025_vm0  ;;  %v9571_v62 = vmul.f32 0.75, %v11133_v51 }
 0x366   : > { %5054 = vst.msk [vmem:[%s9234_s21 + $0x2a8] sm:$0xff] %vm11093_vm2, %v4362_v48  ;;  %vm11112_vm9 = vmmov %vm11025_vm0  ;;  %v9574_v48 = vmul.f32 0.75, %v11135_v36 }
 0x367   : > { %5055 = vst.msk [vmem:[%s9234_s21 + $0x2b0] sm:$0xff] %vm11094_vm8, %v4363_v37  ;;  %vm11113_vm13 = vmmov %vm11025_vm0  ;;  %v9577_v37 = vmul.f32 0.75, %v11137_v2 }
 0x368   : > { %5056 = vst.msk [vmem:[%s9234_s21 + $0x2b8] sm:$0xff] %vm11095_vm12, %v4364_v50  ;;  %vm11114_vm14 = vmmov %vm11025_vm0  ;;  %v9580_v50 = vmul.f32 0.75, %v11139_v34 }
 0x369   : > { %5057 = vst.msk [vmem:[%s9234_s21 + $0x2c0] sm:$0xff] %vm11101_vm10, %v4365_v61  ;;  %11116 = vst [vmem:[#allocation35_spill] sm:$0xff] %v9529_v35  ;;  %v9583_v61 = vmul.f32 0.75, %v11141_v38 }
 0x36a   : > { %5058 = vst.msk [vmem:[%s9234_s21 + $0x2c8] sm:$0xff] %vm11102_vm3, %v4366_v16  ;;  %11122 = vst [vmem:[#allocation109_spill] sm:$0xff] %v9544_v3  ;;  %v9586_v16 = vmul.f32 0.75, %v11143_v8 }
 0x36b   : > { %5059 = vst.msk [vmem:[%s9234_s21 + $0x2d0] sm:$0xff] %vm11103_vm7, %v4367_v25  ;;  %11130 = vst [vmem:[#allocation110_spill] sm:$0xff] %v9565_v7  ;;  %v11145_v25 = vld [vmem:[#allocation98_spill] sm:$0xff] }
 0x36c   : > { %5060 = vst.msk [vmem:[%s9234_s21 + $0x2d8] sm:$0xff] %vm11104_vm11, %v4368_v0  ;;  %11132 = vst [vmem:[#allocation21_spill] sm:$0xff] %v9568_v9  ;;  %v9589_v0 = vmul.f32 0.75, %v11145_v25 }
 0x36d   : > { %5061 = vst.msk [vmem:[%s9234_s21 + $0x2e0] sm:$0xff] %vm11111_vm6, %v4369_v53  ;;  %11134 = vst [vmem:[#allocation37_spill] sm:$0xff] %v9571_v62  ;;  %v9592_v53 = vmul.f32 0.75, %v11147_v1 }
 0x36e   : > { %5062 = vst.msk [vmem:[%s9234_s21 + $0x2e8] sm:$0xff] %vm11112_vm9, %v4370_v10  ;;  %11136 = vst [vmem:[#allocation111_spill] sm:$0xff] %v9574_v48  ;;  %v9595_v10 = vmul.f32 0.75, %v11149_v11  ;;  %v9615_v11 = vmul.f32 0.25, %v11107_v20  ;;  %v9639_v20 = vmul.f32 0.25, %v11123_v49  ;;  %v9663_v49 = vmul.f32 0.25, %v11133_v51 }
 0x36f   : > { %5063 = vst.msk [vmem:[%s9234_s21 + $0x2f0] sm:$0xff] %vm11113_vm13, %v4371_v30  ;;  %11138 = vst [vmem:[#allocation112_spill] sm:$0xff] %v9577_v37  ;;  %v11150_v30 = vld [vmem:[#allocation99_spill] sm:$0xff]  ;;  %v4406_v37 = vmul.f32 0.25, %v11097_v21  ;;  %v9624_v21 = vmul.f32 0.25, %v11117_v32  ;;  %v9648_v32 = vmul.f32 0.25, %v11126_v28 }
 0x370   : > { %5064 = vst.msk [vmem:[%s9234_s21 + $0x2f8] sm:$0xff] %vm11114_vm14, %v4372_v42  ;;  %11140 = vst [vmem:[#allocation23_spill] sm:$0xff] %v9580_v50  ;;  %v9598_v42 = vmul.f32 0.75, %v11150_v30  ;;  %v4405_v50 = vmul.f32 0.25, %v11096_v59  ;;  %v9618_v30 = vmul.f32 0.25, %v11109_v55  ;;  %v9621_v59 = vmul.f32 0.25, %v11115_v5 }
 0x371   : > { %11142 = vst [vmem:[#allocation39_spill] sm:$0xff] %v9583_v61  ;;  %11144 = vst [vmem:[#allocation113_spill] sm:$0xff] %v9586_v16  ;;  %v9603_v61 = vmul.f32 0.25, %v11099_v39  ;;  %v9606_v16 = vmul.f32 0.25, %v11100_v45  ;;  %v9627_v39 = vmul.f32 0.25, %v11118_v46  ;;  %v9630_v45 = vmul.f32 0.25, %v11119_v44 }
 0x372   : > { %11146 = vst [vmem:[#allocation114_spill] sm:$0xff] %v9589_v0  ;;  %11148 = vst [vmem:[#allocation25_spill] sm:$0xff] %v9592_v53  ;;  %v9609_v0 = vmul.f32 0.25, %v11105_v31  ;;  %v9612_v53 = vmul.f32 0.25, %v11106_v27  ;;  %v9633_v31 = vmul.f32 0.25, %v11120_v63  ;;  %v9636_v27 = vmul.f32 0.25, %v11121_v19 }
 0x373   : > { %v9642_v55 = vmul.f32 0.25, %v11124_v52  ;;  %v9645_v5 = vmul.f32 0.25, %v11125_v54  ;;  %v9651_v46 = vmul.f32 0.25, %v11127_v17  ;;  %v9654_v44 = vmul.f32 0.25, %v11128_v24  ;;  %vm11151_vm4 = vmmov %vm11025_vm0 }
 0x374   : > { %v9657_v63 = vmul.f32 0.25, %v11129_v33  ;;  %v9660_v19 = vmul.f32 0.25, %v11131_v47  ;;  %v9666_v52 = vmul.f32 0.25, %v11135_v36  ;;  %v9669_v54 = vmul.f32 0.25, %v11137_v2  ;;  %vm11152_vm5 = vmmov %vm11025_vm0 }
 0x375   : > { %v9672_v28 = vmul.f32 0.25, %v11139_v34  ;;  %v9675_v17 = vmul.f32 0.25, %v11141_v38  ;;  %v9678_v24 = vmul.f32 0.25, %v11143_v8  ;;  %v9681_v33 = vmul.f32 0.25, %v11145_v25  ;;  %vm11153_vm15 = vmmov %vm11025_vm0 }
 0x376   : > { %v9684_v47 = vmul.f32 0.25, %v11147_v1  ;;  %v4435_v51 = vadd.f32 %v4405_v50, %v9489_v40  ;;  %v4436_v36 = vadd.f32 %v4406_v37, %v9492_v56  ;;  %v4437_v2 = vadd.f32 %v4405_v50, %v9495_v41  ;;  %vm11154_vm1 = vmmov %vm11025_vm0 }
 0x377   : > { %v4438_v34 = vadd.f32 %v4406_v37, %v9498_v15  ;;  %v4439_v38 = vadd.f32 %v9603_v61, %v9509_v57  ;;  %v4440_v8 = vadd.f32 %v9606_v16, %v9512_v22  ;;  %v4441_v25 = vadd.f32 %v9609_v0, %v9515_v12  ;;  %vm11155_vm2 = vmmov %vm11025_vm0 }
 0x378   : > { %v4442_v1 = vadd.f32 %v9612_v53, %v9518_v6  ;;  %v4443_v56 = vadd.f32 %v9615_v11, %v9529_v35  ;;  %v4444_v37 = vadd.f32 %v9618_v30, %v9532_v26  ;;  %5001 = vst.msk [vmem:[%s9234_s21 + $0x100] sm:$0xff] %vm11151_vm4, %v4435_v51  ;;  %v4445_v50 = vadd.f32 %v9621_v59, %v9535_v13  ;;  %vm11156_vm8 = vmmov %vm11025_vm0 }
 0x379   : > { %5002 = vst.msk [vmem:[%s9234_s21 + $0x108] sm:$0xff] %vm11152_vm5, %v4436_v36  ;;  %v4446_v6 = vadd.f32 %v9624_v21, %v9538_v23  ;;  %v4447_v35 = vadd.f32 %v9627_v39, %v9541_v58  ;;  %v4448_v12 = vadd.f32 %v9630_v45, %v9544_v3  ;;  %v4449_v51 = vadd.f32 %v9633_v31, %v9547_v14  ;;  %vm11157_vm12 = vmmov %vm11025_vm0 }
 0x37a   : > { %5003 = vst.msk [vmem:[%s9234_s21 + $0x110] sm:$0xff] %vm11153_vm15, %v4437_v2  ;;  %v4450_v36 = vadd.f32 %v9636_v27, %v9550_v4  ;;  %v4451_v3 = vadd.f32 %v9639_v20, %v9553_v29  ;;  %v4452_v2 = vadd.f32 %v9642_v55, %v9556_v60  ;;  %vm11158_vm10 = vmmov %vm11025_vm0 }
 0x37b   : > { %5004 = vst.msk [vmem:[%s9234_s21 + $0x118] sm:$0xff] %vm11025_vm0, %v4438_v34  ;;  %vm11159_vm3 = vmmov %vm11025_vm0  ;;  %v4453_v34 = vadd.f32 %v9645_v5, %v9559_v43 }
 0x37c   : > { %5005 = vst.msk [vmem:[%s9234_s21 + $0x120] sm:$0xff] %vm11154_vm1, %v4439_v38  ;;  %v4454_v38 = vadd.f32 %v9648_v32, %v9562_v18  ;;  %vm11160_vm7 = vmmov %vm11025_vm0 }
 0x37d   : > { %5006 = vst.msk [vmem:[%s9234_s21 + $0x128] sm:$0xff] %vm11155_vm2, %v4440_v8  ;;  %v4455_v8 = vadd.f32 %v9651_v46, %v9565_v7  ;;  %vm11161_vm11 = vmmov %vm11025_vm0 }
 0x37e   : > { %5007 = vst.msk [vmem:[%s9234_s21 + $0x130] sm:$0xff] %vm11156_vm8, %v4441_v25  ;;  %v4456_v25 = vadd.f32 %v9654_v44, %v9568_v9  ;;  %vm11162_vm6 = vmmov %vm11025_vm0 }
 0x37f   : > { %5008 = vst.msk [vmem:[%s9234_s21 + $0x138] sm:$0xff] %vm11157_vm12, %v4442_v1  ;;  %vm11163_vm9 = vmmov %vm11025_vm0  ;;  %v4458_v1 = vadd.f32 %v9660_v19, %v9574_v48  ;;  %v11172_v48 = vld [vmem:[#allocation114_spill] sm:$0xff] }
 0x380   : > { %5009 = vst.msk [vmem:[%s9234_s21 + $0x140] sm:$0xff] %vm11158_vm10, %v4443_v56  ;;  %v4457_v56 = vadd.f32 %v9657_v63, %v9571_v62  ;;  %vm11166_vm13 = vmmov %vm11025_vm0 }
 0x381   : > { %5010 = vst.msk [vmem:[%s9234_s21 + $0x148] sm:$0xff] %vm11159_vm3, %v4444_v37  ;;  %v11164_v37 = vld [vmem:[#allocation112_spill] sm:$0xff]  ;;  %vm11167_vm14 = vmmov %vm11025_vm0 }
 0x382   : > { %5011 = vst.msk [vmem:[%s9234_s21 + $0x150] sm:$0xff] %vm11160_vm7, %v4445_v50  ;;  %v4459_v9 = vadd.f32 %v9663_v49, %v11164_v37  ;;  %v11165_v50 = vld [vmem:[#allocation23_spill] sm:$0xff]  ;;  %vm11168_vm4 = vmmov %vm11025_vm0 }
 0x383   : > { %5012 = vst.msk [vmem:[%s9234_s21 + $0x158] sm:$0xff] %vm11161_vm11, %v4446_v6  ;;  %v4460_v7 = vadd.f32 %v9666_v52, %v11165_v50  ;;  %vm11169_vm5 = vmmov %vm11025_vm0  ;;  %v4463_v50 = vadd.f32 %v9675_v17, %v11172_v48  ;;  %v11178_v48 = vld [vmem:[#allocation99_spill] sm:$0xff] }
 0x384   : > { %5013 = vst.msk [vmem:[%s9234_s21 + $0x160] sm:$0xff] %vm11162_vm6, %v4447_v35  ;;  %v11171_v35 = vld [vmem:[#allocation113_spill] sm:$0xff]  ;;  %vm11174_vm15 = vmmov %vm11025_vm0 }
 0x385   : > { %5014 = vst.msk [vmem:[%s9234_s21 + $0x168] sm:$0xff] %vm11163_vm9, %v4448_v12  ;;  %v11170_v12 = vld [vmem:[#allocation39_spill] sm:$0xff]  ;;  %v4462_v37 = vadd.f32 %v9672_v28, %v11171_v35  ;;  %vm11175_vm1 = vmmov %vm11025_vm0 }
 0x386   : > { %5015 = vst.msk [vmem:[%s9234_s21 + $0x170] sm:$0xff] %vm11166_vm13, %v4449_v51  ;;  %v4461_v6 = vadd.f32 %v9669_v54, %v11170_v12  ;;  %v11173_v51 = vld [vmem:[#allocation25_spill] sm:$0xff]  ;;  %vm11176_vm2 = vmmov %vm11025_vm0 }
 0x387   : > { %5016 = vst.msk [vmem:[%s9234_s21 + $0x178] sm:$0xff] %vm11167_vm14, %v4450_v36  ;;  %v4464_v62 = vadd.f32 %v9678_v24, %v11173_v51  ;;  %v4466_v36 = vadd.f32 %v9684_v47, %v9598_v42  ;;  %vm11179_vm8 = vmmov %vm11025_vm0 }
 0x388   : > { %5017 = vst.msk [vmem:[%s9234_s21 + $0x180] sm:$0xff] %vm11168_vm4, %v4451_v3  ;;  %v4465_v3 = vadd.f32 %v9681_v33, %v9595_v10  ;;  %vm11180_vm12 = vmmov %vm11025_vm0 }
 0x389   : > { %5018 = vst.msk [vmem:[%s9234_s21 + $0x188] sm:$0xff] %vm11169_vm5, %v4452_v2  ;;  %v11177_v2 = vld [vmem:[#allocation3_spill] sm:$0xff]  ;;  %vm11181_vm10 = vmmov %vm11025_vm0 }
 0x38a   : > { %5019 = vst.msk [vmem:[%s9234_s21 + $0x190] sm:$0xff] %vm11174_vm15, %v4453_v34  ;;  %v4467_v51 = vmul.f32 0.25, %v11177_v2  ;;  %v4468_v34 = vmul.f32 0.25, %v11178_v48  ;;  %vm11182_vm3 = vmmov %vm11025_vm0  ;;  %v4471_v2 = vadd.f32 %v9609_v0, %v9495_v41  ;;  %v4472_v48 = vadd.f32 %v9612_v53, %v9498_v15  ;;  %v11196_v53 = vld [vmem:[#allocation109_spill] sm:$0xff] }
 0x38b   : > { %5020 = vst.msk [vmem:[%s9234_s21 + $0x198] sm:$0xff] %vm11025_vm0, %v4454_v38  ;;  %v4469_v38 = vadd.f32 %v9603_v61, %v9489_v40  ;;  %vm11184_vm7 = vmmov %vm11025_vm0  ;;  %v4473_v40 = vadd.f32 %v9615_v11, %v9509_v57  ;;  %v4474_v41 = vadd.f32 %v9618_v30, %v9512_v22  ;;  %v4478_v22 = vadd.f32 %v9630_v45, %v9532_v26 }
 0x38c   : > { %5021 = vst.msk [vmem:[%s9234_s21 + $0x1a0] sm:$0xff] %vm11175_vm1, %v4455_v8  ;;  %v11183_v8 = vld [vmem:[#allocation107_spill] sm:$0xff]  ;;  %vm11185_vm11 = vmmov %vm11025_vm0  ;;  %v4480_v0 = vadd.f32 %v9636_v27, %v9538_v23  ;;  %v4481_v26 = vadd.f32 %v9639_v20, %v9541_v58  ;;  %v4483_v23 = vadd.f32 %v9645_v5, %v9547_v14  ;;  %v4484_v11 = vadd.f32 %v9648_v32, %v9550_v4 }
 0x38d   : > { %5022 = vst.msk [vmem:[%s9234_s21 + $0x1a8] sm:$0xff] %vm11176_vm2, %v4456_v25  ;;  %v4470_v25 = vadd.f32 %v9606_v16, %v11183_v8  ;;  %vm11186_vm6 = vmmov %vm11025_vm0  ;;  %v4479_v16 = vadd.f32 %v9633_v31, %v9535_v13  ;;  %v4482_v13 = vadd.f32 %v9642_v55, %v11196_v53  ;;  %v4485_v58 = vadd.f32 %v9651_v46, %v9553_v29  ;;  %v11205_v29 = vld [vmem:[#allocation110_spill] sm:$0xff]  ;;  %v11213_v31 = vld [vmem:[#allocation112_spill] sm:$0xff] }
 0x38e   : > { %5023 = vst.msk [vmem:[%s9234_s21 + $0x1b0] sm:$0xff] %vm11179_vm8, %v4457_v56  ;;  %vm11187_vm9 = vmmov %vm11025_vm0  ;;  %v4486_v14 = vadd.f32 %v9654_v44, %v9556_v60  ;;  %v4487_v4 = vadd.f32 %v9657_v63, %v9559_v43  ;;  %v4488_v30 = vadd.f32 %v9660_v19, %v9562_v18  ;;  %v4489_v60 = vadd.f32 %v9663_v49, %v11205_v29  ;;  %v11214_v20 = vld [vmem:[#allocation23_spill] sm:$0xff]  ;;  %v11218_v46 = vld [vmem:[#allocation114_spill] sm:$0xff] }
 0x38f   : > { %5024 = vst.msk [vmem:[%s9234_s21 + $0x1b8] sm:$0xff] %vm11180_vm12, %v4458_v1  ;;  %vm11190_vm13 = vmmov %vm11025_vm0  ;;  %v4493_v27 = vadd.f32 %v9675_v17, %v11213_v31  ;;  %v4494_v55 = vadd.f32 %v9678_v24, %v11214_v20  ;;  %v4495_v5 = vadd.f32 %v9681_v33, %v11170_v12  ;;  %v4496_v32 = vadd.f32 %v9684_v47, %v11171_v35  ;;  %v11219_v63 = vld [vmem:[#allocation25_spill] sm:$0xff] }
 0x390   : > { %5025 = vst.msk [vmem:[%s9234_s21 + $0x1c0] sm:$0xff] %vm11181_vm10, %v4459_v9  ;;  %v11189_v9 = vld [vmem:[#allocation20_spill] sm:$0xff]  ;;  %vm11191_vm14 = vmmov %vm11025_vm0  ;;  %v4497_v44 = vadd.f32 %v4467_v51, %v11218_v46  ;;  %v4498_v19 = vadd.f32 %v4468_v34, %v11219_v63  ;;  %v4499_v49 = vadd.f32 %v4467_v51, %v9595_v10 }
 0x391   : > { %5026 = vst.msk [vmem:[%s9234_s21 + $0x1c8] sm:$0xff] %vm11182_vm3, %v4460_v7  ;;  %v11188_v7 = vld [vmem:[#allocation108_spill] sm:$0xff]  ;;  %v4476_v61 = vadd.f32 %v9624_v21, %v11189_v9  ;;  %vm11193_vm4 = vmmov %vm11025_vm0  ;;  %v11207_v21 = vld [vmem:[#allocation37_spill] sm:$0xff] }
 0x392   : > { %5027 = vst.msk [vmem:[%s9234_s21 + $0x1d0] sm:$0xff] %vm11184_vm7, %v4461_v6  ;;  %v4475_v15 = vadd.f32 %v9621_v59, %v11188_v7  ;;  %vm11194_vm5 = vmmov %vm11025_vm0  ;;  %v11206_v59 = vld [vmem:[#allocation21_spill] sm:$0xff]  ;;  %v4491_v18 = vadd.f32 %v9669_v54, %v11207_v21 }
 0x393   : > { %5028 = vst.msk [vmem:[%s9234_s21 + $0x1d8] sm:$0xff] %vm11185_vm11, %v4462_v37  ;;  %vm11195_vm15 = vmmov %vm11025_vm0  ;;  %v4490_v43 = vadd.f32 %v9666_v52, %v11206_v59  ;;  %v4500_v52 = vadd.f32 %v4468_v34, %v9598_v42 }
 0x394   : > { %5029 = vst.msk [vmem:[%s9234_s21 + $0x1e0] sm:$0xff] %vm11186_vm6, %v4463_v50  ;;  %vm11197_vm1 = vmmov %vm11025_vm0 }
 0x395   : > { %5030 = vst.msk [vmem:[%s9234_s21 + $0x1e8] sm:$0xff] %vm11187_vm9, %v4464_v62  ;;  %v11192_v62 = vld [vmem:[#allocation35_spill] sm:$0xff]  ;;  %vm11198_vm2 = vmmov %vm11025_vm0 }
 0x396   : > { %5031 = vst.msk [vmem:[%s9234_s21 + $0x1f0] sm:$0xff] %vm11190_vm13, %v4465_v3  ;;  %v4477_v57 = vadd.f32 %v9627_v39, %v11192_v62  ;;  %vm11199_vm8 = vmmov %vm11025_vm0  ;;  %v11208_v39 = vld [vmem:[#allocation111_spill] sm:$0xff] }
 0x397   : > { %5032 = vst.msk [vmem:[%s9234_s21 + $0x1f8] sm:$0xff] %vm11191_vm14, %v4466_v36  ;;  %vm11200_vm12 = vmmov %vm11025_vm0  ;;  %v4492_v45 = vadd.f32 %v9672_v28, %v11208_v39 }
 0x398   : > { %5065 = vst.msk [vmem:[%s9234_s21 + $0x300] sm:$0xff] %vm11193_vm4, %v4469_v38  ;;  %vm11201_vm10 = vmmov %vm11025_vm0 }
 0x399   : > { %5066 = vst.msk [vmem:[%s9234_s21 + $0x308] sm:$0xff] %vm11194_vm5, %v4470_v25  ;;  %vm11202_vm3 = vmmov %vm11025_vm0 }
 0x39a   : > { %5067 = vst.msk [vmem:[%s9234_s21 + $0x310] sm:$0xff] %vm11195_vm15, %v4471_v2  ;;  %vm11203_vm7 = vmmov %vm11025_vm0 }
 0x39b   : > { %5068 = vst.msk [vmem:[%s9234_s21 + $0x318] sm:$0xff] %vm11025_vm0, %v4472_v48  ;;  %vm11204_vm11 = vmmov %vm11025_vm0 }
 0x39c   : > { %5069 = vst.msk [vmem:[%s9234_s21 + $0x320] sm:$0xff] %vm11197_vm1, %v4473_v40  ;;  %vm11209_vm6 = vmmov %vm11025_vm0 }
 0x39d   : > { %5070 = vst.msk [vmem:[%s9234_s21 + $0x328] sm:$0xff] %vm11198_vm2, %v4474_v41  ;;  %vm11210_vm9 = vmmov %vm11025_vm0 }
 0x39e   : > { %5071 = vst.msk [vmem:[%s9234_s21 + $0x330] sm:$0xff] %vm11199_vm8, %v4475_v15  ;;  %vm11211_vm13 = vmmov %vm11025_vm0 }
 0x39f   : > { %5072 = vst.msk [vmem:[%s9234_s21 + $0x338] sm:$0xff] %vm11200_vm12, %v4476_v61  ;;  %vm11212_vm14 = vmmov %vm11025_vm0 }
 0x3a0   : > { %5073 = vst.msk [vmem:[%s9234_s21 + $0x340] sm:$0xff] %vm11201_vm10, %v4477_v57  ;;  %vm11215_vm4 = vmmov %vm11025_vm0 }
 0x3a1   : > { %5074 = vst.msk [vmem:[%s9234_s21 + $0x348] sm:$0xff] %vm11202_vm3, %v4478_v22  ;;  %vm11216_vm5 = vmmov %vm11025_vm0 }
 0x3a2   : > { %5075 = vst.msk [vmem:[%s9234_s21 + $0x350] sm:$0xff] %vm11203_vm7, %v4479_v16  ;;  %vm11217_vm15 = vmmov %vm11025_vm0 }
 0x3a3   : > { %5076 = vst.msk [vmem:[%s9234_s21 + $0x358] sm:$0xff] %vm11204_vm11, %v4480_v0  ;;  %vm11220_vm1 = vmmov %vm11025_vm0 }
 0x3a4   : > { %5077 = vst.msk [vmem:[%s9234_s21 + $0x360] sm:$0xff] %vm11209_vm6, %v4481_v26  ;;  %vm11221_vm2 = vmmov %vm11025_vm0 }
 0x3a5   : > { %5078 = vst.msk [vmem:[%s9234_s21 + $0x368] sm:$0xff] %vm11210_vm9, %v4482_v13  ;;  %vm11222_vm8 = vmmov %vm11025_vm0 }
 0x3a6   : > { %5079 = vst.msk [vmem:[%s9234_s21 + $0x370] sm:$0xff] %vm11211_vm13, %v4483_v23  ;;  %vm11223_vm12 = vmmov %vm11025_vm0 }
 0x3a7   : > { %5080 = vst.msk [vmem:[%s9234_s21 + $0x378] sm:$0xff] %vm11212_vm14, %v4484_v11  ;;  %vm11224_vm10 = vmmov %vm11025_vm0 }
 0x3a8   : > { %5081 = vst.msk [vmem:[%s9234_s21 + $0x380] sm:$0xff] %vm11215_vm4, %v4485_v58  ;;  %vm11225_vm3 = vmmov %vm11025_vm0 }
 0x3a9   : > { %5082 = vst.msk [vmem:[%s9234_s21 + $0x388] sm:$0xff] %vm11216_vm5, %v4486_v14  ;;  %vm11226_vm7 = vmmov %vm11025_vm0 }
 0x3aa   : > { %5083 = vst.msk [vmem:[%s9234_s21 + $0x390] sm:$0xff] %vm11217_vm15, %v4487_v4  ;;  %vm11227_vm11 = vmmov %vm11025_vm0 }
 0x3ab   : > { %5084 = vst.msk [vmem:[%s9234_s21 + $0x398] sm:$0xff] %vm11025_vm0, %v4488_v30  ;;  %vm11228_vm6 = vmmov %vm11025_vm0 }
 0x3ac   : > { %5085 = vst.msk [vmem:[%s9234_s21 + $0x3a0] sm:$0xff] %vm11220_vm1, %v4489_v60  ;;  %vm11229_vm9 = vmmov %vm11025_vm0 }
 0x3ad   : > { %5086 = vst.msk [vmem:[%s9234_s21 + $0x3a8] sm:$0xff] %vm11221_vm2, %v4490_v43  ;;  %vm11230_vm13 = vmmov %vm11025_vm0 }
 0x3ae   : > { %5087 = vst.msk [vmem:[%s9234_s21 + $0x3b0] sm:$0xff] %vm11222_vm8, %v4491_v18  ;;  %vm11231_vm14 = vmmov %vm11025_vm0 }
 0x3af   : > { %5088 = vst.msk [vmem:[%s9234_s21 + $0x3b8] sm:$0xff] %vm11223_vm12, %v4492_v45 }
 0x3b0   : > { %5089 = vst.msk [vmem:[%s9234_s21 + $0x3c0] sm:$0xff] %vm11224_vm10, %v4493_v27 }
 0x3b1   : > { %5090 = vst.msk [vmem:[%s9234_s21 + $0x3c8] sm:$0xff] %vm11225_vm3, %v4494_v55 }
 0x3b2   : > { %5091 = vst.msk [vmem:[%s9234_s21 + $0x3d0] sm:$0xff] %vm11226_vm7, %v4495_v5 }
 0x3b3   : > { %5092 = vst.msk [vmem:[%s9234_s21 + $0x3d8] sm:$0xff] %vm11227_vm11, %v4496_v32 }
 0x3b4   : > { %5093 = vst.msk [vmem:[%s9234_s21 + $0x3e0] sm:$0xff] %vm11228_vm6, %v4497_v44 }
 0x3b5   : > { %5094 = vst.msk [vmem:[%s9234_s21 + $0x3e8] sm:$0xff] %vm11229_vm9, %v4498_v19 }
 0x3b6   : > { %5095 = vst.msk [vmem:[%s9234_s21 + $0x3f0] sm:$0xff] %vm11230_vm13, %v4499_v49 }
 0x3b7   : > { %5096 = vst.msk [vmem:[%s9234_s21 + $0x3f8] sm:$0xff] %vm11231_vm14, %v4500_v52 }
 0x3b8 PF: > { %s14_s15 = sadd.s32 1, %s5868_s15  }
 0x3b9   : > { %p11_p4 = scmp.ge.s32.totalorder %s14_s15, 4  }
 0x3bb   :  { %13 = sbr.rel (!%p11_p4) target bundleno = 1 (0x1), region = 77 }

</bundles_post_ra>
